<compile_context>
chip_gen: v7x
topology: tpu7x:2x2x1
jax: 0.10.0
libtpu: 0.0.40
codegen_flags: <defaults>
</compile_context>

<pallas_src>
import functools
import math

import jax
import jax.numpy as jnp
from jax.experimental import pallas as pl
from jax.experimental.pallas import tpu as pltpu

# ----------------------------- small BERT config -----------------------------
VOCAB = 100
TYPE_VOCAB = 2
MAX_POS = 32
B, S, H = 2, 8, 32           # batch, seq, hidden
M = B * S                    # flattened tokens per tower (16)
N_HEADS = 4
HEAD_DIM = H // N_HEADS      # 8
MS = N_HEADS * M             # head-stacked rows (64)
INTER = 64                   # FFN intermediate size
N_LAYERS = 2
OUT_DIM = 16                 # params['out_dim'] of the additional linear
LN_EPS = 1e-12
NEG_BIAS = -10000.0          # BERT extended-attention-mask bias

# power-of-two shift helpers for in-kernel structural masks (no vector div/mod)
assert M & (M - 1) == 0 and S & (S - 1) == 0 and HEAD_DIM & (HEAD_DIM - 1) == 0
assert B & (B - 1) == 0
LOG_M = M.bit_length() - 1
LOG_S = S.bit_length() - 1
LOG_D = HEAD_DIM.bit_length() - 1


# ------------------------------- fused tower kernel ---------------------------
def _tower_kernel(emb_ref, maskrow_ref, eg_ref, eb_ref,
                  wq_ref, bq_ref, wk_ref, bk_ref, wv_ref, bv_ref,
                  wo_ref, bo_ref, ln1g_ref, ln1b_ref,
                  w1_ref, b1_ref, w2_ref, b2_ref, ln2g_ref, ln2b_ref,
                  wp_ref, bp_ref, wa_ref, ba_ref, o_ref):
    """Full BertEncoder tower(s); leading ref dim = towers handled this step."""

    def mm(x, w):
        # bf16 MXU inputs, f32 accumulation. Weights are pre-cast to bf16 on the
        # XLA side, so the astype is a no-op for them (no in-kernel weight cast).
        return jnp.dot(x.astype(jnp.bfloat16), w.astype(jnp.bfloat16),
                       preferred_element_type=jnp.float32)

    def ln(x, g, b):
        mu = jnp.mean(x, axis=-1, keepdims=True)
        xc = x - mu
        var = jnp.mean(xc * xc, axis=-1, keepdims=True)
        return xc * jax.lax.rsqrt(var + LN_EPS) * g + b

    def gelu(x):
        # TODO(synk): BERT uses erf-based GELU; tanh approximation (EUP) used here.
        c = math.sqrt(2.0 / math.pi)
        return 0.5 * x * (1.0 + jnp.tanh(c * (x + 0.044715 * x * x * x)))

    # ---- static structural masks (tower/layer independent; built once) ----
    # stacked row/col index r = head * M + token ; token = batch * S + pos
    rr = jax.lax.broadcasted_iota(jnp.int32, (MS, MS), 0)
    cc = jax.lax.broadcasted_iota(jnp.int32, (MS, MS), 1)
    same_head = (rr >> LOG_M) == (cc >> LOG_M)
    same_batch = (((rr >> LOG_S) & (B - 1)) == ((cc >> LOG_S) & (B - 1)))
    struct_ok = jnp.logical_and(same_head, same_batch)               # (MS, MS)

    hr = jax.lax.broadcasted_iota(jnp.int32, (MS, H), 0)
    hc = jax.lax.broadcasted_iota(jnp.int32, (MS, H), 1)
    head_mask = ((hc >> LOG_D) == (hr >> LOG_M)).astype(jnp.float32)  # (MS, H)

    n_towers = emb_ref.shape[0]
    for t in range(n_towers):                       # static (1 when gridded, T when folded)
        # Additive attention bias built in-kernel from the small key-mask row:
        # block-diagonal over heads and batches + key padding.
        key_ok = maskrow_ref[t] > 0.5                                  # (1, MS)
        bias = jnp.where(jnp.logical_and(struct_ok, key_ok), 0.0, NEG_BIAS)

        h = ln(emb_ref[t], eg_ref[t], eb_ref[t])                       # embeddings LN, (M, H)

        for li in range(N_LAYERS):                  # static unroll, VMEM-resident
            # Heads stacked on the sublane axis: row r = head*M + token.
            x_rep = jnp.concatenate([h] * N_HEADS, axis=0)             # (MS, H), aligned copies
            q = mm(x_rep, wq_ref[t, li]) + bq_ref[t, li]               # 1/sqrt(d) folded XLA-side
            k = (mm(x_rep, wk_ref[t, li]) + bk_ref[t, li]) * head_mask
            v = (mm(x_rep, wv_ref[t, li]) + bv_ref[t, li]) * head_mask

            # ONE (MS,MS) score matmul: K rows are zeroed outside their head's
            # lanes, so diagonal head-blocks equal Q_h K_h^T; off-diagonal
            # blocks are garbage but killed by `bias`.
            s = jax.lax.dot_general(q.astype(jnp.bfloat16), k.astype(jnp.bfloat16),
                                    (((1,), (1,)), ((), ())),
                                    preferred_element_type=jnp.float32) + bias
            mrow = jnp.max(s, axis=-1, keepdims=True)
            p = jnp.exp(s - mrow)
            p = p * pl.reciprocal(jnp.sum(p, axis=-1, keepdims=True), approx=True)

            # Per-head V @ Wo in stacked form: v rows are zero outside their own
            # head's lanes, so the full (H,H) Wo contraction picks exactly that
            # head's Wo rows.
            vw = mm(v, wo_ref[t, li])                                  # (MS, H)
            # Cross-head probabilities are exactly 0 (exp(-1e4) underflows), so
            # folding the stacked rows yields the (M, MS) per-head prob matrix.
            p_fold = (p[0 * M:1 * M] + p[1 * M:2 * M]
                      + p[2 * M:3 * M] + p[3 * M:4 * M])               # (M, MS), aligned slices
            attn = mm(p_fold, vw) + bo_ref[t, li]                      # == concat-heads @ Wo
            h = ln(attn + h, ln1g_ref[t, li], ln1b_ref[t, li])         # add & norm

            ffn = gelu(mm(h, w1_ref[t, li]) + b1_ref[t, li])
            h = ln(mm(ffn, w2_ref[t, li]) + b2_ref[t, li] + h,
                   ln2g_ref[t, li], ln2b_ref[t, li])                   # add & norm

        # Pooler on the CLS token of each sequence: rows b*S are sublane-aligned
        # (multiples of 8) -> direct row reads, no one-hot matmul.
        cls = jnp.concatenate([h[b * S:b * S + 1, :] for b in range(B)], axis=0)  # (B, H)
        pooled = jnp.tanh(mm(cls, wp_ref[t]) + bp_ref[t])              # BERT pooler
        # add_linear=True path: dropout (eval -> identity) + additional_linear
        out = mm(pooled, wa_ref[t]) + ba_ref[t]                        # (B, OUT_DIM)
        o_ref[t] = out.astype(o_ref.dtype)


# ------------------------------ parameter setup -------------------------------
def init_bert_encoder_params(key):
    def nrm(k, shape, scale=0.02):
        return scale * jax.random.normal(k, shape, dtype=jnp.float32)

    keys = jax.random.split(key, 8 + N_LAYERS)
    p = {
        "word_emb": nrm(keys[0], (VOCAB, H)),
        "pos_emb": nrm(keys[1], (MAX_POS, H)),
        "type_emb": nrm(keys[2], (TYPE_VOCAB, H)),
        "emb_ln_g": jnp.ones((H,), jnp.float32),
        "emb_ln_b": jnp.zeros((H,), jnp.float32),
        "wp": nrm(keys[3], (H, H)),            # pooler
        "bp": jnp.zeros((H,), jnp.float32),
        "wa": nrm(keys[4], (H, OUT_DIM)),      # additional_linear (add_linear=True)
        "ba": jnp.zeros((OUT_DIM,), jnp.float32),
        "layers": [],
    }
    for li in range(N_LAYERS):
        lk = jax.random.split(keys[8 + li], 6)
        p["layers"].append({
            "wq": nrm(lk[0], (H, H)), "bq": jnp.zeros((H,), jnp.float32),
            "wk": nrm(lk[1], (H, H)), "bk": jnp.zeros((H,), jnp.float32),
            "wv": nrm(lk[2], (H, H)), "bv": jnp.zeros((H,), jnp.float32),
            "wo": nrm(lk[3], (H, H)), "bo": jnp.zeros((H,), jnp.float32),
            "ln1_g": jnp.ones((H,), jnp.float32), "ln1_b": jnp.zeros((H,), jnp.float32),
            "w1": nrm(lk[4], (H, INTER)), "b1": jnp.zeros((INTER,), jnp.float32),
            "w2": nrm(lk[5], (INTER, H)), "b2": jnp.zeros((H,), jnp.float32),
            "ln2_g": jnp.ones((H,), jnp.float32), "ln2_b": jnp.zeros((H,), jnp.float32),
        })
    return p


@functools.lru_cache(maxsize=None)
def _towers_parallel_grid():
    """v7x has 2 TensorCores/chip: keep towers on a 'parallel' grid axis.
    Single-TC chips (v5e/v6e): fold both towers into one grid step (avoids the
    second pipeline step's fixed overhead and a second weight-DMA wave)."""
    try:
        kind = jax.devices()[0].device_kind.lower()
    except Exception:
        return True
    return ("v7" in kind) or ("7x" in kind)


# ------------------------- fused forward (all towers, one jit) -----------------
@jax.jit
def _fused_forward(tower_params, token_idx, segment_idx, mask):
    """tower_params: tuple of per-tower param dicts.
    token_idx/segment_idx/mask: (T, B, S). Returns (T, B, OUT_DIM)."""
    T = token_idx.shape[0]
    scale = 1.0 / math.sqrt(HEAD_DIM)
    bf = lambda x: x.astype(jnp.bfloat16)          # pre-cast weights (halves DMA/VMEM)

    def tstack(fn):
        return jnp.stack([fn(p) for p in tower_params], axis=0)

    def lstack(fn):
        return jnp.stack(
            [jnp.stack([fn(l) for l in p["layers"]], axis=0) for p in tower_params],
            axis=0)

    stacked = (
        tstack(lambda p: p["emb_ln_g"].reshape(1, H)),
        tstack(lambda p: p["emb_ln_b"].reshape(1, H)),
        lstack(lambda l: bf(l["wq"] * scale)),                 # 1/sqrt(d) folded into Q proj
        lstack(lambda l: (l["bq"] * scale).reshape(1, H)),
        lstack(lambda l: bf(l["wk"])),
        lstack(lambda l: l["bk"].reshape(1, H)),
        lstack(lambda l: bf(l["wv"])),
        lstack(lambda l: l["bv"].reshape(1, H)),
        lstack(lambda l: bf(l["wo"])),
        lstack(lambda l: l["bo"].reshape(1, H)),
        lstack(lambda l: l["ln1_g"].reshape(1, H)),
        lstack(lambda l: l["ln1_b"].reshape(1, H)),
        lstack(lambda l: bf(l["w1"])),
        lstack(lambda l: l["b1"].reshape(1, INTER)),
        lstack(lambda l: bf(l["w2"])),
        lstack(lambda l: l["b2"].reshape(1, H)),
        lstack(lambda l: l["ln2_g"].reshape(1, H)),
        lstack(lambda l: l["ln2_b"].reshape(1, H)),
        tstack(lambda p: bf(p["wp"])),
        tstack(lambda p: p["bp"].reshape(1, H)),
        tstack(lambda p: bf(p["wa"])),
        tstack(lambda p: p["ba"].reshape(1, OUT_DIM)),
    )

    # Embedding gather (XLA glue); the add + LayerNorm happen inside the kernel.
    def embed(we, pe, te, tok, seg):
        return we[tok] + pe[jnp.arange(S)][None, :, :] + te[seg]
    emb = jax.vmap(embed)(tstack(lambda p: p["word_emb"]),
                          tstack(lambda p: p["pos_emb"]),
                          tstack(lambda p: p["type_emb"]),
                          token_idx, segment_idx)
    emb = emb.reshape(T, M, H).astype(jnp.float32)

    # Small (T, 1, N_HEADS*M) key-padding row; the full (MS, MS) additive bias
    # is built inside the kernel (no O((B*S)^2) HBM tensor / DMA).
    maskrow = jnp.tile(mask.reshape(T, 1, M).astype(jnp.float32), (1, 1, N_HEADS))

    parallel = bool(_towers_parallel_grid()) and T > 1

    def spec(*dims):
        nd = len(dims)
        if parallel:
            return pl.BlockSpec((1,) + dims, lambda t, nd=nd: (t,) + (0,) * nd)
        return pl.BlockSpec((T,) + dims, lambda t, nd=nd: (0,) * (nd + 1))

    L = N_LAYERS
    in_specs = [
        spec(M, H),                            # embeddings
        spec(1, MS),                           # key mask row
        spec(1, H), spec(1, H),                # embedding LN
        spec(L, H, H), spec(L, 1, H),          # Wq, bq
        spec(L, H, H), spec(L, 1, H),          # Wk, bk
        spec(L, H, H), spec(L, 1, H),          # Wv, bv
        spec(L, H, H), spec(L, 1, H),          # Wo, bo
        spec(L, 1, H), spec(L, 1, H),          # LN1
        spec(L, H, INTER), spec(L, 1, INTER),  # FFN up
        spec(L, INTER, H), spec(L, 1, H),      # FFN down
        spec(L, 1, H), spec(L, 1, H),          # LN2
        spec(H, H), spec(1, H),                # pooler
        spec(H, OUT_DIM), spec(1, OUT_DIM),    # additional linear
    ]

    return pl.pallas_call(
        _tower_kernel,
        out_shape=jax.ShapeDtypeStruct((T, B, OUT_DIM), jnp.float32),
        grid=(T,) if parallel else (1,),
        in_specs=in_specs,
        out_specs=spec(B, OUT_DIM),
        compiler_params=pltpu.CompilerParams(
            dimension_semantics=("parallel",) if parallel else ("arbitrary",)),
    )(emb, maskrow, *stacked)


# ------------------------------ BiEncoderModule -------------------------------
def biencoder_forward(params_ctxt, params_cand,
                      token_idx_ctxt, segment_idx_ctxt, mask_ctxt,
                      token_idx_cands, segment_idx_cands, mask_cands):
    towers, toks, segs, masks, names = [], [], [], [], []
    if token_idx_ctxt is not None:
        towers.append(params_ctxt); toks.append(token_idx_ctxt)
        segs.append(segment_idx_ctxt); masks.append(mask_ctxt); names.append("ctxt")
    if token_idx_cands is not None:
        towers.append(params_cand); toks.append(token_idx_cands)
        segs.append(segment_idx_cands); masks.append(mask_cands); names.append("cand")
    if not towers:
        return None, None

    out = _fused_forward(
        tuple(towers),
        jnp.stack(toks).astype(jnp.int32),
        jnp.stack(segs).astype(jnp.int32),
        jnp.stack([m.astype(jnp.float32) for m in masks]))

    result = {"ctxt": None, "cand": None}
    for i, n in enumerate(names):
        result[n] = out[i]
    return result["ctxt"], result["cand"]


# ------------------------------------ main -------------------------------------
if __name__ == "__main__":
    root = jax.random.PRNGKey(0)
    k_ctxt, k_cand, k_tok1, k_tok2 = jax.random.split(root, 4)

    params_ctxt = init_bert_encoder_params(k_ctxt)
    params_cand = init_bert_encoder_params(k_cand)

    token_idx_ctxt = jax.random.randint(k_tok1, (B, S), 0, VOCAB, dtype=jnp.int32)
    token_idx_cands = jax.random.randint(k_tok2, (B, S), 0, VOCAB, dtype=jnp.int32)
    segment_idx_ctxt = jnp.zeros((B, S), jnp.int32)
    segment_idx_cands = jnp.zeros((B, S), jnp.int32)
    # second context example has two padding positions
    mask_ctxt = jnp.array([[1] * S, [1] * (S - 2) + [0, 0]], jnp.float32)
    mask_cands = jnp.ones((B, S), jnp.float32)

    emb_ctxt, emb_cands = biencoder_forward(
        params_ctxt, params_cand,
        token_idx_ctxt, segment_idx_ctxt, mask_ctxt,
        token_idx_cands, segment_idx_cands, mask_cands)

    jax.block_until_ready((emb_ctxt, emb_cands))
    assert emb_ctxt.shape == (B, OUT_DIM) and emb_cands.shape == (B, OUT_DIM)
    assert jnp.all(jnp.isfinite(emb_ctxt)) and jnp.all(jnp.isfinite(emb_cands))
    print("KERNEL_OK")
</pallas_src>

<mosaic_0001>
module attributes {stable_mosaic.version = 11 : i64} {
  func.func @_tower_kernel(%arg0: i32, %arg1: memref<2x16x32xf32, #tpu.memory_space<vmem>>, %arg2: memref<2x1x64xf32, #tpu.memory_space<vmem>>, %arg3: memref<2x1x32xf32, #tpu.memory_space<vmem>>, %arg4: memref<2x1x32xf32, #tpu.memory_space<vmem>>, %arg5: memref<2x2x32x32xbf16, #tpu.memory_space<vmem>>, %arg6: memref<2x2x1x32xf32, #tpu.memory_space<vmem>>, %arg7: memref<2x2x32x32xbf16, #tpu.memory_space<vmem>>, %arg8: memref<2x2x1x32xf32, #tpu.memory_space<vmem>>, %arg9: memref<2x2x32x32xbf16, #tpu.memory_space<vmem>>, %arg10: memref<2x2x1x32xf32, #tpu.memory_space<vmem>>, %arg11: memref<2x2x32x32xbf16, #tpu.memory_space<vmem>>, %arg12: memref<2x2x1x32xf32, #tpu.memory_space<vmem>>, %arg13: memref<2x2x1x32xf32, #tpu.memory_space<vmem>>, %arg14: memref<2x2x1x32xf32, #tpu.memory_space<vmem>>, %arg15: memref<2x2x32x64xbf16, #tpu.memory_space<vmem>>, %arg16: memref<2x2x1x64xf32, #tpu.memory_space<vmem>>, %arg17: memref<2x2x64x32xbf16, #tpu.memory_space<vmem>>, %arg18: memref<2x2x1x32xf32, #tpu.memory_space<vmem>>, %arg19: memref<2x2x1x32xf32, #tpu.memory_space<vmem>>, %arg20: memref<2x2x1x32xf32, #tpu.memory_space<vmem>>, %arg21: memref<2x32x32xbf16, #tpu.memory_space<vmem>>, %arg22: memref<2x1x32xf32, #tpu.memory_space<vmem>>, %arg23: memref<2x32x16xbf16, #tpu.memory_space<vmem>>, %arg24: memref<2x1x16xf32, #tpu.memory_space<vmem>>, %arg25: memref<2x2x16xf32, #tpu.memory_space<vmem>>) attributes {dimension_semantics = [#tpu.dimension_semantics<arbitrary>], iteration_bounds = array<i64: 1>, scalar_prefetch = 0 : i64, scratch_operands = 0 : i64, tpu.core_type = #tpu.core_type<tc>, window_params = [{pipeline_mode = #tpu.pipeline_mode<synchronous>, transform_indices = @transform_0, window_bounds = array<i64: 2, 16, 32>}, {pipeline_mode = #tpu.pipeline_mode<synchronous>, transform_indices = @transform_1, window_bounds = array<i64: 2, 1, 64>}, {pipeline_mode = #tpu.pipeline_mode<synchronous>, transform_indices = @transform_2, window_bounds = array<i64: 2, 1, 32>}, {pipeline_mode = #tpu.pipeline_mode<synchronous>, transform_indices = @transform_3, window_bounds = array<i64: 2, 1, 32>}, {pipeline_mode = #tpu.pipeline_mode<synchronous>, transform_indices = @transform_4, window_bounds = array<i64: 2, 2, 32, 32>}, {pipeline_mode = #tpu.pipeline_mode<synchronous>, transform_indices = @transform_5, window_bounds = array<i64: 2, 2, 1, 32>}, {pipeline_mode = #tpu.pipeline_mode<synchronous>, transform_indices = @transform_6, window_bounds = array<i64: 2, 2, 32, 32>}, {pipeline_mode = #tpu.pipeline_mode<synchronous>, transform_indices = @transform_7, window_bounds = array<i64: 2, 2, 1, 32>}, {pipeline_mode = #tpu.pipeline_mode<synchronous>, transform_indices = @transform_8, window_bounds = array<i64: 2, 2, 32, 32>}, {pipeline_mode = #tpu.pipeline_mode<synchronous>, transform_indices = @transform_9, window_bounds = array<i64: 2, 2, 1, 32>}, {pipeline_mode = #tpu.pipeline_mode<synchronous>, transform_indices = @transform_10, window_bounds = array<i64: 2, 2, 32, 32>}, {pipeline_mode = #tpu.pipeline_mode<synchronous>, transform_indices = @transform_11, window_bounds = array<i64: 2, 2, 1, 32>}, {pipeline_mode = #tpu.pipeline_mode<synchronous>, transform_indices = @transform_12, window_bounds = array<i64: 2, 2, 1, 32>}, {pipeline_mode = #tpu.pipeline_mode<synchronous>, transform_indices = @transform_13, window_bounds = array<i64: 2, 2, 1, 32>}, {pipeline_mode = #tpu.pipeline_mode<synchronous>, transform_indices = @transform_14, window_bounds = array<i64: 2, 2, 32, 64>}, {pipeline_mode = #tpu.pipeline_mode<synchronous>, transform_indices = @transform_15, window_bounds = array<i64: 2, 2, 1, 64>}, {pipeline_mode = #tpu.pipeline_mode<synchronous>, transform_indices = @transform_16, window_bounds = array<i64: 2, 2, 64, 32>}, {pipeline_mode = #tpu.pipeline_mode<synchronous>, transform_indices = @transform_17, window_bounds = array<i64: 2, 2, 1, 32>}, {pipeline_mode = #tpu.pipeline_mode<synchronous>, transform_indices = @transform_18, window_bounds = array<i64: 2, 2, 1, 32>}, {pipeline_mode = #tpu.pipeline_mode<synchronous>, transform_indices = @transform_19, window_bounds = array<i64: 2, 2, 1, 32>}, {pipeline_mode = #tpu.pipeline_mode<synchronous>, transform_indices = @transform_20, window_bounds = array<i64: 2, 32, 32>}, {pipeline_mode = #tpu.pipeline_mode<synchronous>, transform_indices = @transform_21, window_bounds = array<i64: 2, 1, 32>}, {pipeline_mode = #tpu.pipeline_mode<synchronous>, transform_indices = @transform_22, window_bounds = array<i64: 2, 32, 16>}, {pipeline_mode = #tpu.pipeline_mode<synchronous>, transform_indices = @transform_23, window_bounds = array<i64: 2, 1, 16>}, {pipeline_mode = #tpu.pipeline_mode<synchronous>, transform_indices = @transform_24, window_bounds = array<i64: 2, 2, 16>}]} {
    %0 = tpu.iota {dimensions = array<i32: 0>} : vector<64x64xi32>
    %1 = tpu.iota {dimensions = array<i32: 1>} : vector<64x64xi32>
    %c4_i32 = arith.constant 4 : i32
    %2 = vector.broadcast %c4_i32 : i32 to vector<64x64xi32>
    %3 = arith.shrsi %0, %2 : vector<64x64xi32>
    %c4_i32_0 = arith.constant 4 : i32
    %4 = vector.broadcast %c4_i32_0 : i32 to vector<64x64xi32>
    %5 = arith.shrsi %1, %4 : vector<64x64xi32>
    %6 = arith.cmpi eq, %3, %5 : vector<64x64xi32>
    %c3_i32 = arith.constant 3 : i32
    %7 = vector.broadcast %c3_i32 : i32 to vector<64x64xi32>
    %8 = arith.shrsi %0, %7 : vector<64x64xi32>
    %c1_i32 = arith.constant 1 : i32
    %9 = vector.broadcast %c1_i32 : i32 to vector<64x64xi32>
    %10 = arith.andi %8, %9 : vector<64x64xi32>
    %c3_i32_1 = arith.constant 3 : i32
    %11 = vector.broadcast %c3_i32_1 : i32 to vector<64x64xi32>
    %12 = arith.shrsi %1, %11 : vector<64x64xi32>
    %c1_i32_2 = arith.constant 1 : i32
    %13 = vector.broadcast %c1_i32_2 : i32 to vector<64x64xi32>
    %14 = arith.andi %12, %13 : vector<64x64xi32>
    %15 = arith.cmpi eq, %10, %14 : vector<64x64xi32>
    %16 = arith.andi %6, %15 : vector<64x64xi1>
    %17 = tpu.iota {dimensions = array<i32: 0>} : vector<64x32xi32>
    %18 = tpu.iota {dimensions = array<i32: 1>} : vector<64x32xi32>
    %c3_i32_3 = arith.constant 3 : i32
    %19 = vector.broadcast %c3_i32_3 : i32 to vector<64x32xi32>
    %20 = arith.shrsi %18, %19 : vector<64x32xi32>
    %c4_i32_4 = arith.constant 4 : i32
    %21 = vector.broadcast %c4_i32_4 : i32 to vector<64x32xi32>
    %22 = arith.shrsi %17, %21 : vector<64x32xi32>
    %23 = arith.cmpi eq, %20, %22 : vector<64x32xi32>
    %24 = arith.extui %23 : vector<64x32xi1> to vector<64x32xi32>
    %25 = arith.sitofp %24 : vector<64x32xi32> to vector<64x32xf32>
    %c0 = arith.constant 0 : index
    %c0_5 = arith.constant 0 : index
    %c0_6 = arith.constant 0 : index
    %26 = vector.load %arg2[%c0, %c0_5, %c0_6] : memref<2x1x64xf32, #tpu.memory_space<vmem>>, vector<1x1x64xf32>
    %27 = vector.shape_cast %26 : vector<1x1x64xf32> to vector<1x64xf32>
    %cst = arith.constant 5.000000e-01 : f32
    %28 = vector.broadcast %cst : f32 to vector<1x64xf32>
    %29 = arith.cmpf ogt, %27, %28 : vector<1x64xf32>
    %30 = vector.broadcast %29 : vector<1x64xi1> to vector<64x64xi1>
    %31 = arith.andi %16, %30 : vector<64x64xi1>
    %cst_7 = arith.constant 0.000000e+00 : f32
    %cst_8 = arith.constant -1.000000e+04 : f32
    %32 = vector.broadcast %cst_7 : f32 to vector<64x64xf32>
    %33 = vector.broadcast %cst_8 : f32 to vector<64x64xf32>
    %34 = arith.select %31, %32, %33 : vector<64x64xi1>, vector<64x64xf32>
    %c0_9 = arith.constant 0 : index
    %c0_10 = arith.constant 0 : index
    %c0_11 = arith.constant 0 : index
    %35 = vector.load %arg1[%c0_9, %c0_10, %c0_11] : memref<2x16x32xf32, #tpu.memory_space<vmem>>, vector<1x16x32xf32>
    %36 = vector.shape_cast %35 : vector<1x16x32xf32> to vector<16x32xf32>
    %c0_12 = arith.constant 0 : index
    %c0_13 = arith.constant 0 : index
    %c0_14 = arith.constant 0 : index
    %37 = vector.load %arg3[%c0_12, %c0_13, %c0_14] : memref<2x1x32xf32, #tpu.memory_space<vmem>>, vector<1x1x32xf32>
    %38 = vector.shape_cast %37 : vector<1x1x32xf32> to vector<1x32xf32>
    %c0_15 = arith.constant 0 : index
    %c0_16 = arith.constant 0 : index
    %c0_17 = arith.constant 0 : index
    %39 = vector.load %arg4[%c0_15, %c0_16, %c0_17] : memref<2x1x32xf32, #tpu.memory_space<vmem>>, vector<1x1x32xf32>
    %40 = vector.shape_cast %39 : vector<1x1x32xf32> to vector<1x32xf32>
    %cst_18 = arith.constant dense<0.000000e+00> : vector<16xf32>
    %41 = vector.multi_reduction <add>, %36, %cst_18 [1] : vector<16x32xf32> to vector<16xf32>
    %42 = vector.shape_cast %41 : vector<16xf32> to vector<16x1xf32>
    %cst_19 = arith.constant 3.200000e+01 : f32
    %43 = vector.broadcast %cst_19 : f32 to vector<16x1xf32>
    %44 = arith.divf %42, %43 : vector<16x1xf32>
    %45 = vector.broadcast %44 : vector<16x1xf32> to vector<16x32xf32>
    %46 = arith.subf %36, %45 : vector<16x32xf32>
    %47 = arith.mulf %46, %46 : vector<16x32xf32>
    %cst_20 = arith.constant dense<0.000000e+00> : vector<16xf32>
    %48 = vector.multi_reduction <add>, %47, %cst_20 [1] : vector<16x32xf32> to vector<16xf32>
    %49 = vector.shape_cast %48 : vector<16xf32> to vector<16x1xf32>
    %cst_21 = arith.constant 3.200000e+01 : f32
    %50 = vector.broadcast %cst_21 : f32 to vector<16x1xf32>
    %51 = arith.divf %49, %50 : vector<16x1xf32>
    %cst_22 = arith.constant 9.99999996E-13 : f32
    %52 = vector.broadcast %cst_22 : f32 to vector<16x1xf32>
    %53 = arith.addf %51, %52 : vector<16x1xf32>
    %54 = math.rsqrt %53 : vector<16x1xf32>
    %55 = vector.broadcast %54 : vector<16x1xf32> to vector<16x32xf32>
    %56 = arith.mulf %46, %55 : vector<16x32xf32>
    %57 = vector.broadcast %38 : vector<1x32xf32> to vector<16x32xf32>
    %58 = arith.mulf %56, %57 : vector<16x32xf32>
    %59 = vector.broadcast %40 : vector<1x32xf32> to vector<16x32xf32>
    %60 = arith.addf %58, %59 : vector<16x32xf32>
    %61 = tpu.concatenate %60, %60, %60, %60 in 0 : vector<16x32xf32>, vector<16x32xf32>, vector<16x32xf32>, vector<16x32xf32> -> vector<64x32xf32>
    %c0_23 = arith.constant 0 : index
    %c0_24 = arith.constant 0 : index
    %c0_25 = arith.constant 0 : index
    %c0_26 = arith.constant 0 : index
    %62 = vector.load %arg5[%c0_23, %c0_24, %c0_25, %c0_26] : memref<2x2x32x32xbf16, #tpu.memory_space<vmem>>, vector<1x1x32x32xbf16>
    %63 = vector.shape_cast %62 : vector<1x1x32x32xbf16> to vector<32x32xbf16>
    %64 = arith.truncf %61 : vector<64x32xf32> to vector<64x32xbf16>
    %cst_27 = arith.constant dense<0.000000e+00> : vector<64x32xf32>
    %65 = tpu.matmul %64, %63, %cst_27 {dimension_numbers = #tpu.dot_dimension_numbers<[1], [0], [0], [1], [0, 0, 1, 1], [], []>} : vector<64x32xbf16>, vector<32x32xbf16>, vector<64x32xf32> -> vector<64x32xf32>
    %c0_28 = arith.constant 0 : index
    %c0_29 = arith.constant 0 : index
    %c0_30 = arith.constant 0 : index
    %c0_31 = arith.constant 0 : index
    %66 = vector.load %arg6[%c0_28, %c0_29, %c0_30, %c0_31] : memref<2x2x1x32xf32, #tpu.memory_space<vmem>>, vector<1x1x1x32xf32>
    %67 = vector.shape_cast %66 : vector<1x1x1x32xf32> to vector<1x32xf32>
    %68 = vector.broadcast %67 : vector<1x32xf32> to vector<64x32xf32>
    %69 = arith.addf %65, %68 : vector<64x32xf32>
    %c0_32 = arith.constant 0 : index
    %c0_33 = arith.constant 0 : index
    %c0_34 = arith.constant 0 : index
    %c0_35 = arith.constant 0 : index
    %70 = vector.load %arg7[%c0_32, %c0_33, %c0_34, %c0_35] : memref<2x2x32x32xbf16, #tpu.memory_space<vmem>>, vector<1x1x32x32xbf16>
    %71 = vector.shape_cast %70 : vector<1x1x32x32xbf16> to vector<32x32xbf16>
    %72 = arith.truncf %61 : vector<64x32xf32> to vector<64x32xbf16>
    %cst_36 = arith.constant dense<0.000000e+00> : vector<64x32xf32>
    %73 = tpu.matmul %72, %71, %cst_36 {dimension_numbers = #tpu.dot_dimension_numbers<[1], [0], [0], [1], [0, 0, 1, 1], [], []>} : vector<64x32xbf16>, vector<32x32xbf16>, vector<64x32xf32> -> vector<64x32xf32>
    %c0_37 = arith.constant 0 : index
    %c0_38 = arith.constant 0 : index
    %c0_39 = arith.constant 0 : index
    %c0_40 = arith.constant 0 : index
    %74 = vector.load %arg8[%c0_37, %c0_38, %c0_39, %c0_40] : memref<2x2x1x32xf32, #tpu.memory_space<vmem>>, vector<1x1x1x32xf32>
    %75 = vector.shape_cast %74 : vector<1x1x1x32xf32> to vector<1x32xf32>
    %76 = vector.broadcast %75 : vector<1x32xf32> to vector<64x32xf32>
    %77 = arith.addf %73, %76 : vector<64x32xf32>
    %78 = arith.mulf %77, %25 : vector<64x32xf32>
    %c0_41 = arith.constant 0 : index
    %c0_42 = arith.constant 0 : index
    %c0_43 = arith.constant 0 : index
    %c0_44 = arith.constant 0 : index
    %79 = vector.load %arg9[%c0_41, %c0_42, %c0_43, %c0_44] : memref<2x2x32x32xbf16, #tpu.memory_space<vmem>>, vector<1x1x32x32xbf16>
    %80 = vector.shape_cast %79 : vector<1x1x32x32xbf16> to vector<32x32xbf16>
    %81 = arith.truncf %61 : vector<64x32xf32> to vector<64x32xbf16>
    %cst_45 = arith.constant dense<0.000000e+00> : vector<64x32xf32>
    %82 = tpu.matmul %81, %80, %cst_45 {dimension_numbers = #tpu.dot_dimension_numbers<[1], [0], [0], [1], [0, 0, 1, 1], [], []>} : vector<64x32xbf16>, vector<32x32xbf16>, vector<64x32xf32> -> vector<64x32xf32>
    %c0_46 = arith.constant 0 : index
    %c0_47 = arith.constant 0 : index
    %c0_48 = arith.constant 0 : index
    %c0_49 = arith.constant 0 : index
    %83 = vector.load %arg10[%c0_46, %c0_47, %c0_48, %c0_49] : memref<2x2x1x32xf32, #tpu.memory_space<vmem>>, vector<1x1x1x32xf32>
    %84 = vector.shape_cast %83 : vector<1x1x1x32xf32> to vector<1x32xf32>
    %85 = vector.broadcast %84 : vector<1x32xf32> to vector<64x32xf32>
    %86 = arith.addf %82, %85 : vector<64x32xf32>
    %87 = arith.mulf %86, %25 : vector<64x32xf32>
    %88 = arith.truncf %69 : vector<64x32xf32> to vector<64x32xbf16>
    %89 = arith.truncf %78 : vector<64x32xf32> to vector<64x32xbf16>
    %cst_50 = arith.constant dense<0.000000e+00> : vector<64x64xf32>
    %90 = tpu.matmul %88, %89, %cst_50 {dimension_numbers = #tpu.dot_dimension_numbers<[1], [1], [0], [0], [0, 0, 1, 0], [], []>} : vector<64x32xbf16>, vector<64x32xbf16>, vector<64x64xf32> -> vector<64x64xf32>
    %91 = arith.addf %90, %34 : vector<64x64xf32>
    %cst_51 = arith.constant dense<0xFF800000> : vector<64xf32>
    %92 = vector.multi_reduction <maximumf>, %91, %cst_51 [1] : vector<64x64xf32> to vector<64xf32>
    %93 = vector.shape_cast %92 : vector<64xf32> to vector<64x1xf32>
    %94 = vector.broadcast %93 : vector<64x1xf32> to vector<64x64xf32>
    %95 = arith.subf %91, %94 : vector<64x64xf32>
    %96 = math.exp %95 : vector<64x64xf32>
    %cst_52 = arith.constant dense<0.000000e+00> : vector<64xf32>
    %97 = vector.multi_reduction <add>, %96, %cst_52 [1] : vector<64x64xf32> to vector<64xf32>
    %98 = vector.shape_cast %97 : vector<64xf32> to vector<64x1xf32>
    %99 = tpu.reciprocal %98 {approx = true} : vector<64x1xf32> -> vector<64x1xf32>
    %100 = vector.broadcast %99 : vector<64x1xf32> to vector<64x64xf32>
    %101 = arith.mulf %96, %100 : vector<64x64xf32>
    %c0_53 = arith.constant 0 : index
    %c0_54 = arith.constant 0 : index
    %c0_55 = arith.constant 0 : index
    %c0_56 = arith.constant 0 : index
    %102 = vector.load %arg11[%c0_53, %c0_54, %c0_55, %c0_56] : memref<2x2x32x32xbf16, #tpu.memory_space<vmem>>, vector<1x1x32x32xbf16>
    %103 = vector.shape_cast %102 : vector<1x1x32x32xbf16> to vector<32x32xbf16>
    %104 = arith.truncf %87 : vector<64x32xf32> to vector<64x32xbf16>
    %cst_57 = arith.constant dense<0.000000e+00> : vector<64x32xf32>
    %105 = tpu.matmul %104, %103, %cst_57 {dimension_numbers = #tpu.dot_dimension_numbers<[1], [0], [0], [1], [0, 0, 1, 1], [], []>} : vector<64x32xbf16>, vector<32x32xbf16>, vector<64x32xf32> -> vector<64x32xf32>
    %106 = vector.extract_strided_slice %101 {offsets = [0, 0], sizes = [16, 64], strides = [1, 1]} : vector<64x64xf32> to vector<16x64xf32>
    %107 = vector.extract_strided_slice %101 {offsets = [16, 0], sizes = [16, 64], strides = [1, 1]} : vector<64x64xf32> to vector<16x64xf32>
    %108 = arith.addf %106, %107 : vector<16x64xf32>
    %109 = vector.extract_strided_slice %101 {offsets = [32, 0], sizes = [16, 64], strides = [1, 1]} : vector<64x64xf32> to vector<16x64xf32>
    %110 = arith.addf %108, %109 : vector<16x64xf32>
    %111 = vector.extract_strided_slice %101 {offsets = [48, 0], sizes = [16, 64], strides = [1, 1]} : vector<64x64xf32> to vector<16x64xf32>
    %112 = arith.addf %110, %111 : vector<16x64xf32>
    %113 = arith.truncf %112 : vector<16x64xf32> to vector<16x64xbf16>
    %114 = arith.truncf %105 : vector<64x32xf32> to vector<64x32xbf16>
    %cst_58 = arith.constant dense<0.000000e+00> : vector<16x32xf32>
    %115 = tpu.matmul %113, %114, %cst_58 {dimension_numbers = #tpu.dot_dimension_numbers<[1], [0], [0], [1], [0, 0, 1, 1], [], []>} : vector<16x64xbf16>, vector<64x32xbf16>, vector<16x32xf32> -> vector<16x32xf32>
    %c0_59 = arith.constant 0 : index
    %c0_60 = arith.constant 0 : index
    %c0_61 = arith.constant 0 : index
    %c0_62 = arith.constant 0 : index
    %116 = vector.load %arg12[%c0_59, %c0_60, %c0_61, %c0_62] : memref<2x2x1x32xf32, #tpu.memory_space<vmem>>, vector<1x1x1x32xf32>
    %117 = vector.shape_cast %116 : vector<1x1x1x32xf32> to vector<1x32xf32>
    %118 = vector.broadcast %117 : vector<1x32xf32> to vector<16x32xf32>
    %119 = arith.addf %115, %118 : vector<16x32xf32>
    %120 = arith.addf %119, %60 : vector<16x32xf32>
    %c0_63 = arith.constant 0 : index
    %c0_64 = arith.constant 0 : index
    %c0_65 = arith.constant 0 : index
    %c0_66 = arith.constant 0 : index
    %121 = vector.load %arg13[%c0_63, %c0_64, %c0_65, %c0_66] : memref<2x2x1x32xf32, #tpu.memory_space<vmem>>, vector<1x1x1x32xf32>
    %122 = vector.shape_cast %121 : vector<1x1x1x32xf32> to vector<1x32xf32>
    %c0_67 = arith.constant 0 : index
    %c0_68 = arith.constant 0 : index
    %c0_69 = arith.constant 0 : index
    %c0_70 = arith.constant 0 : index
    %123 = vector.load %arg14[%c0_67, %c0_68, %c0_69, %c0_70] : memref<2x2x1x32xf32, #tpu.memory_space<vmem>>, vector<1x1x1x32xf32>
    %124 = vector.shape_cast %123 : vector<1x1x1x32xf32> to vector<1x32xf32>
    %cst_71 = arith.constant dense<0.000000e+00> : vector<16xf32>
    %125 = vector.multi_reduction <add>, %120, %cst_71 [1] : vector<16x32xf32> to vector<16xf32>
    %126 = vector.shape_cast %125 : vector<16xf32> to vector<16x1xf32>
    %cst_72 = arith.constant 3.200000e+01 : f32
    %127 = vector.broadcast %cst_72 : f32 to vector<16x1xf32>
    %128 = arith.divf %126, %127 : vector<16x1xf32>
    %129 = vector.broadcast %128 : vector<16x1xf32> to vector<16x32xf32>
    %130 = arith.subf %120, %129 : vector<16x32xf32>
    %131 = arith.mulf %130, %130 : vector<16x32xf32>
    %cst_73 = arith.constant dense<0.000000e+00> : vector<16xf32>
    %132 = vector.multi_reduction <add>, %131, %cst_73 [1] : vector<16x32xf32> to vector<16xf32>
    %133 = vector.shape_cast %132 : vector<16xf32> to vector<16x1xf32>
    %cst_74 = arith.constant 3.200000e+01 : f32
    %134 = vector.broadcast %cst_74 : f32 to vector<16x1xf32>
    %135 = arith.divf %133, %134 : vector<16x1xf32>
    %cst_75 = arith.constant 9.99999996E-13 : f32
    %136 = vector.broadcast %cst_75 : f32 to vector<16x1xf32>
    %137 = arith.addf %135, %136 : vector<16x1xf32>
    %138 = math.rsqrt %137 : vector<16x1xf32>
    %139 = vector.broadcast %138 : vector<16x1xf32> to vector<16x32xf32>
    %140 = arith.mulf %130, %139 : vector<16x32xf32>
    %141 = vector.broadcast %122 : vector<1x32xf32> to vector<16x32xf32>
    %142 = arith.mulf %140, %141 : vector<16x32xf32>
    %143 = vector.broadcast %124 : vector<1x32xf32> to vector<16x32xf32>
    %144 = arith.addf %142, %143 : vector<16x32xf32>
    %c0_76 = arith.constant 0 : index
    %c0_77 = arith.constant 0 : index
    %c0_78 = arith.constant 0 : index
    %c0_79 = arith.constant 0 : index
    %145 = vector.load %arg15[%c0_76, %c0_77, %c0_78, %c0_79] : memref<2x2x32x64xbf16, #tpu.memory_space<vmem>>, vector<1x1x32x64xbf16>
    %146 = vector.shape_cast %145 : vector<1x1x32x64xbf16> to vector<32x64xbf16>
    %147 = arith.truncf %144 : vector<16x32xf32> to vector<16x32xbf16>
    %cst_80 = arith.constant dense<0.000000e+00> : vector<16x64xf32>
    %148 = tpu.matmul %147, %146, %cst_80 {dimension_numbers = #tpu.dot_dimension_numbers<[1], [0], [0], [1], [0, 0, 1, 1], [], []>} : vector<16x32xbf16>, vector<32x64xbf16>, vector<16x64xf32> -> vector<16x64xf32>
    %c0_81 = arith.constant 0 : index
    %c0_82 = arith.constant 0 : index
    %c0_83 = arith.constant 0 : index
    %c0_84 = arith.constant 0 : index
    %149 = vector.load %arg16[%c0_81, %c0_82, %c0_83, %c0_84] : memref<2x2x1x64xf32, #tpu.memory_space<vmem>>, vector<1x1x1x64xf32>
    %150 = vector.shape_cast %149 : vector<1x1x1x64xf32> to vector<1x64xf32>
    %151 = vector.broadcast %150 : vector<1x64xf32> to vector<16x64xf32>
    %152 = arith.addf %148, %151 : vector<16x64xf32>
    %cst_85 = arith.constant 5.000000e-01 : f32
    %153 = vector.broadcast %cst_85 : f32 to vector<16x64xf32>
    %154 = arith.mulf %153, %152 : vector<16x64xf32>
    %cst_86 = arith.constant 4.471500e-02 : f32
    %155 = vector.broadcast %cst_86 : f32 to vector<16x64xf32>
    %156 = arith.mulf %155, %152 : vector<16x64xf32>
    %157 = arith.mulf %156, %152 : vector<16x64xf32>
    %158 = arith.mulf %157, %152 : vector<16x64xf32>
    %159 = arith.addf %152, %158 : vector<16x64xf32>
    %cst_87 = arith.constant 0.797884583 : f32
    %160 = vector.broadcast %cst_87 : f32 to vector<16x64xf32>
    %161 = arith.mulf %160, %159 : vector<16x64xf32>
    %162 = math.tanh %161 : vector<16x64xf32>
    %cst_88 = arith.constant 1.000000e+00 : f32
    %163 = vector.broadcast %cst_88 : f32 to vector<16x64xf32>
    %164 = arith.addf %163, %162 : vector<16x64xf32>
    %165 = arith.mulf %154, %164 : vector<16x64xf32>
    %c0_89 = arith.constant 0 : index
    %c0_90 = arith.constant 0 : index
    %c0_91 = arith.constant 0 : index
    %c0_92 = arith.constant 0 : index
    %166 = vector.load %arg17[%c0_89, %c0_90, %c0_91, %c0_92] : memref<2x2x64x32xbf16, #tpu.memory_space<vmem>>, vector<1x1x64x32xbf16>
    %167 = vector.shape_cast %166 : vector<1x1x64x32xbf16> to vector<64x32xbf16>
    %168 = arith.truncf %165 : vector<16x64xf32> to vector<16x64xbf16>
    %cst_93 = arith.constant dense<0.000000e+00> : vector<16x32xf32>
    %169 = tpu.matmul %168, %167, %cst_93 {dimension_numbers = #tpu.dot_dimension_numbers<[1], [0], [0], [1], [0, 0, 1, 1], [], []>} : vector<16x64xbf16>, vector<64x32xbf16>, vector<16x32xf32> -> vector<16x32xf32>
    %c0_94 = arith.constant 0 : index
    %c0_95 = arith.constant 0 : index
    %c0_96 = arith.constant 0 : index
    %c0_97 = arith.constant 0 : index
    %170 = vector.load %arg18[%c0_94, %c0_95, %c0_96, %c0_97] : memref<2x2x1x32xf32, #tpu.memory_space<vmem>>, vector<1x1x1x32xf32>
    %171 = vector.shape_cast %170 : vector<1x1x1x32xf32> to vector<1x32xf32>
    %172 = vector.broadcast %171 : vector<1x32xf32> to vector<16x32xf32>
    %173 = arith.addf %169, %172 : vector<16x32xf32>
    %174 = arith.addf %173, %144 : vector<16x32xf32>
    %c0_98 = arith.constant 0 : index
    %c0_99 = arith.constant 0 : index
    %c0_100 = arith.constant 0 : index
    %c0_101 = arith.constant 0 : index
    %175 = vector.load %arg19[%c0_98, %c0_99, %c0_100, %c0_101] : memref<2x2x1x32xf32, #tpu.memory_space<vmem>>, vector<1x1x1x32xf32>
    %176 = vector.shape_cast %175 : vector<1x1x1x32xf32> to vector<1x32xf32>
    %c0_102 = arith.constant 0 : index
    %c0_103 = arith.constant 0 : index
    %c0_104 = arith.constant 0 : index
    %c0_105 = arith.constant 0 : index
    %177 = vector.load %arg20[%c0_102, %c0_103, %c0_104, %c0_105] : memref<2x2x1x32xf32, #tpu.memory_space<vmem>>, vector<1x1x1x32xf32>
    %178 = vector.shape_cast %177 : vector<1x1x1x32xf32> to vector<1x32xf32>
    %cst_106 = arith.constant dense<0.000000e+00> : vector<16xf32>
    %179 = vector.multi_reduction <add>, %174, %cst_106 [1] : vector<16x32xf32> to vector<16xf32>
    %180 = vector.shape_cast %179 : vector<16xf32> to vector<16x1xf32>
    %cst_107 = arith.constant 3.200000e+01 : f32
    %181 = vector.broadcast %cst_107 : f32 to vector<16x1xf32>
    %182 = arith.divf %180, %181 : vector<16x1xf32>
    %183 = vector.broadcast %182 : vector<16x1xf32> to vector<16x32xf32>
    %184 = arith.subf %174, %183 : vector<16x32xf32>
    %185 = arith.mulf %184, %184 : vector<16x32xf32>
    %cst_108 = arith.constant dense<0.000000e+00> : vector<16xf32>
    %186 = vector.multi_reduction <add>, %185, %cst_108 [1] : vector<16x32xf32> to vector<16xf32>
    %187 = vector.shape_cast %186 : vector<16xf32> to vector<16x1xf32>
    %cst_109 = arith.constant 3.200000e+01 : f32
    %188 = vector.broadcast %cst_109 : f32 to vector<16x1xf32>
    %189 = arith.divf %187, %188 : vector<16x1xf32>
    %cst_110 = arith.constant 9.99999996E-13 : f32
    %190 = vector.broadcast %cst_110 : f32 to vector<16x1xf32>
    %191 = arith.addf %189, %190 : vector<16x1xf32>
    %192 = math.rsqrt %191 : vector<16x1xf32>
    %193 = vector.broadcast %192 : vector<16x1xf32> to vector<16x32xf32>
    %194 = arith.mulf %184, %193 : vector<16x32xf32>
    %195 = vector.broadcast %176 : vector<1x32xf32> to vector<16x32xf32>
    %196 = arith.mulf %194, %195 : vector<16x32xf32>
    %197 = vector.broadcast %178 : vector<1x32xf32> to vector<16x32xf32>
    %198 = arith.addf %196, %197 : vector<16x32xf32>
    %199 = tpu.concatenate %198, %198, %198, %198 in 0 : vector<16x32xf32>, vector<16x32xf32>, vector<16x32xf32>, vector<16x32xf32> -> vector<64x32xf32>
    %c0_111 = arith.constant 0 : index
    %c1 = arith.constant 1 : index
    %c0_112 = arith.constant 0 : index
    %c0_113 = arith.constant 0 : index
    %200 = vector.load %arg5[%c0_111, %c1, %c0_112, %c0_113] : memref<2x2x32x32xbf16, #tpu.memory_space<vmem>>, vector<1x1x32x32xbf16>
    %201 = vector.shape_cast %200 : vector<1x1x32x32xbf16> to vector<32x32xbf16>
    %202 = arith.truncf %199 : vector<64x32xf32> to vector<64x32xbf16>
    %cst_114 = arith.constant dense<0.000000e+00> : vector<64x32xf32>
    %203 = tpu.matmul %202, %201, %cst_114 {dimension_numbers = #tpu.dot_dimension_numbers<[1], [0], [0], [1], [0, 0, 1, 1], [], []>} : vector<64x32xbf16>, vector<32x32xbf16>, vector<64x32xf32> -> vector<64x32xf32>
    %c0_115 = arith.constant 0 : index
    %c1_116 = arith.constant 1 : index
    %c0_117 = arith.constant 0 : index
    %c0_118 = arith.constant 0 : index
    %204 = vector.load %arg6[%c0_115, %c1_116, %c0_117, %c0_118] : memref<2x2x1x32xf32, #tpu.memory_space<vmem>>, vector<1x1x1x32xf32>
    %205 = vector.shape_cast %204 : vector<1x1x1x32xf32> to vector<1x32xf32>
    %206 = vector.broadcast %205 : vector<1x32xf32> to vector<64x32xf32>
    %207 = arith.addf %203, %206 : vector<64x32xf32>
    %c0_119 = arith.constant 0 : index
    %c1_120 = arith.constant 1 : index
    %c0_121 = arith.constant 0 : index
    %c0_122 = arith.constant 0 : index
    %208 = vector.load %arg7[%c0_119, %c1_120, %c0_121, %c0_122] : memref<2x2x32x32xbf16, #tpu.memory_space<vmem>>, vector<1x1x32x32xbf16>
    %209 = vector.shape_cast %208 : vector<1x1x32x32xbf16> to vector<32x32xbf16>
    %210 = arith.truncf %199 : vector<64x32xf32> to vector<64x32xbf16>
    %cst_123 = arith.constant dense<0.000000e+00> : vector<64x32xf32>
    %211 = tpu.matmul %210, %209, %cst_123 {dimension_numbers = #tpu.dot_dimension_numbers<[1], [0], [0], [1], [0, 0, 1, 1], [], []>} : vector<64x32xbf16>, vector<32x32xbf16>, vector<64x32xf32> -> vector<64x32xf32>
    %c0_124 = arith.constant 0 : index
    %c1_125 = arith.constant 1 : index
    %c0_126 = arith.constant 0 : index
    %c0_127 = arith.constant 0 : index
    %212 = vector.load %arg8[%c0_124, %c1_125, %c0_126, %c0_127] : memref<2x2x1x32xf32, #tpu.memory_space<vmem>>, vector<1x1x1x32xf32>
    %213 = vector.shape_cast %212 : vector<1x1x1x32xf32> to vector<1x32xf32>
    %214 = vector.broadcast %213 : vector<1x32xf32> to vector<64x32xf32>
    %215 = arith.addf %211, %214 : vector<64x32xf32>
    %216 = arith.mulf %215, %25 : vector<64x32xf32>
    %c0_128 = arith.constant 0 : index
    %c1_129 = arith.constant 1 : index
    %c0_130 = arith.constant 0 : index
    %c0_131 = arith.constant 0 : index
    %217 = vector.load %arg9[%c0_128, %c1_129, %c0_130, %c0_131] : memref<2x2x32x32xbf16, #tpu.memory_space<vmem>>, vector<1x1x32x32xbf16>
    %218 = vector.shape_cast %217 : vector<1x1x32x32xbf16> to vector<32x32xbf16>
    %219 = arith.truncf %199 : vector<64x32xf32> to vector<64x32xbf16>
    %cst_132 = arith.constant dense<0.000000e+00> : vector<64x32xf32>
    %220 = tpu.matmul %219, %218, %cst_132 {dimension_numbers = #tpu.dot_dimension_numbers<[1], [0], [0], [1], [0, 0, 1, 1], [], []>} : vector<64x32xbf16>, vector<32x32xbf16>, vector<64x32xf32> -> vector<64x32xf32>
    %c0_133 = arith.constant 0 : index
    %c1_134 = arith.constant 1 : index
    %c0_135 = arith.constant 0 : index
    %c0_136 = arith.constant 0 : index
    %221 = vector.load %arg10[%c0_133, %c1_134, %c0_135, %c0_136] : memref<2x2x1x32xf32, #tpu.memory_space<vmem>>, vector<1x1x1x32xf32>
    %222 = vector.shape_cast %221 : vector<1x1x1x32xf32> to vector<1x32xf32>
    %223 = vector.broadcast %222 : vector<1x32xf32> to vector<64x32xf32>
    %224 = arith.addf %220, %223 : vector<64x32xf32>
    %225 = arith.mulf %224, %25 : vector<64x32xf32>
    %226 = arith.truncf %207 : vector<64x32xf32> to vector<64x32xbf16>
    %227 = arith.truncf %216 : vector<64x32xf32> to vector<64x32xbf16>
    %cst_137 = arith.constant dense<0.000000e+00> : vector<64x64xf32>
    %228 = tpu.matmul %226, %227, %cst_137 {dimension_numbers = #tpu.dot_dimension_numbers<[1], [1], [0], [0], [0, 0, 1, 0], [], []>} : vector<64x32xbf16>, vector<64x32xbf16>, vector<64x64xf32> -> vector<64x64xf32>
    %229 = arith.addf %228, %34 : vector<64x64xf32>
    %cst_138 = arith.constant dense<0xFF800000> : vector<64xf32>
    %230 = vector.multi_reduction <maximumf>, %229, %cst_138 [1] : vector<64x64xf32> to vector<64xf32>
    %231 = vector.shape_cast %230 : vector<64xf32> to vector<64x1xf32>
    %232 = vector.broadcast %231 : vector<64x1xf32> to vector<64x64xf32>
    %233 = arith.subf %229, %232 : vector<64x64xf32>
    %234 = math.exp %233 : vector<64x64xf32>
    %cst_139 = arith.constant dense<0.000000e+00> : vector<64xf32>
    %235 = vector.multi_reduction <add>, %234, %cst_139 [1] : vector<64x64xf32> to vector<64xf32>
    %236 = vector.shape_cast %235 : vector<64xf32> to vector<64x1xf32>
    %237 = tpu.reciprocal %236 {approx = true} : vector<64x1xf32> -> vector<64x1xf32>
    %238 = vector.broadcast %237 : vector<64x1xf32> to vector<64x64xf32>
    %239 = arith.mulf %234, %238 : vector<64x64xf32>
    %c0_140 = arith.constant 0 : index
    %c1_141 = arith.constant 1 : index
    %c0_142 = arith.constant 0 : index
    %c0_143 = arith.constant 0 : index
    %240 = vector.load %arg11[%c0_140, %c1_141, %c0_142, %c0_143] : memref<2x2x32x32xbf16, #tpu.memory_space<vmem>>, vector<1x1x32x32xbf16>
    %241 = vector.shape_cast %240 : vector<1x1x32x32xbf16> to vector<32x32xbf16>
    %242 = arith.truncf %225 : vector<64x32xf32> to vector<64x32xbf16>
    %cst_144 = arith.constant dense<0.000000e+00> : vector<64x32xf32>
    %243 = tpu.matmul %242, %241, %cst_144 {dimension_numbers = #tpu.dot_dimension_numbers<[1], [0], [0], [1], [0, 0, 1, 1], [], []>} : vector<64x32xbf16>, vector<32x32xbf16>, vector<64x32xf32> -> vector<64x32xf32>
    %244 = vector.extract_strided_slice %239 {offsets = [0, 0], sizes = [16, 64], strides = [1, 1]} : vector<64x64xf32> to vector<16x64xf32>
    %245 = vector.extract_strided_slice %239 {offsets = [16, 0], sizes = [16, 64], strides = [1, 1]} : vector<64x64xf32> to vector<16x64xf32>
    %246 = arith.addf %244, %245 : vector<16x64xf32>
    %247 = vector.extract_strided_slice %239 {offsets = [32, 0], sizes = [16, 64], strides = [1, 1]} : vector<64x64xf32> to vector<16x64xf32>
    %248 = arith.addf %246, %247 : vector<16x64xf32>
    %249 = vector.extract_strided_slice %239 {offsets = [48, 0], sizes = [16, 64], strides = [1, 1]} : vector<64x64xf32> to vector<16x64xf32>
    %250 = arith.addf %248, %249 : vector<16x64xf32>
    %251 = arith.truncf %250 : vector<16x64xf32> to vector<16x64xbf16>
    %252 = arith.truncf %243 : vector<64x32xf32> to vector<64x32xbf16>
    %cst_145 = arith.constant dense<0.000000e+00> : vector<16x32xf32>
    %253 = tpu.matmul %251, %252, %cst_145 {dimension_numbers = #tpu.dot_dimension_numbers<[1], [0], [0], [1], [0, 0, 1, 1], [], []>} : vector<16x64xbf16>, vector<64x32xbf16>, vector<16x32xf32> -> vector<16x32xf32>
    %c0_146 = arith.constant 0 : index
    %c1_147 = arith.constant 1 : index
    %c0_148 = arith.constant 0 : index
    %c0_149 = arith.constant 0 : index
    %254 = vector.load %arg12[%c0_146, %c1_147, %c0_148, %c0_149] : memref<2x2x1x32xf32, #tpu.memory_space<vmem>>, vector<1x1x1x32xf32>
    %255 = vector.shape_cast %254 : vector<1x1x1x32xf32> to vector<1x32xf32>
    %256 = vector.broadcast %255 : vector<1x32xf32> to vector<16x32xf32>
    %257 = arith.addf %253, %256 : vector<16x32xf32>
    %258 = arith.addf %257, %198 : vector<16x32xf32>
    %c0_150 = arith.constant 0 : index
    %c1_151 = arith.constant 1 : index
    %c0_152 = arith.constant 0 : index
    %c0_153 = arith.constant 0 : index
    %259 = vector.load %arg13[%c0_150, %c1_151, %c0_152, %c0_153] : memref<2x2x1x32xf32, #tpu.memory_space<vmem>>, vector<1x1x1x32xf32>
    %260 = vector.shape_cast %259 : vector<1x1x1x32xf32> to vector<1x32xf32>
    %c0_154 = arith.constant 0 : index
    %c1_155 = arith.constant 1 : index
    %c0_156 = arith.constant 0 : index
    %c0_157 = arith.constant 0 : index
    %261 = vector.load %arg14[%c0_154, %c1_155, %c0_156, %c0_157] : memref<2x2x1x32xf32, #tpu.memory_space<vmem>>, vector<1x1x1x32xf32>
    %262 = vector.shape_cast %261 : vector<1x1x1x32xf32> to vector<1x32xf32>
    %cst_158 = arith.constant dense<0.000000e+00> : vector<16xf32>
    %263 = vector.multi_reduction <add>, %258, %cst_158 [1] : vector<16x32xf32> to vector<16xf32>
    %264 = vector.shape_cast %263 : vector<16xf32> to vector<16x1xf32>
    %cst_159 = arith.constant 3.200000e+01 : f32
    %265 = vector.broadcast %cst_159 : f32 to vector<16x1xf32>
    %266 = arith.divf %264, %265 : vector<16x1xf32>
    %267 = vector.broadcast %266 : vector<16x1xf32> to vector<16x32xf32>
    %268 = arith.subf %258, %267 : vector<16x32xf32>
    %269 = arith.mulf %268, %268 : vector<16x32xf32>
    %cst_160 = arith.constant dense<0.000000e+00> : vector<16xf32>
    %270 = vector.multi_reduction <add>, %269, %cst_160 [1] : vector<16x32xf32> to vector<16xf32>
    %271 = vector.shape_cast %270 : vector<16xf32> to vector<16x1xf32>
    %cst_161 = arith.constant 3.200000e+01 : f32
    %272 = vector.broadcast %cst_161 : f32 to vector<16x1xf32>
    %273 = arith.divf %271, %272 : vector<16x1xf32>
    %cst_162 = arith.constant 9.99999996E-13 : f32
    %274 = vector.broadcast %cst_162 : f32 to vector<16x1xf32>
    %275 = arith.addf %273, %274 : vector<16x1xf32>
    %276 = math.rsqrt %275 : vector<16x1xf32>
    %277 = vector.broadcast %276 : vector<16x1xf32> to vector<16x32xf32>
    %278 = arith.mulf %268, %277 : vector<16x32xf32>
    %279 = vector.broadcast %260 : vector<1x32xf32> to vector<16x32xf32>
    %280 = arith.mulf %278, %279 : vector<16x32xf32>
    %281 = vector.broadcast %262 : vector<1x32xf32> to vector<16x32xf32>
    %282 = arith.addf %280, %281 : vector<16x32xf32>
    %c0_163 = arith.constant 0 : index
    %c1_164 = arith.constant 1 : index
    %c0_165 = arith.constant 0 : index
    %c0_166 = arith.constant 0 : index
    %283 = vector.load %arg15[%c0_163, %c1_164, %c0_165, %c0_166] : memref<2x2x32x64xbf16, #tpu.memory_space<vmem>>, vector<1x1x32x64xbf16>
    %284 = vector.shape_cast %283 : vector<1x1x32x64xbf16> to vector<32x64xbf16>
    %285 = arith.truncf %282 : vector<16x32xf32> to vector<16x32xbf16>
    %cst_167 = arith.constant dense<0.000000e+00> : vector<16x64xf32>
    %286 = tpu.matmul %285, %284, %cst_167 {dimension_numbers = #tpu.dot_dimension_numbers<[1], [0], [0], [1], [0, 0, 1, 1], [], []>} : vector<16x32xbf16>, vector<32x64xbf16>, vector<16x64xf32> -> vector<16x64xf32>
    %c0_168 = arith.constant 0 : index
    %c1_169 = arith.constant 1 : index
    %c0_170 = arith.constant 0 : index
    %c0_171 = arith.constant 0 : index
    %287 = vector.load %arg16[%c0_168, %c1_169, %c0_170, %c0_171] : memref<2x2x1x64xf32, #tpu.memory_space<vmem>>, vector<1x1x1x64xf32>
    %288 = vector.shape_cast %287 : vector<1x1x1x64xf32> to vector<1x64xf32>
    %289 = vector.broadcast %288 : vector<1x64xf32> to vector<16x64xf32>
    %290 = arith.addf %286, %289 : vector<16x64xf32>
    %cst_172 = arith.constant 5.000000e-01 : f32
    %291 = vector.broadcast %cst_172 : f32 to vector<16x64xf32>
    %292 = arith.mulf %291, %290 : vector<16x64xf32>
    %cst_173 = arith.constant 4.471500e-02 : f32
    %293 = vector.broadcast %cst_173 : f32 to vector<16x64xf32>
    %294 = arith.mulf %293, %290 : vector<16x64xf32>
    %295 = arith.mulf %294, %290 : vector<16x64xf32>
    %296 = arith.mulf %295, %290 : vector<16x64xf32>
    %297 = arith.addf %290, %296 : vector<16x64xf32>
    %cst_174 = arith.constant 0.797884583 : f32
    %298 = vector.broadcast %cst_174 : f32 to vector<16x64xf32>
    %299 = arith.mulf %298, %297 : vector<16x64xf32>
    %300 = math.tanh %299 : vector<16x64xf32>
    %cst_175 = arith.constant 1.000000e+00 : f32
    %301 = vector.broadcast %cst_175 : f32 to vector<16x64xf32>
    %302 = arith.addf %301, %300 : vector<16x64xf32>
    %303 = arith.mulf %292, %302 : vector<16x64xf32>
    %c0_176 = arith.constant 0 : index
    %c1_177 = arith.constant 1 : index
    %c0_178 = arith.constant 0 : index
    %c0_179 = arith.constant 0 : index
    %304 = vector.load %arg17[%c0_176, %c1_177, %c0_178, %c0_179] : memref<2x2x64x32xbf16, #tpu.memory_space<vmem>>, vector<1x1x64x32xbf16>
    %305 = vector.shape_cast %304 : vector<1x1x64x32xbf16> to vector<64x32xbf16>
    %306 = arith.truncf %303 : vector<16x64xf32> to vector<16x64xbf16>
    %cst_180 = arith.constant dense<0.000000e+00> : vector<16x32xf32>
    %307 = tpu.matmul %306, %305, %cst_180 {dimension_numbers = #tpu.dot_dimension_numbers<[1], [0], [0], [1], [0, 0, 1, 1], [], []>} : vector<16x64xbf16>, vector<64x32xbf16>, vector<16x32xf32> -> vector<16x32xf32>
    %c0_181 = arith.constant 0 : index
    %c1_182 = arith.constant 1 : index
    %c0_183 = arith.constant 0 : index
    %c0_184 = arith.constant 0 : index
    %308 = vector.load %arg18[%c0_181, %c1_182, %c0_183, %c0_184] : memref<2x2x1x32xf32, #tpu.memory_space<vmem>>, vector<1x1x1x32xf32>
    %309 = vector.shape_cast %308 : vector<1x1x1x32xf32> to vector<1x32xf32>
    %310 = vector.broadcast %309 : vector<1x32xf32> to vector<16x32xf32>
    %311 = arith.addf %307, %310 : vector<16x32xf32>
    %312 = arith.addf %311, %282 : vector<16x32xf32>
    %c0_185 = arith.constant 0 : index
    %c1_186 = arith.constant 1 : index
    %c0_187 = arith.constant 0 : index
    %c0_188 = arith.constant 0 : index
    %313 = vector.load %arg19[%c0_185, %c1_186, %c0_187, %c0_188] : memref<2x2x1x32xf32, #tpu.memory_space<vmem>>, vector<1x1x1x32xf32>
    %314 = vector.shape_cast %313 : vector<1x1x1x32xf32> to vector<1x32xf32>
    %c0_189 = arith.constant 0 : index
    %c1_190 = arith.constant 1 : index
    %c0_191 = arith.constant 0 : index
    %c0_192 = arith.constant 0 : index
    %315 = vector.load %arg20[%c0_189, %c1_190, %c0_191, %c0_192] : memref<2x2x1x32xf32, #tpu.memory_space<vmem>>, vector<1x1x1x32xf32>
    %316 = vector.shape_cast %315 : vector<1x1x1x32xf32> to vector<1x32xf32>
    %cst_193 = arith.constant dense<0.000000e+00> : vector<16xf32>
    %317 = vector.multi_reduction <add>, %312, %cst_193 [1] : vector<16x32xf32> to vector<16xf32>
    %318 = vector.shape_cast %317 : vector<16xf32> to vector<16x1xf32>
    %cst_194 = arith.constant 3.200000e+01 : f32
    %319 = vector.broadcast %cst_194 : f32 to vector<16x1xf32>
    %320 = arith.divf %318, %319 : vector<16x1xf32>
    %321 = vector.broadcast %320 : vector<16x1xf32> to vector<16x32xf32>
    %322 = arith.subf %312, %321 : vector<16x32xf32>
    %323 = arith.mulf %322, %322 : vector<16x32xf32>
    %cst_195 = arith.constant dense<0.000000e+00> : vector<16xf32>
    %324 = vector.multi_reduction <add>, %323, %cst_195 [1] : vector<16x32xf32> to vector<16xf32>
    %325 = vector.shape_cast %324 : vector<16xf32> to vector<16x1xf32>
    %cst_196 = arith.constant 3.200000e+01 : f32
    %326 = vector.broadcast %cst_196 : f32 to vector<16x1xf32>
    %327 = arith.divf %325, %326 : vector<16x1xf32>
    %cst_197 = arith.constant 9.99999996E-13 : f32
    %328 = vector.broadcast %cst_197 : f32 to vector<16x1xf32>
    %329 = arith.addf %327, %328 : vector<16x1xf32>
    %330 = math.rsqrt %329 : vector<16x1xf32>
    %331 = vector.broadcast %330 : vector<16x1xf32> to vector<16x32xf32>
    %332 = arith.mulf %322, %331 : vector<16x32xf32>
    %333 = vector.broadcast %314 : vector<1x32xf32> to vector<16x32xf32>
    %334 = arith.mulf %332, %333 : vector<16x32xf32>
    %335 = vector.broadcast %316 : vector<1x32xf32> to vector<16x32xf32>
    %336 = arith.addf %334, %335 : vector<16x32xf32>
    %337 = vector.extract_strided_slice %336 {offsets = [0, 0], sizes = [1, 32], strides = [1, 1]} : vector<16x32xf32> to vector<1x32xf32>
    %338 = vector.extract_strided_slice %336 {offsets = [8, 0], sizes = [1, 32], strides = [1, 1]} : vector<16x32xf32> to vector<1x32xf32>
    %339 = tpu.concatenate %337, %338 in 0 : vector<1x32xf32>, vector<1x32xf32> -> vector<2x32xf32>
    %c0_198 = arith.constant 0 : index
    %c0_199 = arith.constant 0 : index
    %c0_200 = arith.constant 0 : index
    %340 = vector.load %arg21[%c0_198, %c0_199, %c0_200] : memref<2x32x32xbf16, #tpu.memory_space<vmem>>, vector<1x32x32xbf16>
    %341 = vector.shape_cast %340 : vector<1x32x32xbf16> to vector<32x32xbf16>
    %342 = arith.truncf %339 : vector<2x32xf32> to vector<2x32xbf16>
    %cst_201 = arith.constant dense<0.000000e+00> : vector<2x32xf32>
    %343 = tpu.matmul %342, %341, %cst_201 {dimension_numbers = #tpu.dot_dimension_numbers<[1], [0], [0], [1], [0, 0, 1, 1], [], []>} : vector<2x32xbf16>, vector<32x32xbf16>, vector<2x32xf32> -> vector<2x32xf32>
    %c0_202 = arith.constant 0 : index
    %c0_203 = arith.constant 0 : index
    %c0_204 = arith.constant 0 : index
    %344 = vector.load %arg22[%c0_202, %c0_203, %c0_204] : memref<2x1x32xf32, #tpu.memory_space<vmem>>, vector<1x1x32xf32>
    %345 = vector.shape_cast %344 : vector<1x1x32xf32> to vector<1x32xf32>
    %346 = vector.broadcast %345 : vector<1x32xf32> to vector<2x32xf32>
    %347 = arith.addf %343, %346 : vector<2x32xf32>
    %348 = math.tanh %347 : vector<2x32xf32>
    %c0_205 = arith.constant 0 : index
    %c0_206 = arith.constant 0 : index
    %c0_207 = arith.constant 0 : index
    %349 = vector.load %arg23[%c0_205, %c0_206, %c0_207] : memref<2x32x16xbf16, #tpu.memory_space<vmem>>, vector<1x32x16xbf16>
    %350 = vector.shape_cast %349 : vector<1x32x16xbf16> to vector<32x16xbf16>
    %351 = arith.truncf %348 : vector<2x32xf32> to vector<2x32xbf16>
    %cst_208 = arith.constant dense<0.000000e+00> : vector<2x16xf32>
    %352 = tpu.matmul %351, %350, %cst_208 {dimension_numbers = #tpu.dot_dimension_numbers<[1], [0], [0], [1], [0, 0, 1, 1], [], []>} : vector<2x32xbf16>, vector<32x16xbf16>, vector<2x16xf32> -> vector<2x16xf32>
    %c0_209 = arith.constant 0 : index
    %c0_210 = arith.constant 0 : index
    %c0_211 = arith.constant 0 : index
    %353 = vector.load %arg24[%c0_209, %c0_210, %c0_211] : memref<2x1x16xf32, #tpu.memory_space<vmem>>, vector<1x1x16xf32>
    %354 = vector.shape_cast %353 : vector<1x1x16xf32> to vector<1x16xf32>
    %355 = vector.broadcast %354 : vector<1x16xf32> to vector<2x16xf32>
    %356 = arith.addf %352, %355 : vector<2x16xf32>
    %c0_212 = arith.constant 0 : index
    %c0_213 = arith.constant 0 : index
    %c0_214 = arith.constant 0 : index
    %357 = vector.load %arg25[%c0_212, %c0_213, %c0_214] : memref<2x2x16xf32, #tpu.memory_space<vmem>>, vector<1x2x16xf32>
    %358 = vector.shape_cast %357 : vector<1x2x16xf32> to vector<2x16xf32>
    %359 = vector.shape_cast %356 : vector<2x16xf32> to vector<1x2x16xf32>
    tpu.vector_store %arg25[%c0_212, %c0_213, %c0_214], %359 {strides = array<i32>} : memref<2x2x16xf32, #tpu.memory_space<vmem>>, vector<1x2x16xf32>,
    %c1_215 = arith.constant 1 : index
    %c0_216 = arith.constant 0 : index
    %c0_217 = arith.constant 0 : index
    %360 = vector.load %arg2[%c1_215, %c0_216, %c0_217] : memref<2x1x64xf32, #tpu.memory_space<vmem>>, vector<1x1x64xf32>
    %361 = vector.shape_cast %360 : vector<1x1x64xf32> to vector<1x64xf32>
    %cst_218 = arith.constant 5.000000e-01 : f32
    %362 = vector.broadcast %cst_218 : f32 to vector<1x64xf32>
    %363 = arith.cmpf ogt, %361, %362 : vector<1x64xf32>
    %364 = vector.broadcast %363 : vector<1x64xi1> to vector<64x64xi1>
    %365 = arith.andi %16, %364 : vector<64x64xi1>
    %cst_219 = arith.constant 0.000000e+00 : f32
    %cst_220 = arith.constant -1.000000e+04 : f32
    %366 = vector.broadcast %cst_219 : f32 to vector<64x64xf32>
    %367 = vector.broadcast %cst_220 : f32 to vector<64x64xf32>
    %368 = arith.select %365, %366, %367 : vector<64x64xi1>, vector<64x64xf32>
    %c1_221 = arith.constant 1 : index
    %c0_222 = arith.constant 0 : index
    %c0_223 = arith.constant 0 : index
    %369 = vector.load %arg1[%c1_221, %c0_222, %c0_223] : memref<2x16x32xf32, #tpu.memory_space<vmem>>, vector<1x16x32xf32>
    %370 = vector.shape_cast %369 : vector<1x16x32xf32> to vector<16x32xf32>
    %c1_224 = arith.constant 1 : index
    %c0_225 = arith.constant 0 : index
    %c0_226 = arith.constant 0 : index
    %371 = vector.load %arg3[%c1_224, %c0_225, %c0_226] : memref<2x1x32xf32, #tpu.memory_space<vmem>>, vector<1x1x32xf32>
    %372 = vector.shape_cast %371 : vector<1x1x32xf32> to vector<1x32xf32>
    %c1_227 = arith.constant 1 : index
    %c0_228 = arith.constant 0 : index
    %c0_229 = arith.constant 0 : index
    %373 = vector.load %arg4[%c1_227, %c0_228, %c0_229] : memref<2x1x32xf32, #tpu.memory_space<vmem>>, vector<1x1x32xf32>
    %374 = vector.shape_cast %373 : vector<1x1x32xf32> to vector<1x32xf32>
    %cst_230 = arith.constant dense<0.000000e+00> : vector<16xf32>
    %375 = vector.multi_reduction <add>, %370, %cst_230 [1] : vector<16x32xf32> to vector<16xf32>
    %376 = vector.shape_cast %375 : vector<16xf32> to vector<16x1xf32>
    %cst_231 = arith.constant 3.200000e+01 : f32
    %377 = vector.broadcast %cst_231 : f32 to vector<16x1xf32>
    %378 = arith.divf %376, %377 : vector<16x1xf32>
    %379 = vector.broadcast %378 : vector<16x1xf32> to vector<16x32xf32>
    %380 = arith.subf %370, %379 : vector<16x32xf32>
    %381 = arith.mulf %380, %380 : vector<16x32xf32>
    %cst_232 = arith.constant dense<0.000000e+00> : vector<16xf32>
    %382 = vector.multi_reduction <add>, %381, %cst_232 [1] : vector<16x32xf32> to vector<16xf32>
    %383 = vector.shape_cast %382 : vector<16xf32> to vector<16x1xf32>
    %cst_233 = arith.constant 3.200000e+01 : f32
    %384 = vector.broadcast %cst_233 : f32 to vector<16x1xf32>
    %385 = arith.divf %383, %384 : vector<16x1xf32>
    %cst_234 = arith.constant 9.99999996E-13 : f32
    %386 = vector.broadcast %cst_234 : f32 to vector<16x1xf32>
    %387 = arith.addf %385, %386 : vector<16x1xf32>
    %388 = math.rsqrt %387 : vector<16x1xf32>
    %389 = vector.broadcast %388 : vector<16x1xf32> to vector<16x32xf32>
    %390 = arith.mulf %380, %389 : vector<16x32xf32>
    %391 = vector.broadcast %372 : vector<1x32xf32> to vector<16x32xf32>
    %392 = arith.mulf %390, %391 : vector<16x32xf32>
    %393 = vector.broadcast %374 : vector<1x32xf32> to vector<16x32xf32>
    %394 = arith.addf %392, %393 : vector<16x32xf32>
    %395 = tpu.concatenate %394, %394, %394, %394 in 0 : vector<16x32xf32>, vector<16x32xf32>, vector<16x32xf32>, vector<16x32xf32> -> vector<64x32xf32>
    %c1_235 = arith.constant 1 : index
    %c0_236 = arith.constant 0 : index
    %c0_237 = arith.constant 0 : index
    %c0_238 = arith.constant 0 : index
    %396 = vector.load %arg5[%c1_235, %c0_236, %c0_237, %c0_238] : memref<2x2x32x32xbf16, #tpu.memory_space<vmem>>, vector<1x1x32x32xbf16>
    %397 = vector.shape_cast %396 : vector<1x1x32x32xbf16> to vector<32x32xbf16>
    %398 = arith.truncf %395 : vector<64x32xf32> to vector<64x32xbf16>
    %cst_239 = arith.constant dense<0.000000e+00> : vector<64x32xf32>
    %399 = tpu.matmul %398, %397, %cst_239 {dimension_numbers = #tpu.dot_dimension_numbers<[1], [0], [0], [1], [0, 0, 1, 1], [], []>} : vector<64x32xbf16>, vector<32x32xbf16>, vector<64x32xf32> -> vector<64x32xf32>
    %c1_240 = arith.constant 1 : index
    %c0_241 = arith.constant 0 : index
    %c0_242 = arith.constant 0 : index
    %c0_243 = arith.constant 0 : index
    %400 = vector.load %arg6[%c1_240, %c0_241, %c0_242, %c0_243] : memref<2x2x1x32xf32, #tpu.memory_space<vmem>>, vector<1x1x1x32xf32>
    %401 = vector.shape_cast %400 : vector<1x1x1x32xf32> to vector<1x32xf32>
    %402 = vector.broadcast %401 : vector<1x32xf32> to vector<64x32xf32>
    %403 = arith.addf %399, %402 : vector<64x32xf32>
    %c1_244 = arith.constant 1 : index
    %c0_245 = arith.constant 0 : index
    %c0_246 = arith.constant 0 : index
    %c0_247 = arith.constant 0 : index
    %404 = vector.load %arg7[%c1_244, %c0_245, %c0_246, %c0_247] : memref<2x2x32x32xbf16, #tpu.memory_space<vmem>>, vector<1x1x32x32xbf16>
    %405 = vector.shape_cast %404 : vector<1x1x32x32xbf16> to vector<32x32xbf16>
    %406 = arith.truncf %395 : vector<64x32xf32> to vector<64x32xbf16>
    %cst_248 = arith.constant dense<0.000000e+00> : vector<64x32xf32>
    %407 = tpu.matmul %406, %405, %cst_248 {dimension_numbers = #tpu.dot_dimension_numbers<[1], [0], [0], [1], [0, 0, 1, 1], [], []>} : vector<64x32xbf16>, vector<32x32xbf16>, vector<64x32xf32> -> vector<64x32xf32>
    %c1_249 = arith.constant 1 : index
    %c0_250 = arith.constant 0 : index
    %c0_251 = arith.constant 0 : index
    %c0_252 = arith.constant 0 : index
    %408 = vector.load %arg8[%c1_249, %c0_250, %c0_251, %c0_252] : memref<2x2x1x32xf32, #tpu.memory_space<vmem>>, vector<1x1x1x32xf32>
    %409 = vector.shape_cast %408 : vector<1x1x1x32xf32> to vector<1x32xf32>
    %410 = vector.broadcast %409 : vector<1x32xf32> to vector<64x32xf32>
    %411 = arith.addf %407, %410 : vector<64x32xf32>
    %412 = arith.mulf %411, %25 : vector<64x32xf32>
    %c1_253 = arith.constant 1 : index
    %c0_254 = arith.constant 0 : index
    %c0_255 = arith.constant 0 : index
    %c0_256 = arith.constant 0 : index
    %413 = vector.load %arg9[%c1_253, %c0_254, %c0_255, %c0_256] : memref<2x2x32x32xbf16, #tpu.memory_space<vmem>>, vector<1x1x32x32xbf16>
    %414 = vector.shape_cast %413 : vector<1x1x32x32xbf16> to vector<32x32xbf16>
    %415 = arith.truncf %395 : vector<64x32xf32> to vector<64x32xbf16>
    %cst_257 = arith.constant dense<0.000000e+00> : vector<64x32xf32>
    %416 = tpu.matmul %415, %414, %cst_257 {dimension_numbers = #tpu.dot_dimension_numbers<[1], [0], [0], [1], [0, 0, 1, 1], [], []>} : vector<64x32xbf16>, vector<32x32xbf16>, vector<64x32xf32> -> vector<64x32xf32>
    %c1_258 = arith.constant 1 : index
    %c0_259 = arith.constant 0 : index
    %c0_260 = arith.constant 0 : index
    %c0_261 = arith.constant 0 : index
    %417 = vector.load %arg10[%c1_258, %c0_259, %c0_260, %c0_261] : memref<2x2x1x32xf32, #tpu.memory_space<vmem>>, vector<1x1x1x32xf32>
    %418 = vector.shape_cast %417 : vector<1x1x1x32xf32> to vector<1x32xf32>
    %419 = vector.broadcast %418 : vector<1x32xf32> to vector<64x32xf32>
    %420 = arith.addf %416, %419 : vector<64x32xf32>
    %421 = arith.mulf %420, %25 : vector<64x32xf32>
    %422 = arith.truncf %403 : vector<64x32xf32> to vector<64x32xbf16>
    %423 = arith.truncf %412 : vector<64x32xf32> to vector<64x32xbf16>
    %cst_262 = arith.constant dense<0.000000e+00> : vector<64x64xf32>
    %424 = tpu.matmul %422, %423, %cst_262 {dimension_numbers = #tpu.dot_dimension_numbers<[1], [1], [0], [0], [0, 0, 1, 0], [], []>} : vector<64x32xbf16>, vector<64x32xbf16>, vector<64x64xf32> -> vector<64x64xf32>
    %425 = arith.addf %424, %368 : vector<64x64xf32>
    %cst_263 = arith.constant dense<0xFF800000> : vector<64xf32>
    %426 = vector.multi_reduction <maximumf>, %425, %cst_263 [1] : vector<64x64xf32> to vector<64xf32>
    %427 = vector.shape_cast %426 : vector<64xf32> to vector<64x1xf32>
    %428 = vector.broadcast %427 : vector<64x1xf32> to vector<64x64xf32>
    %429 = arith.subf %425, %428 : vector<64x64xf32>
    %430 = math.exp %429 : vector<64x64xf32>
    %cst_264 = arith.constant dense<0.000000e+00> : vector<64xf32>
    %431 = vector.multi_reduction <add>, %430, %cst_264 [1] : vector<64x64xf32> to vector<64xf32>
    %432 = vector.shape_cast %431 : vector<64xf32> to vector<64x1xf32>
    %433 = tpu.reciprocal %432 {approx = true} : vector<64x1xf32> -> vector<64x1xf32>
    %434 = vector.broadcast %433 : vector<64x1xf32> to vector<64x64xf32>
    %435 = arith.mulf %430, %434 : vector<64x64xf32>
    %c1_265 = arith.constant 1 : index
    %c0_266 = arith.constant 0 : index
    %c0_267 = arith.constant 0 : index
    %c0_268 = arith.constant 0 : index
    %436 = vector.load %arg11[%c1_265, %c0_266, %c0_267, %c0_268] : memref<2x2x32x32xbf16, #tpu.memory_space<vmem>>, vector<1x1x32x32xbf16>
    %437 = vector.shape_cast %436 : vector<1x1x32x32xbf16> to vector<32x32xbf16>
    %438 = arith.truncf %421 : vector<64x32xf32> to vector<64x32xbf16>
    %cst_269 = arith.constant dense<0.000000e+00> : vector<64x32xf32>
    %439 = tpu.matmul %438, %437, %cst_269 {dimension_numbers = #tpu.dot_dimension_numbers<[1], [0], [0], [1], [0, 0, 1, 1], [], []>} : vector<64x32xbf16>, vector<32x32xbf16>, vector<64x32xf32> -> vector<64x32xf32>
    %440 = vector.extract_strided_slice %435 {offsets = [0, 0], sizes = [16, 64], strides = [1, 1]} : vector<64x64xf32> to vector<16x64xf32>
    %441 = vector.extract_strided_slice %435 {offsets = [16, 0], sizes = [16, 64], strides = [1, 1]} : vector<64x64xf32> to vector<16x64xf32>
    %442 = arith.addf %440, %441 : vector<16x64xf32>
    %443 = vector.extract_strided_slice %435 {offsets = [32, 0], sizes = [16, 64], strides = [1, 1]} : vector<64x64xf32> to vector<16x64xf32>
    %444 = arith.addf %442, %443 : vector<16x64xf32>
    %445 = vector.extract_strided_slice %435 {offsets = [48, 0], sizes = [16, 64], strides = [1, 1]} : vector<64x64xf32> to vector<16x64xf32>
    %446 = arith.addf %444, %445 : vector<16x64xf32>
    %447 = arith.truncf %446 : vector<16x64xf32> to vector<16x64xbf16>
    %448 = arith.truncf %439 : vector<64x32xf32> to vector<64x32xbf16>
    %cst_270 = arith.constant dense<0.000000e+00> : vector<16x32xf32>
    %449 = tpu.matmul %447, %448, %cst_270 {dimension_numbers = #tpu.dot_dimension_numbers<[1], [0], [0], [1], [0, 0, 1, 1], [], []>} : vector<16x64xbf16>, vector<64x32xbf16>, vector<16x32xf32> -> vector<16x32xf32>
    %c1_271 = arith.constant 1 : index
    %c0_272 = arith.constant 0 : index
    %c0_273 = arith.constant 0 : index
    %c0_274 = arith.constant 0 : index
    %450 = vector.load %arg12[%c1_271, %c0_272, %c0_273, %c0_274] : memref<2x2x1x32xf32, #tpu.memory_space<vmem>>, vector<1x1x1x32xf32>
    %451 = vector.shape_cast %450 : vector<1x1x1x32xf32> to vector<1x32xf32>
    %452 = vector.broadcast %451 : vector<1x32xf32> to vector<16x32xf32>
    %453 = arith.addf %449, %452 : vector<16x32xf32>
    %454 = arith.addf %453, %394 : vector<16x32xf32>
    %c1_275 = arith.constant 1 : index
    %c0_276 = arith.constant 0 : index
    %c0_277 = arith.constant 0 : index
    %c0_278 = arith.constant 0 : index
    %455 = vector.load %arg13[%c1_275, %c0_276, %c0_277, %c0_278] : memref<2x2x1x32xf32, #tpu.memory_space<vmem>>, vector<1x1x1x32xf32>
    %456 = vector.shape_cast %455 : vector<1x1x1x32xf32> to vector<1x32xf32>
    %c1_279 = arith.constant 1 : index
    %c0_280 = arith.constant 0 : index
    %c0_281 = arith.constant 0 : index
    %c0_282 = arith.constant 0 : index
    %457 = vector.load %arg14[%c1_279, %c0_280, %c0_281, %c0_282] : memref<2x2x1x32xf32, #tpu.memory_space<vmem>>, vector<1x1x1x32xf32>
    %458 = vector.shape_cast %457 : vector<1x1x1x32xf32> to vector<1x32xf32>
    %cst_283 = arith.constant dense<0.000000e+00> : vector<16xf32>
    %459 = vector.multi_reduction <add>, %454, %cst_283 [1] : vector<16x32xf32> to vector<16xf32>
    %460 = vector.shape_cast %459 : vector<16xf32> to vector<16x1xf32>
    %cst_284 = arith.constant 3.200000e+01 : f32
    %461 = vector.broadcast %cst_284 : f32 to vector<16x1xf32>
    %462 = arith.divf %460, %461 : vector<16x1xf32>
    %463 = vector.broadcast %462 : vector<16x1xf32> to vector<16x32xf32>
    %464 = arith.subf %454, %463 : vector<16x32xf32>
    %465 = arith.mulf %464, %464 : vector<16x32xf32>
    %cst_285 = arith.constant dense<0.000000e+00> : vector<16xf32>
    %466 = vector.multi_reduction <add>, %465, %cst_285 [1] : vector<16x32xf32> to vector<16xf32>
    %467 = vector.shape_cast %466 : vector<16xf32> to vector<16x1xf32>
    %cst_286 = arith.constant 3.200000e+01 : f32
    %468 = vector.broadcast %cst_286 : f32 to vector<16x1xf32>
    %469 = arith.divf %467, %468 : vector<16x1xf32>
    %cst_287 = arith.constant 9.99999996E-13 : f32
    %470 = vector.broadcast %cst_287 : f32 to vector<16x1xf32>
    %471 = arith.addf %469, %470 : vector<16x1xf32>
    %472 = math.rsqrt %471 : vector<16x1xf32>
    %473 = vector.broadcast %472 : vector<16x1xf32> to vector<16x32xf32>
    %474 = arith.mulf %464, %473 : vector<16x32xf32>
    %475 = vector.broadcast %456 : vector<1x32xf32> to vector<16x32xf32>
    %476 = arith.mulf %474, %475 : vector<16x32xf32>
    %477 = vector.broadcast %458 : vector<1x32xf32> to vector<16x32xf32>
    %478 = arith.addf %476, %477 : vector<16x32xf32>
    %c1_288 = arith.constant 1 : index
    %c0_289 = arith.constant 0 : index
    %c0_290 = arith.constant 0 : index
    %c0_291 = arith.constant 0 : index
    %479 = vector.load %arg15[%c1_288, %c0_289, %c0_290, %c0_291] : memref<2x2x32x64xbf16, #tpu.memory_space<vmem>>, vector<1x1x32x64xbf16>
    %480 = vector.shape_cast %479 : vector<1x1x32x64xbf16> to vector<32x64xbf16>
    %481 = arith.truncf %478 : vector<16x32xf32> to vector<16x32xbf16>
    %cst_292 = arith.constant dense<0.000000e+00> : vector<16x64xf32>
    %482 = tpu.matmul %481, %480, %cst_292 {dimension_numbers = #tpu.dot_dimension_numbers<[1], [0], [0], [1], [0, 0, 1, 1], [], []>} : vector<16x32xbf16>, vector<32x64xbf16>, vector<16x64xf32> -> vector<16x64xf32>
    %c1_293 = arith.constant 1 : index
    %c0_294 = arith.constant 0 : index
    %c0_295 = arith.constant 0 : index
    %c0_296 = arith.constant 0 : index
    %483 = vector.load %arg16[%c1_293, %c0_294, %c0_295, %c0_296] : memref<2x2x1x64xf32, #tpu.memory_space<vmem>>, vector<1x1x1x64xf32>
    %484 = vector.shape_cast %483 : vector<1x1x1x64xf32> to vector<1x64xf32>
    %485 = vector.broadcast %484 : vector<1x64xf32> to vector<16x64xf32>
    %486 = arith.addf %482, %485 : vector<16x64xf32>
    %cst_297 = arith.constant 5.000000e-01 : f32
    %487 = vector.broadcast %cst_297 : f32 to vector<16x64xf32>
    %488 = arith.mulf %487, %486 : vector<16x64xf32>
    %cst_298 = arith.constant 4.471500e-02 : f32
    %489 = vector.broadcast %cst_298 : f32 to vector<16x64xf32>
    %490 = arith.mulf %489, %486 : vector<16x64xf32>
    %491 = arith.mulf %490, %486 : vector<16x64xf32>
    %492 = arith.mulf %491, %486 : vector<16x64xf32>
    %493 = arith.addf %486, %492 : vector<16x64xf32>
    %cst_299 = arith.constant 0.797884583 : f32
    %494 = vector.broadcast %cst_299 : f32 to vector<16x64xf32>
    %495 = arith.mulf %494, %493 : vector<16x64xf32>
    %496 = math.tanh %495 : vector<16x64xf32>
    %cst_300 = arith.constant 1.000000e+00 : f32
    %497 = vector.broadcast %cst_300 : f32 to vector<16x64xf32>
    %498 = arith.addf %497, %496 : vector<16x64xf32>
    %499 = arith.mulf %488, %498 : vector<16x64xf32>
    %c1_301 = arith.constant 1 : index
    %c0_302 = arith.constant 0 : index
    %c0_303 = arith.constant 0 : index
    %c0_304 = arith.constant 0 : index
    %500 = vector.load %arg17[%c1_301, %c0_302, %c0_303, %c0_304] : memref<2x2x64x32xbf16, #tpu.memory_space<vmem>>, vector<1x1x64x32xbf16>
    %501 = vector.shape_cast %500 : vector<1x1x64x32xbf16> to vector<64x32xbf16>
    %502 = arith.truncf %499 : vector<16x64xf32> to vector<16x64xbf16>
    %cst_305 = arith.constant dense<0.000000e+00> : vector<16x32xf32>
    %503 = tpu.matmul %502, %501, %cst_305 {dimension_numbers = #tpu.dot_dimension_numbers<[1], [0], [0], [1], [0, 0, 1, 1], [], []>} : vector<16x64xbf16>, vector<64x32xbf16>, vector<16x32xf32> -> vector<16x32xf32>
    %c1_306 = arith.constant 1 : index
    %c0_307 = arith.constant 0 : index
    %c0_308 = arith.constant 0 : index
    %c0_309 = arith.constant 0 : index
    %504 = vector.load %arg18[%c1_306, %c0_307, %c0_308, %c0_309] : memref<2x2x1x32xf32, #tpu.memory_space<vmem>>, vector<1x1x1x32xf32>
    %505 = vector.shape_cast %504 : vector<1x1x1x32xf32> to vector<1x32xf32>
    %506 = vector.broadcast %505 : vector<1x32xf32> to vector<16x32xf32>
    %507 = arith.addf %503, %506 : vector<16x32xf32>
    %508 = arith.addf %507, %478 : vector<16x32xf32>
    %c1_310 = arith.constant 1 : index
    %c0_311 = arith.constant 0 : index
    %c0_312 = arith.constant 0 : index
    %c0_313 = arith.constant 0 : index
    %509 = vector.load %arg19[%c1_310, %c0_311, %c0_312, %c0_313] : memref<2x2x1x32xf32, #tpu.memory_space<vmem>>, vector<1x1x1x32xf32>
    %510 = vector.shape_cast %509 : vector<1x1x1x32xf32> to vector<1x32xf32>
    %c1_314 = arith.constant 1 : index
    %c0_315 = arith.constant 0 : index
    %c0_316 = arith.constant 0 : index
    %c0_317 = arith.constant 0 : index
    %511 = vector.load %arg20[%c1_314, %c0_315, %c0_316, %c0_317] : memref<2x2x1x32xf32, #tpu.memory_space<vmem>>, vector<1x1x1x32xf32>
    %512 = vector.shape_cast %511 : vector<1x1x1x32xf32> to vector<1x32xf32>
    %cst_318 = arith.constant dense<0.000000e+00> : vector<16xf32>
    %513 = vector.multi_reduction <add>, %508, %cst_318 [1] : vector<16x32xf32> to vector<16xf32>
    %514 = vector.shape_cast %513 : vector<16xf32> to vector<16x1xf32>
    %cst_319 = arith.constant 3.200000e+01 : f32
    %515 = vector.broadcast %cst_319 : f32 to vector<16x1xf32>
    %516 = arith.divf %514, %515 : vector<16x1xf32>
    %517 = vector.broadcast %516 : vector<16x1xf32> to vector<16x32xf32>
    %518 = arith.subf %508, %517 : vector<16x32xf32>
    %519 = arith.mulf %518, %518 : vector<16x32xf32>
    %cst_320 = arith.constant dense<0.000000e+00> : vector<16xf32>
    %520 = vector.multi_reduction <add>, %519, %cst_320 [1] : vector<16x32xf32> to vector<16xf32>
    %521 = vector.shape_cast %520 : vector<16xf32> to vector<16x1xf32>
    %cst_321 = arith.constant 3.200000e+01 : f32
    %522 = vector.broadcast %cst_321 : f32 to vector<16x1xf32>
    %523 = arith.divf %521, %522 : vector<16x1xf32>
    %cst_322 = arith.constant 9.99999996E-13 : f32
    %524 = vector.broadcast %cst_322 : f32 to vector<16x1xf32>
    %525 = arith.addf %523, %524 : vector<16x1xf32>
    %526 = math.rsqrt %525 : vector<16x1xf32>
    %527 = vector.broadcast %526 : vector<16x1xf32> to vector<16x32xf32>
    %528 = arith.mulf %518, %527 : vector<16x32xf32>
    %529 = vector.broadcast %510 : vector<1x32xf32> to vector<16x32xf32>
    %530 = arith.mulf %528, %529 : vector<16x32xf32>
    %531 = vector.broadcast %512 : vector<1x32xf32> to vector<16x32xf32>
    %532 = arith.addf %530, %531 : vector<16x32xf32>
    %533 = tpu.concatenate %532, %532, %532, %532 in 0 : vector<16x32xf32>, vector<16x32xf32>, vector<16x32xf32>, vector<16x32xf32> -> vector<64x32xf32>
    %c1_323 = arith.constant 1 : index
    %c1_324 = arith.constant 1 : index
    %c0_325 = arith.constant 0 : index
    %c0_326 = arith.constant 0 : index
    %534 = vector.load %arg5[%c1_323, %c1_324, %c0_325, %c0_326] : memref<2x2x32x32xbf16, #tpu.memory_space<vmem>>, vector<1x1x32x32xbf16>
    %535 = vector.shape_cast %534 : vector<1x1x32x32xbf16> to vector<32x32xbf16>
    %536 = arith.truncf %533 : vector<64x32xf32> to vector<64x32xbf16>
    %cst_327 = arith.constant dense<0.000000e+00> : vector<64x32xf32>
    %537 = tpu.matmul %536, %535, %cst_327 {dimension_numbers = #tpu.dot_dimension_numbers<[1], [0], [0], [1], [0, 0, 1, 1], [], []>} : vector<64x32xbf16>, vector<32x32xbf16>, vector<64x32xf32> -> vector<64x32xf32>
    %c1_328 = arith.constant 1 : index
    %c1_329 = arith.constant 1 : index
    %c0_330 = arith.constant 0 : index
    %c0_331 = arith.constant 0 : index
    %538 = vector.load %arg6[%c1_328, %c1_329, %c0_330, %c0_331] : memref<2x2x1x32xf32, #tpu.memory_space<vmem>>, vector<1x1x1x32xf32>
    %539 = vector.shape_cast %538 : vector<1x1x1x32xf32> to vector<1x32xf32>
    %540 = vector.broadcast %539 : vector<1x32xf32> to vector<64x32xf32>
    %541 = arith.addf %537, %540 : vector<64x32xf32>
    %c1_332 = arith.constant 1 : index
    %c1_333 = arith.constant 1 : index
    %c0_334 = arith.constant 0 : index
    %c0_335 = arith.constant 0 : index
    %542 = vector.load %arg7[%c1_332, %c1_333, %c0_334, %c0_335] : memref<2x2x32x32xbf16, #tpu.memory_space<vmem>>, vector<1x1x32x32xbf16>
    %543 = vector.shape_cast %542 : vector<1x1x32x32xbf16> to vector<32x32xbf16>
    %544 = arith.truncf %533 : vector<64x32xf32> to vector<64x32xbf16>
    %cst_336 = arith.constant dense<0.000000e+00> : vector<64x32xf32>
    %545 = tpu.matmul %544, %543, %cst_336 {dimension_numbers = #tpu.dot_dimension_numbers<[1], [0], [0], [1], [0, 0, 1, 1], [], []>} : vector<64x32xbf16>, vector<32x32xbf16>, vector<64x32xf32> -> vector<64x32xf32>
    %c1_337 = arith.constant 1 : index
    %c1_338 = arith.constant 1 : index
    %c0_339 = arith.constant 0 : index
    %c0_340 = arith.constant 0 : index
    %546 = vector.load %arg8[%c1_337, %c1_338, %c0_339, %c0_340] : memref<2x2x1x32xf32, #tpu.memory_space<vmem>>, vector<1x1x1x32xf32>
    %547 = vector.shape_cast %546 : vector<1x1x1x32xf32> to vector<1x32xf32>
    %548 = vector.broadcast %547 : vector<1x32xf32> to vector<64x32xf32>
    %549 = arith.addf %545, %548 : vector<64x32xf32>
    %550 = arith.mulf %549, %25 : vector<64x32xf32>
    %c1_341 = arith.constant 1 : index
    %c1_342 = arith.constant 1 : index
    %c0_343 = arith.constant 0 : index
    %c0_344 = arith.constant 0 : index
    %551 = vector.load %arg9[%c1_341, %c1_342, %c0_343, %c0_344] : memref<2x2x32x32xbf16, #tpu.memory_space<vmem>>, vector<1x1x32x32xbf16>
    %552 = vector.shape_cast %551 : vector<1x1x32x32xbf16> to vector<32x32xbf16>
    %553 = arith.truncf %533 : vector<64x32xf32> to vector<64x32xbf16>
    %cst_345 = arith.constant dense<0.000000e+00> : vector<64x32xf32>
    %554 = tpu.matmul %553, %552, %cst_345 {dimension_numbers = #tpu.dot_dimension_numbers<[1], [0], [0], [1], [0, 0, 1, 1], [], []>} : vector<64x32xbf16>, vector<32x32xbf16>, vector<64x32xf32> -> vector<64x32xf32>
    %c1_346 = arith.constant 1 : index
    %c1_347 = arith.constant 1 : index
    %c0_348 = arith.constant 0 : index
    %c0_349 = arith.constant 0 : index
    %555 = vector.load %arg10[%c1_346, %c1_347, %c0_348, %c0_349] : memref<2x2x1x32xf32, #tpu.memory_space<vmem>>, vector<1x1x1x32xf32>
    %556 = vector.shape_cast %555 : vector<1x1x1x32xf32> to vector<1x32xf32>
    %557 = vector.broadcast %556 : vector<1x32xf32> to vector<64x32xf32>
    %558 = arith.addf %554, %557 : vector<64x32xf32>
    %559 = arith.mulf %558, %25 : vector<64x32xf32>
    %560 = arith.truncf %541 : vector<64x32xf32> to vector<64x32xbf16>
    %561 = arith.truncf %550 : vector<64x32xf32> to vector<64x32xbf16>
    %cst_350 = arith.constant dense<0.000000e+00> : vector<64x64xf32>
    %562 = tpu.matmul %560, %561, %cst_350 {dimension_numbers = #tpu.dot_dimension_numbers<[1], [1], [0], [0], [0, 0, 1, 0], [], []>} : vector<64x32xbf16>, vector<64x32xbf16>, vector<64x64xf32> -> vector<64x64xf32>
    %563 = arith.addf %562, %368 : vector<64x64xf32>
    %cst_351 = arith.constant dense<0xFF800000> : vector<64xf32>
    %564 = vector.multi_reduction <maximumf>, %563, %cst_351 [1] : vector<64x64xf32> to vector<64xf32>
    %565 = vector.shape_cast %564 : vector<64xf32> to vector<64x1xf32>
    %566 = vector.broadcast %565 : vector<64x1xf32> to vector<64x64xf32>
    %567 = arith.subf %563, %566 : vector<64x64xf32>
    %568 = math.exp %567 : vector<64x64xf32>
    %cst_352 = arith.constant dense<0.000000e+00> : vector<64xf32>
    %569 = vector.multi_reduction <add>, %568, %cst_352 [1] : vector<64x64xf32> to vector<64xf32>
    %570 = vector.shape_cast %569 : vector<64xf32> to vector<64x1xf32>
    %571 = tpu.reciprocal %570 {approx = true} : vector<64x1xf32> -> vector<64x1xf32>
    %572 = vector.broadcast %571 : vector<64x1xf32> to vector<64x64xf32>
    %573 = arith.mulf %568, %572 : vector<64x64xf32>
    %c1_353 = arith.constant 1 : index
    %c1_354 = arith.constant 1 : index
    %c0_355 = arith.constant 0 : index
    %c0_356 = arith.constant 0 : index
    %574 = vector.load %arg11[%c1_353, %c1_354, %c0_355, %c0_356] : memref<2x2x32x32xbf16, #tpu.memory_space<vmem>>, vector<1x1x32x32xbf16>
    %575 = vector.shape_cast %574 : vector<1x1x32x32xbf16> to vector<32x32xbf16>
    %576 = arith.truncf %559 : vector<64x32xf32> to vector<64x32xbf16>
    %cst_357 = arith.constant dense<0.000000e+00> : vector<64x32xf32>
    %577 = tpu.matmul %576, %575, %cst_357 {dimension_numbers = #tpu.dot_dimension_numbers<[1], [0], [0], [1], [0, 0, 1, 1], [], []>} : vector<64x32xbf16>, vector<32x32xbf16>, vector<64x32xf32> -> vector<64x32xf32>
    %578 = vector.extract_strided_slice %573 {offsets = [0, 0], sizes = [16, 64], strides = [1, 1]} : vector<64x64xf32> to vector<16x64xf32>
    %579 = vector.extract_strided_slice %573 {offsets = [16, 0], sizes = [16, 64], strides = [1, 1]} : vector<64x64xf32> to vector<16x64xf32>
    %580 = arith.addf %578, %579 : vector<16x64xf32>
    %581 = vector.extract_strided_slice %573 {offsets = [32, 0], sizes = [16, 64], strides = [1, 1]} : vector<64x64xf32> to vector<16x64xf32>
    %582 = arith.addf %580, %581 : vector<16x64xf32>
    %583 = vector.extract_strided_slice %573 {offsets = [48, 0], sizes = [16, 64], strides = [1, 1]} : vector<64x64xf32> to vector<16x64xf32>
    %584 = arith.addf %582, %583 : vector<16x64xf32>
    %585 = arith.truncf %584 : vector<16x64xf32> to vector<16x64xbf16>
    %586 = arith.truncf %577 : vector<64x32xf32> to vector<64x32xbf16>
    %cst_358 = arith.constant dense<0.000000e+00> : vector<16x32xf32>
    %587 = tpu.matmul %585, %586, %cst_358 {dimension_numbers = #tpu.dot_dimension_numbers<[1], [0], [0], [1], [0, 0, 1, 1], [], []>} : vector<16x64xbf16>, vector<64x32xbf16>, vector<16x32xf32> -> vector<16x32xf32>
    %c1_359 = arith.constant 1 : index
    %c1_360 = arith.constant 1 : index
    %c0_361 = arith.constant 0 : index
    %c0_362 = arith.constant 0 : index
    %588 = vector.load %arg12[%c1_359, %c1_360, %c0_361, %c0_362] : memref<2x2x1x32xf32, #tpu.memory_space<vmem>>, vector<1x1x1x32xf32>
    %589 = vector.shape_cast %588 : vector<1x1x1x32xf32> to vector<1x32xf32>
    %590 = vector.broadcast %589 : vector<1x32xf32> to vector<16x32xf32>
    %591 = arith.addf %587, %590 : vector<16x32xf32>
    %592 = arith.addf %591, %532 : vector<16x32xf32>
    %c1_363 = arith.constant 1 : index
    %c1_364 = arith.constant 1 : index
    %c0_365 = arith.constant 0 : index
    %c0_366 = arith.constant 0 : index
    %593 = vector.load %arg13[%c1_363, %c1_364, %c0_365, %c0_366] : memref<2x2x1x32xf32, #tpu.memory_space<vmem>>, vector<1x1x1x32xf32>
    %594 = vector.shape_cast %593 : vector<1x1x1x32xf32> to vector<1x32xf32>
    %c1_367 = arith.constant 1 : index
    %c1_368 = arith.constant 1 : index
    %c0_369 = arith.constant 0 : index
    %c0_370 = arith.constant 0 : index
    %595 = vector.load %arg14[%c1_367, %c1_368, %c0_369, %c0_370] : memref<2x2x1x32xf32, #tpu.memory_space<vmem>>, vector<1x1x1x32xf32>
    %596 = vector.shape_cast %595 : vector<1x1x1x32xf32> to vector<1x32xf32>
    %cst_371 = arith.constant dense<0.000000e+00> : vector<16xf32>
    %597 = vector.multi_reduction <add>, %592, %cst_371 [1] : vector<16x32xf32> to vector<16xf32>
    %598 = vector.shape_cast %597 : vector<16xf32> to vector<16x1xf32>
    %cst_372 = arith.constant 3.200000e+01 : f32
    %599 = vector.broadcast %cst_372 : f32 to vector<16x1xf32>
    %600 = arith.divf %598, %599 : vector<16x1xf32>
    %601 = vector.broadcast %600 : vector<16x1xf32> to vector<16x32xf32>
    %602 = arith.subf %592, %601 : vector<16x32xf32>
    %603 = arith.mulf %602, %602 : vector<16x32xf32>
    %cst_373 = arith.constant dense<0.000000e+00> : vector<16xf32>
    %604 = vector.multi_reduction <add>, %603, %cst_373 [1] : vector<16x32xf32> to vector<16xf32>
    %605 = vector.shape_cast %604 : vector<16xf32> to vector<16x1xf32>
    %cst_374 = arith.constant 3.200000e+01 : f32
    %606 = vector.broadcast %cst_374 : f32 to vector<16x1xf32>
    %607 = arith.divf %605, %606 : vector<16x1xf32>
    %cst_375 = arith.constant 9.99999996E-13 : f32
    %608 = vector.broadcast %cst_375 : f32 to vector<16x1xf32>
    %609 = arith.addf %607, %608 : vector<16x1xf32>
    %610 = math.rsqrt %609 : vector<16x1xf32>
    %611 = vector.broadcast %610 : vector<16x1xf32> to vector<16x32xf32>
    %612 = arith.mulf %602, %611 : vector<16x32xf32>
    %613 = vector.broadcast %594 : vector<1x32xf32> to vector<16x32xf32>
    %614 = arith.mulf %612, %613 : vector<16x32xf32>
    %615 = vector.broadcast %596 : vector<1x32xf32> to vector<16x32xf32>
    %616 = arith.addf %614, %615 : vector<16x32xf32>
    %c1_376 = arith.constant 1 : index
    %c1_377 = arith.constant 1 : index
    %c0_378 = arith.constant 0 : index
    %c0_379 = arith.constant 0 : index
    %617 = vector.load %arg15[%c1_376, %c1_377, %c0_378, %c0_379] : memref<2x2x32x64xbf16, #tpu.memory_space<vmem>>, vector<1x1x32x64xbf16>
    %618 = vector.shape_cast %617 : vector<1x1x32x64xbf16> to vector<32x64xbf16>
    %619 = arith.truncf %616 : vector<16x32xf32> to vector<16x32xbf16>
    %cst_380 = arith.constant dense<0.000000e+00> : vector<16x64xf32>
    %620 = tpu.matmul %619, %618, %cst_380 {dimension_numbers = #tpu.dot_dimension_numbers<[1], [0], [0], [1], [0, 0, 1, 1], [], []>} : vector<16x32xbf16>, vector<32x64xbf16>, vector<16x64xf32> -> vector<16x64xf32>
    %c1_381 = arith.constant 1 : index
    %c1_382 = arith.constant 1 : index
    %c0_383 = arith.constant 0 : index
    %c0_384 = arith.constant 0 : index
    %621 = vector.load %arg16[%c1_381, %c1_382, %c0_383, %c0_384] : memref<2x2x1x64xf32, #tpu.memory_space<vmem>>, vector<1x1x1x64xf32>
    %622 = vector.shape_cast %621 : vector<1x1x1x64xf32> to vector<1x64xf32>
    %623 = vector.broadcast %622 : vector<1x64xf32> to vector<16x64xf32>
    %624 = arith.addf %620, %623 : vector<16x64xf32>
    %cst_385 = arith.constant 5.000000e-01 : f32
    %625 = vector.broadcast %cst_385 : f32 to vector<16x64xf32>
    %626 = arith.mulf %625, %624 : vector<16x64xf32>
    %cst_386 = arith.constant 4.471500e-02 : f32
    %627 = vector.broadcast %cst_386 : f32 to vector<16x64xf32>
    %628 = arith.mulf %627, %624 : vector<16x64xf32>
    %629 = arith.mulf %628, %624 : vector<16x64xf32>
    %630 = arith.mulf %629, %624 : vector<16x64xf32>
    %631 = arith.addf %624, %630 : vector<16x64xf32>
    %cst_387 = arith.constant 0.797884583 : f32
    %632 = vector.broadcast %cst_387 : f32 to vector<16x64xf32>
    %633 = arith.mulf %632, %631 : vector<16x64xf32>
    %634 = math.tanh %633 : vector<16x64xf32>
    %cst_388 = arith.constant 1.000000e+00 : f32
    %635 = vector.broadcast %cst_388 : f32 to vector<16x64xf32>
    %636 = arith.addf %635, %634 : vector<16x64xf32>
    %637 = arith.mulf %626, %636 : vector<16x64xf32>
    %c1_389 = arith.constant 1 : index
    %c1_390 = arith.constant 1 : index
    %c0_391 = arith.constant 0 : index
    %c0_392 = arith.constant 0 : index
    %638 = vector.load %arg17[%c1_389, %c1_390, %c0_391, %c0_392] : memref<2x2x64x32xbf16, #tpu.memory_space<vmem>>, vector<1x1x64x32xbf16>
    %639 = vector.shape_cast %638 : vector<1x1x64x32xbf16> to vector<64x32xbf16>
    %640 = arith.truncf %637 : vector<16x64xf32> to vector<16x64xbf16>
    %cst_393 = arith.constant dense<0.000000e+00> : vector<16x32xf32>
    %641 = tpu.matmul %640, %639, %cst_393 {dimension_numbers = #tpu.dot_dimension_numbers<[1], [0], [0], [1], [0, 0, 1, 1], [], []>} : vector<16x64xbf16>, vector<64x32xbf16>, vector<16x32xf32> -> vector<16x32xf32>
    %c1_394 = arith.constant 1 : index
    %c1_395 = arith.constant 1 : index
    %c0_396 = arith.constant 0 : index
    %c0_397 = arith.constant 0 : index
    %642 = vector.load %arg18[%c1_394, %c1_395, %c0_396, %c0_397] : memref<2x2x1x32xf32, #tpu.memory_space<vmem>>, vector<1x1x1x32xf32>
    %643 = vector.shape_cast %642 : vector<1x1x1x32xf32> to vector<1x32xf32>
    %644 = vector.broadcast %643 : vector<1x32xf32> to vector<16x32xf32>
    %645 = arith.addf %641, %644 : vector<16x32xf32>
    %646 = arith.addf %645, %616 : vector<16x32xf32>
    %c1_398 = arith.constant 1 : index
    %c1_399 = arith.constant 1 : index
    %c0_400 = arith.constant 0 : index
    %c0_401 = arith.constant 0 : index
    %647 = vector.load %arg19[%c1_398, %c1_399, %c0_400, %c0_401] : memref<2x2x1x32xf32, #tpu.memory_space<vmem>>, vector<1x1x1x32xf32>
    %648 = vector.shape_cast %647 : vector<1x1x1x32xf32> to vector<1x32xf32>
    %c1_402 = arith.constant 1 : index
    %c1_403 = arith.constant 1 : index
    %c0_404 = arith.constant 0 : index
    %c0_405 = arith.constant 0 : index
    %649 = vector.load %arg20[%c1_402, %c1_403, %c0_404, %c0_405] : memref<2x2x1x32xf32, #tpu.memory_space<vmem>>, vector<1x1x1x32xf32>
    %650 = vector.shape_cast %649 : vector<1x1x1x32xf32> to vector<1x32xf32>
    %cst_406 = arith.constant dense<0.000000e+00> : vector<16xf32>
    %651 = vector.multi_reduction <add>, %646, %cst_406 [1] : vector<16x32xf32> to vector<16xf32>
    %652 = vector.shape_cast %651 : vector<16xf32> to vector<16x1xf32>
    %cst_407 = arith.constant 3.200000e+01 : f32
    %653 = vector.broadcast %cst_407 : f32 to vector<16x1xf32>
    %654 = arith.divf %652, %653 : vector<16x1xf32>
    %655 = vector.broadcast %654 : vector<16x1xf32> to vector<16x32xf32>
    %656 = arith.subf %646, %655 : vector<16x32xf32>
    %657 = arith.mulf %656, %656 : vector<16x32xf32>
    %cst_408 = arith.constant dense<0.000000e+00> : vector<16xf32>
    %658 = vector.multi_reduction <add>, %657, %cst_408 [1] : vector<16x32xf32> to vector<16xf32>
    %659 = vector.shape_cast %658 : vector<16xf32> to vector<16x1xf32>
    %cst_409 = arith.constant 3.200000e+01 : f32
    %660 = vector.broadcast %cst_409 : f32 to vector<16x1xf32>
    %661 = arith.divf %659, %660 : vector<16x1xf32>
    %cst_410 = arith.constant 9.99999996E-13 : f32
    %662 = vector.broadcast %cst_410 : f32 to vector<16x1xf32>
    %663 = arith.addf %661, %662 : vector<16x1xf32>
    %664 = math.rsqrt %663 : vector<16x1xf32>
    %665 = vector.broadcast %664 : vector<16x1xf32> to vector<16x32xf32>
    %666 = arith.mulf %656, %665 : vector<16x32xf32>
    %667 = vector.broadcast %648 : vector<1x32xf32> to vector<16x32xf32>
    %668 = arith.mulf %666, %667 : vector<16x32xf32>
    %669 = vector.broadcast %650 : vector<1x32xf32> to vector<16x32xf32>
    %670 = arith.addf %668, %669 : vector<16x32xf32>
    %671 = vector.extract_strided_slice %670 {offsets = [0, 0], sizes = [1, 32], strides = [1, 1]} : vector<16x32xf32> to vector<1x32xf32>
    %672 = vector.extract_strided_slice %670 {offsets = [8, 0], sizes = [1, 32], strides = [1, 1]} : vector<16x32xf32> to vector<1x32xf32>
    %673 = tpu.concatenate %671, %672 in 0 : vector<1x32xf32>, vector<1x32xf32> -> vector<2x32xf32>
    %c1_411 = arith.constant 1 : index
    %c0_412 = arith.constant 0 : index
    %c0_413 = arith.constant 0 : index
    %674 = vector.load %arg21[%c1_411, %c0_412, %c0_413] : memref<2x32x32xbf16, #tpu.memory_space<vmem>>, vector<1x32x32xbf16>
    %675 = vector.shape_cast %674 : vector<1x32x32xbf16> to vector<32x32xbf16>
    %676 = arith.truncf %673 : vector<2x32xf32> to vector<2x32xbf16>
    %cst_414 = arith.constant dense<0.000000e+00> : vector<2x32xf32>
    %677 = tpu.matmul %676, %675, %cst_414 {dimension_numbers = #tpu.dot_dimension_numbers<[1], [0], [0], [1], [0, 0, 1, 1], [], []>} : vector<2x32xbf16>, vector<32x32xbf16>, vector<2x32xf32> -> vector<2x32xf32>
    %c1_415 = arith.constant 1 : index
    %c0_416 = arith.constant 0 : index
    %c0_417 = arith.constant 0 : index
    %678 = vector.load %arg22[%c1_415, %c0_416, %c0_417] : memref<2x1x32xf32, #tpu.memory_space<vmem>>, vector<1x1x32xf32>
    %679 = vector.shape_cast %678 : vector<1x1x32xf32> to vector<1x32xf32>
    %680 = vector.broadcast %679 : vector<1x32xf32> to vector<2x32xf32>
    %681 = arith.addf %677, %680 : vector<2x32xf32>
    %682 = math.tanh %681 : vector<2x32xf32>
    %c1_418 = arith.constant 1 : index
    %c0_419 = arith.constant 0 : index
    %c0_420 = arith.constant 0 : index
    %683 = vector.load %arg23[%c1_418, %c0_419, %c0_420] : memref<2x32x16xbf16, #tpu.memory_space<vmem>>, vector<1x32x16xbf16>
    %684 = vector.shape_cast %683 : vector<1x32x16xbf16> to vector<32x16xbf16>
    %685 = arith.truncf %682 : vector<2x32xf32> to vector<2x32xbf16>
    %cst_421 = arith.constant dense<0.000000e+00> : vector<2x16xf32>
    %686 = tpu.matmul %685, %684, %cst_421 {dimension_numbers = #tpu.dot_dimension_numbers<[1], [0], [0], [1], [0, 0, 1, 1], [], []>} : vector<2x32xbf16>, vector<32x16xbf16>, vector<2x16xf32> -> vector<2x16xf32>
    %c1_422 = arith.constant 1 : index
    %c0_423 = arith.constant 0 : index
    %c0_424 = arith.constant 0 : index
    %687 = vector.load %arg24[%c1_422, %c0_423, %c0_424] : memref<2x1x16xf32, #tpu.memory_space<vmem>>, vector<1x1x16xf32>
    %688 = vector.shape_cast %687 : vector<1x1x16xf32> to vector<1x16xf32>
    %689 = vector.broadcast %688 : vector<1x16xf32> to vector<2x16xf32>
    %690 = arith.addf %686, %689 : vector<2x16xf32>
    %c1_425 = arith.constant 1 : index
    %c0_426 = arith.constant 0 : index
    %c0_427 = arith.constant 0 : index
    %691 = vector.load %arg25[%c1_425, %c0_426, %c0_427] : memref<2x2x16xf32, #tpu.memory_space<vmem>>, vector<1x2x16xf32>
    %692 = vector.shape_cast %691 : vector<1x2x16xf32> to vector<2x16xf32>
    %693 = vector.shape_cast %690 : vector<2x16xf32> to vector<1x2x16xf32>
    tpu.vector_store %arg25[%c1_425, %c0_426, %c0_427], %693 {strides = array<i32>} : memref<2x2x16xf32, #tpu.memory_space<vmem>>, vector<1x2x16xf32>,
    return
  }
  func.func @transform_0(%arg0: i32) -> (i32, i32, i32) {
    %c0_i32 = arith.constant 0 : i32
    %c0_i32_0 = arith.constant 0 : i32
    %c0_i32_1 = arith.constant 0 : i32
    %c0_i32_2 = arith.constant 0 : i32
    return %c0_i32, %c0_i32_0, %c0_i32_1 : i32, i32, i32
  }
  func.func @transform_1(%arg0: i32) -> (i32, i32, i32) {
    %c0_i32 = arith.constant 0 : i32
    %c0_i32_0 = arith.constant 0 : i32
    %c0_i32_1 = arith.constant 0 : i32
    %c0_i32_2 = arith.constant 0 : i32
    return %c0_i32, %c0_i32_0, %c0_i32_1 : i32, i32, i32
  }
  func.func @transform_2(%arg0: i32) -> (i32, i32, i32) {
    %c0_i32 = arith.constant 0 : i32
    %c0_i32_0 = arith.constant 0 : i32
    %c0_i32_1 = arith.constant 0 : i32
    %c0_i32_2 = arith.constant 0 : i32
    return %c0_i32, %c0_i32_0, %c0_i32_1 : i32, i32, i32
  }
  func.func @transform_3(%arg0: i32) -> (i32, i32, i32) {
    %c0_i32 = arith.constant 0 : i32
    %c0_i32_0 = arith.constant 0 : i32
    %c0_i32_1 = arith.constant 0 : i32
    %c0_i32_2 = arith.constant 0 : i32
    return %c0_i32, %c0_i32_0, %c0_i32_1 : i32, i32, i32
  }
  func.func @transform_4(%arg0: i32) -> (i32, i32, i32, i32) {
    %c0_i32 = arith.constant 0 : i32
    %c0_i32_0 = arith.constant 0 : i32
    %c0_i32_1 = arith.constant 0 : i32
    %c0_i32_2 = arith.constant 0 : i32
    %c0_i32_3 = arith.constant 0 : i32
    return %c0_i32, %c0_i32_0, %c0_i32_1, %c0_i32_2 : i32, i32, i32, i32
  }
  func.func @transform_5(%arg0: i32) -> (i32, i32, i32, i32) {
    %c0_i32 = arith.constant 0 : i32
    %c0_i32_0 = arith.constant 0 : i32
    %c0_i32_1 = arith.constant 0 : i32
    %c0_i32_2 = arith.constant 0 : i32
    %c0_i32_3 = arith.constant 0 : i32
    return %c0_i32, %c0_i32_0, %c0_i32_1, %c0_i32_2 : i32, i32, i32, i32
  }
  func.func @transform_6(%arg0: i32) -> (i32, i32, i32, i32) {
    %c0_i32 = arith.constant 0 : i32
    %c0_i32_0 = arith.constant 0 : i32
    %c0_i32_1 = arith.constant 0 : i32
    %c0_i32_2 = arith.constant 0 : i32
    %c0_i32_3 = arith.constant 0 : i32
    return %c0_i32, %c0_i32_0, %c0_i32_1, %c0_i32_2 : i32, i32, i32, i32
  }
  func.func @transform_7(%arg0: i32) -> (i32, i32, i32, i32) {
    %c0_i32 = arith.constant 0 : i32
    %c0_i32_0 = arith.constant 0 : i32
    %c0_i32_1 = arith.constant 0 : i32
    %c0_i32_2 = arith.constant 0 : i32
    %c0_i32_3 = arith.constant 0 : i32
    return %c0_i32, %c0_i32_0, %c0_i32_1, %c0_i32_2 : i32, i32, i32, i32
  }
  func.func @transform_8(%arg0: i32) -> (i32, i32, i32, i32) {
    %c0_i32 = arith.constant 0 : i32
    %c0_i32_0 = arith.constant 0 : i32
    %c0_i32_1 = arith.constant 0 : i32
    %c0_i32_2 = arith.constant 0 : i32
    %c0_i32_3 = arith.constant 0 : i32
    return %c0_i32, %c0_i32_0, %c0_i32_1, %c0_i32_2 : i32, i32, i32, i32
  }
  func.func @transform_9(%arg0: i32) -> (i32, i32, i32, i32) {
    %c0_i32 = arith.constant 0 : i32
    %c0_i32_0 = arith.constant 0 : i32
    %c0_i32_1 = arith.constant 0 : i32
    %c0_i32_2 = arith.constant 0 : i32
    %c0_i32_3 = arith.constant 0 : i32
    return %c0_i32, %c0_i32_0, %c0_i32_1, %c0_i32_2 : i32, i32, i32, i32
  }
  func.func @transform_10(%arg0: i32) -> (i32, i32, i32, i32) {
    %c0_i32 = arith.constant 0 : i32
    %c0_i32_0 = arith.constant 0 : i32
    %c0_i32_1 = arith.constant 0 : i32
    %c0_i32_2 = arith.constant 0 : i32
    %c0_i32_3 = arith.constant 0 : i32
    return %c0_i32, %c0_i32_0, %c0_i32_1, %c0_i32_2 : i32, i32, i32, i32
  }
  func.func @transform_11(%arg0: i32) -> (i32, i32, i32, i32) {
    %c0_i32 = arith.constant 0 : i32
    %c0_i32_0 = arith.constant 0 : i32
    %c0_i32_1 = arith.constant 0 : i32
    %c0_i32_2 = arith.constant 0 : i32
    %c0_i32_3 = arith.constant 0 : i32
    return %c0_i32, %c0_i32_0, %c0_i32_1, %c0_i32_2 : i32, i32, i32, i32
  }
  func.func @transform_12(%arg0: i32) -> (i32, i32, i32, i32) {
    %c0_i32 = arith.constant 0 : i32
    %c0_i32_0 = arith.constant 0 : i32
    %c0_i32_1 = arith.constant 0 : i32
    %c0_i32_2 = arith.constant 0 : i32
    %c0_i32_3 = arith.constant 0 : i32
    return %c0_i32, %c0_i32_0, %c0_i32_1, %c0_i32_2 : i32, i32, i32, i32
  }
  func.func @transform_13(%arg0: i32) -> (i32, i32, i32, i32) {
    %c0_i32 = arith.constant 0 : i32
    %c0_i32_0 = arith.constant 0 : i32
    %c0_i32_1 = arith.constant 0 : i32
    %c0_i32_2 = arith.constant 0 : i32
    %c0_i32_3 = arith.constant 0 : i32
    return %c0_i32, %c0_i32_0, %c0_i32_1, %c0_i32_2 : i32, i32, i32, i32
  }
  func.func @transform_14(%arg0: i32) -> (i32, i32, i32, i32) {
    %c0_i32 = arith.constant 0 : i32
    %c0_i32_0 = arith.constant 0 : i32
    %c0_i32_1 = arith.constant 0 : i32
    %c0_i32_2 = arith.constant 0 : i32
    %c0_i32_3 = arith.constant 0 : i32
    return %c0_i32, %c0_i32_0, %c0_i32_1, %c0_i32_2 : i32, i32, i32, i32
  }
  func.func @transform_15(%arg0: i32) -> (i32, i32, i32, i32) {
    %c0_i32 = arith.constant 0 : i32
    %c0_i32_0 = arith.constant 0 : i32
    %c0_i32_1 = arith.constant 0 : i32
    %c0_i32_2 = arith.constant 0 : i32
    %c0_i32_3 = arith.constant 0 : i32
    return %c0_i32, %c0_i32_0, %c0_i32_1, %c0_i32_2 : i32, i32, i32, i32
  }
  func.func @transform_16(%arg0: i32) -> (i32, i32, i32, i32) {
    %c0_i32 = arith.constant 0 : i32
    %c0_i32_0 = arith.constant 0 : i32
    %c0_i32_1 = arith.constant 0 : i32
    %c0_i32_2 = arith.constant 0 : i32
    %c0_i32_3 = arith.constant 0 : i32
    return %c0_i32, %c0_i32_0, %c0_i32_1, %c0_i32_2 : i32, i32, i32, i32
  }
  func.func @transform_17(%arg0: i32) -> (i32, i32, i32, i32) {
    %c0_i32 = arith.constant 0 : i32
    %c0_i32_0 = arith.constant 0 : i32
    %c0_i32_1 = arith.constant 0 : i32
    %c0_i32_2 = arith.constant 0 : i32
    %c0_i32_3 = arith.constant 0 : i32
    return %c0_i32, %c0_i32_0, %c0_i32_1, %c0_i32_2 : i32, i32, i32, i32
  }
  func.func @transform_18(%arg0: i32) -> (i32, i32, i32, i32) {
    %c0_i32 = arith.constant 0 : i32
    %c0_i32_0 = arith.constant 0 : i32
    %c0_i32_1 = arith.constant 0 : i32
    %c0_i32_2 = arith.constant 0 : i32
    %c0_i32_3 = arith.constant 0 : i32
    return %c0_i32, %c0_i32_0, %c0_i32_1, %c0_i32_2 : i32, i32, i32, i32
  }
  func.func @transform_19(%arg0: i32) -> (i32, i32, i32, i32) {
    %c0_i32 = arith.constant 0 : i32
    %c0_i32_0 = arith.constant 0 : i32
    %c0_i32_1 = arith.constant 0 : i32
    %c0_i32_2 = arith.constant 0 : i32
    %c0_i32_3 = arith.constant 0 : i32
    return %c0_i32, %c0_i32_0, %c0_i32_1, %c0_i32_2 : i32, i32, i32, i32
  }
  func.func @transform_20(%arg0: i32) -> (i32, i32, i32) {
    %c0_i32 = arith.constant 0 : i32
    %c0_i32_0 = arith.constant 0 : i32
    %c0_i32_1 = arith.constant 0 : i32
    %c0_i32_2 = arith.constant 0 : i32
    return %c0_i32, %c0_i32_0, %c0_i32_1 : i32, i32, i32
  }
  func.func @transform_21(%arg0: i32) -> (i32, i32, i32) {
    %c0_i32 = arith.constant 0 : i32
    %c0_i32_0 = arith.constant 0 : i32
    %c0_i32_1 = arith.constant 0 : i32
    %c0_i32_2 = arith.constant 0 : i32
    return %c0_i32, %c0_i32_0, %c0_i32_1 : i32, i32, i32
  }
  func.func @transform_22(%arg0: i32) -> (i32, i32, i32) {
    %c0_i32 = arith.constant 0 : i32
    %c0_i32_0 = arith.constant 0 : i32
    %c0_i32_1 = arith.constant 0 : i32
    %c0_i32_2 = arith.constant 0 : i32
    return %c0_i32, %c0_i32_0, %c0_i32_1 : i32, i32, i32
  }
  func.func @transform_23(%arg0: i32) -> (i32, i32, i32) {
    %c0_i32 = arith.constant 0 : i32
    %c0_i32_0 = arith.constant 0 : i32
    %c0_i32_1 = arith.constant 0 : i32
    %c0_i32_2 = arith.constant 0 : i32
    return %c0_i32, %c0_i32_0, %c0_i32_1 : i32, i32, i32
  }
  func.func @transform_24(%arg0: i32) -> (i32, i32, i32) {
    %c0_i32 = arith.constant 0 : i32
    %c0_i32_0 = arith.constant 0 : i32
    %c0_i32_1 = arith.constant 0 : i32
    %c0_i32_2 = arith.constant 0 : i32
    return %c0_i32, %c0_i32_0, %c0_i32_1 : i32, i32, i32
  }
}

</mosaic_0001>

<bundles_post_ra>
// kernel: _fused_forward.1
= control target key start
LH: loop header
LB: loop body
LE: loop exit
PB: predicated region body
PF: predicated region fallthrough
CT: control target
= control target key end

     0   :  { %s6805_s0 = inlined_call_operand.vmem [shape: f32[2,16,32], index: 0, kind: input, shape index: {}]   ;;  %s6806_s1 = inlined_call_operand.vmem [shape: f32[2,1,64], index: 1, kind: input, shape index: {}]   ;;  %s6807_s2 = inlined_call_operand.vmem [shape: f32[2,1,32], index: 2, kind: input, shape index: {}]   ;;  %s6808_s3 = inlined_call_operand.vmem [shape: f32[2,1,32], index: 3, kind: input, shape index: {}]   ;;  %s6809_s4 = inlined_call_operand.vmem [shape: bf16[2,2,32,32], index: 4, kind: input, shape index: {}]   ;;  %s6810_s5 = inlined_call_operand.vmem [shape: f32[2,2,1,32], index: 5, kind: input, shape index: {}]   ;;  %s6811_s6 = inlined_call_operand.vmem [shape: bf16[2,2,32,32], index: 6, kind: input, shape index: {}]   ;;  %s6812_s7 = inlined_call_operand.vmem [shape: f32[2,2,1,32], index: 7, kind: input, shape index: {}]   ;;  %s6813_s8 = inlined_call_operand.vmem [shape: bf16[2,2,32,32], index: 8, kind: input, shape index: {}]   ;;  %s6814_s9 = inlined_call_operand.vmem [shape: f32[2,2,1,32], index: 9, kind: input, shape index: {}]   ;;  %s6815_s10 = inlined_call_operand.vmem [shape: bf16[2,2,32,32], index: 10, kind: input, shape index: {}]   ;;  %s6816_s11 = inlined_call_operand.vmem [shape: f32[2,2,1,32], index: 11, kind: input, shape index: {}]   ;;  %s6817_s12 = inlined_call_operand.vmem [shape: f32[2,2,1,32], index: 12, kind: input, shape index: {}]   ;;  %s6818_s13 = inlined_call_operand.vmem [shape: f32[2,2,1,32], index: 13, kind: input, shape index: {}]   ;;  %s6819_s14 = inlined_call_operand.vmem [shape: bf16[2,2,32,64], index: 14, kind: input, shape index: {}]   ;;  %s6820_s15 = inlined_call_operand.vmem [shape: f32[2,2,1,64], index: 15, kind: input, shape index: {}]   ;;  %s6821_s16 = inlined_call_operand.vmem [shape: bf16[2,2,64,32], index: 16, kind: input, shape index: {}]   ;;  %s6822_s17 = inlined_call_operand.vmem [shape: f32[2,2,1,32], index: 17, kind: input, shape index: {}]   ;;  %s6823_s18 = inlined_call_operand.vmem [shape: f32[2,2,1,32], index: 18, kind: input, shape index: {}]   ;;  %s6824_s19 = inlined_call_operand.vmem [shape: f32[2,2,1,32], index: 19, kind: input, shape index: {}]   ;;  %s6825_s20 = inlined_call_operand.vmem [shape: bf16[2,32,32], index: 20, kind: input, shape index: {}]   ;;  %s6826_s21 = inlined_call_operand.vmem [shape: f32[2,1,32], index: 21, kind: input, shape index: {}]   ;;  %s6827_s22 = inlined_call_operand.vmem [shape: bf16[2,32,16], index: 22, kind: input, shape index: {}]   ;;  %s6828_s23 = inlined_call_operand.vmem [shape: f32[2,1,16], index: 23, kind: input, shape index: {}]   ;;  %s6829_s24 = inlined_call_operand.hbm [shape: f32[2,2,16], index: 24, kind: output, shape index: {}]  }
   0x1   :  { %6846 = sst [smem:[#allocation5_spill]] %s6805_s0 }
   0x2   :  { %6847 = sst [smem:[#allocation6_spill]] %s6806_s1 }
   0x3   :  { %6848 = sst [smem:[#allocation7_spill]] %s6807_s2 }
   0x4   :  { %6849 = sst [smem:[#allocation8_spill]] %s6808_s3 }
   0x5   :  { %6850 = sst [smem:[#allocation9_spill]] %s6809_s4 }
   0x6   :  { %6851 = sst [smem:[#allocation10_spill]] %s6810_s5 }
   0x7   :  { %6852 = sst [smem:[#allocation11_spill]] %s6811_s6 }
   0x8   :  { %6853 = sst [smem:[#allocation12_spill]] %s6812_s7 }
   0x9   :  { %6854 = sst [smem:[#allocation13_spill]] %s6813_s8 }
   0xa   :  { %6855 = sst [smem:[#allocation14_spill]] %s6829_s24 }
   0xb   :  { %s6856_s27 = sld [smem:[#allocation5_spill]]  ;;  %vm6839_vm0 = vcmask 261120  }
  0x11   :  { %v189_v0 = vld [vmem:[%s6856_s27] sm:$0xff]  ;;  %v190_v1 = vld [vmem:[%s6856_s27 + $0x8] sm:$0xff] }
  0x12   :  { %v194_v2 = vsel %vm6839_vm0, %v189_v0, 0.0  ;;  %v197_v3 = vsel %vm6839_vm0, %v190_v1, 0.0 }
  0x13   :  { %195 = vadd.xlane.f32.xlu0 %v194_v2 }
  0x17   :  { %198 = vadd.xlane.f32.xlu0 %v197_v3 }
  0x18   :  { %29 = vsyncpa [#allocation3], 0  ;;  %s6857_s0 = sld [smem:[#allocation9_spill]]  ;;  %s6858_s3 = sld [smem:[#allocation11_spill]]  ;;  %v5205_v37 = vld [vmem:[%s6815_s10] sm:$0xff]   ;;  %v5206_v38 = vld [vmem:[%s6815_s10 + $0x8] sm:$0xff]   ;;  %v79_v40 = vlaneseq }
  0x19   :  { %s6859_s28 = sld [smem:[#allocation13_spill]]  ;;  %s6860_s29 = sld [smem:[#allocation7_spill]]  ;;  %v5475_v39 = vmov 0.0  }
  0x1a   :  { %s6861_s25 = sld [smem:[#allocation8_spill]]  ;;  %v5666_v41 = vshrl.u32 %v79_v40, 7  ;;  %v5671_v43 = vand.u32 127, %v79_v40  ;;  %s6862_s30 = sld [smem:[#allocation12_spill]] }
  0x1b   :  { %s6863_s1 = sld [smem:[#allocation10_spill]]  ;;  %s6866_s7 = sld [smem:[#allocation6_spill]] }
  0x1c   :  { %v5669_v42 = vadd.s32 16, %v5666_v41  ;;  %v5674_v44 = vadd.s32 24, %v5666_v41  ;;  %v5677_v45 = vadd.s32 8, %v5666_v41  ;;  %v5681_v47 = vshra.s32 %v5671_v43, 3 }
  0x1d   :  { %v90_v48 = vshra.s32 %v5666_v41, 4  ;;  %v5701_v52 = vadd.s32 48, %v5666_v41  ;;  %v5704_v53 = vadd.s32 32, %v5666_v41  ;;  %v5710_v54 = vadd.s32 56, %v5666_v41 }
  0x1e   :  { %v5199_v14 = vld [vmem:[%s6857_s0] sm:$0xff]   ;;  %v5201_v16 = vld [vmem:[%s6857_s0 + $0x8] sm:$0xff]   ;;  %v92_v46 = vshra.s32 %v5669_v42, 4  ;;  %v93_v49 = vshra.s32 %v5674_v44, 4  ;;  %v91_v50 = vshra.s32 %v5677_v45, 4  ;;  %v5716_v58 = vadd.s32 40, %v5666_v41 }
  0x1f   :  { %v5200_v15 = vld [vmem:[%s6858_s3] sm:$0xff]   ;;  %4760 = vmatprep.subr.bf16.mxu0 %v5199_v14  ;;  %v5202_v17 = vld [vmem:[%s6858_s3 + $0x8] sm:$0xff]   ;;  %vm141_vm2 = vcmp.eq.s32.totalorder %v5681_v47, %v90_v48 }
  0x20   :  { %4772 = vmatprep.subr.bf16.mxu1 %v5200_v15  ;;  %4761 = vmatpush3.bf16.msra.mxu0 %v5199_v14  ;;  %v5203_v18 = vld [vmem:[%s6859_s28] sm:$0xff]   ;;  %v5204_v36 = vld [vmem:[%s6859_s28 + $0x8] sm:$0xff]   ;;  %vm143_vm1 = vcmp.eq.s32.totalorder %v5681_v47, %v92_v46  ;;  %vm144_vm3 = vcmp.eq.s32.totalorder %v5681_v47, %v93_v49  ;;  %vm142_vm4 = vcmp.eq.s32.totalorder %v5681_v47, %v91_v50  ;;  %v5723_v62 = vsel %vm141_vm2, 1.0, %v5475_v39 }
  0x21   :  { %4773 = vmatpush3.bf16.msra.mxu1 %v5200_v15  ;;  %4762 = vmatprep.subr.bf16.mxu0 %v5201_v16  ;;  %v4231_v27 = vld [vmem:[%s6860_s29] ss:$0 sm:$0xff]  ;;  %v5719_v59 = vsel %vm143_vm1, 1.0, %v5475_v39 }
  0x22   :  { %4774 = vmatprep.subr.bf16.mxu1 %v5202_v17  ;;  %v4232_v31 = vld [vmem:[%s6861_s25] ss:$0 sm:$0xff] }
  0x23   :  { %v5692_v51 = vld [vmem:[%s6862_s30] ss:$0 sm:$0xff] }
  0x24   :  { %4763 = vmatpush3.bf16.msra.mxu0 %v5201_v16  ;;  %v4233_v56 = vld [vmem:[%s6863_s1] ss:$0 sm:$0xff]  ;;  %v95_v16 = vshra.s32 %v5716_v58, 4 }
  0x25   :  { %4775 = vmatpush3.bf16.msra.mxu1 %v5202_v17  ;;  %4784 = vmatprep.subr.bf16.mxu0 %v5203_v18 }
  0x26   :  { %vm5761_vm8 = vcmp.eq.s32.totalorder %v5681_v47, %v95_v16 }
  0xa0   :  { %v196_v4 = vpop.xlane.xlu0 %195 }
  0xa1   :  { %v201_v5 = vmul.f32 0.03125, %v196_v4  ;;  %v5730_v4 = vsel %vm142_vm4, 1.0, %v5475_v39 }
  0xa3   :  { %v203_v6 = vsub.f32 %v189_v0, %v201_v5  ;;  %v5726_v0 = vsel %vm144_vm3, 1.0, %v5475_v39  ;;  %v96_v5 = vshra.s32 %v5701_v52, 4 }
  0xa4   :  { %v199_v7 = vpop.xlane.xlu0 %198 }
  0xa5   :  { %v202_v8 = vmul.f32 0.03125, %v199_v7  ;;  %v205_v9 = vmul.f32 %v203_v6, %v203_v6  ;;  %vm147_vm5 = vcmp.eq.s32.totalorder %v5681_v47, %v96_v5 }
  0xa7   :  { %v204_v10 = vsub.f32 %v190_v1, %v202_v8  ;;  %v207_v11 = vsel %vm6839_vm0, %v205_v9, 0.0 }
  0xa8   :  { %208 = vadd.xlane.f32.xlu1 %v207_v11 }
  0xa9   :  { %v206_v12 = vmul.f32 %v204_v10, %v204_v10 }
  0xab   :  { %v210_v13 = vsel %vm6839_vm0, %v206_v12, 0.0  ;;  %v97_v12 = vshra.s32 %v5710_v54, 4 }
  0xac   :  { %211 = vadd.xlane.f32.xlu1 %v210_v13 }
  0xad   :  { %vm148_vm7 = vcmp.eq.s32.totalorder %v5681_v47, %v97_v12 }
 0x135   :  { %v209_v19 = vpop.xlane.xlu1 %208 }
 0x136   :  { %v213_v20 = vmul.f32 0.03125, %v209_v19 }
 0x138   :  { %v215_v21 = vadd.f32 1e-12, %v213_v20 }
 0x139   :  { %v212_v22 = vpop.xlane.xlu1 %211 }
 0x13a   :  { %5263 = vrsqrt.f32 %v215_v21  ;;  %v214_v23 = vmul.f32 0.03125, %v212_v22 }
 0x13c   :  { %v216_v24 = vadd.f32 1e-12, %v214_v23 }
 0x13e   :  { %5265 = vrsqrt.f32 %v216_v24 }
 0x144   :  { %v5264_v25 = vpop.eup %5263 }
 0x145   :  { %v219_v26 = vmul.f32 %v5264_v25, %v203_v6  ;;  %v94_v6 = vshra.s32 %v5704_v53, 4 }
 0x147   :  { %v227_v29 = vmul.f32 %v4231_v27, %v219_v26  ;;  %vm145_vm6 = vcmp.eq.s32.totalorder %v5681_v47, %v94_v6 }
 0x148   :  { %v5266_v28 = vpop.eup %5265 }
 0x149   :  { %v220_v30 = vmul.f32 %v5266_v28, %v204_v10  ;;  %v5638_v33 = vadd.f32 %v4232_v31, %v227_v29  ;;  %v5766_v28 = vsel %vm147_vm5, 1.0, %v5475_v39 }
 0x14b   :  { %v228_v32 = vmul.f32 %v4231_v27, %v220_v30 }
 0x14d   :  { %v5640_v34 = vadd.f32 %v4232_v31, %v228_v32  ;;  %v5770_v32 = vsel %vm145_vm6, 1.0, %v5475_v39 }
 0x14f   :  { %v241_v35 = vpack.c.bf16 %v5640_v34, %v5638_v33 }
 0x151   :  { %4764 = vmatprep.mubr.msk.bf16.mxu0 %vm6839_vm0, %v241_v35  ;;  %4776 = vmatprep.mubr.msk.bf16.mxu1 %vm6839_vm0, %v241_v35 }
 0x152   :  { %4765 = vmatmul.mubr.msk.bf16.vlgmr.msra.gmra.mrb[0].mxu0 %vm6839_vm0, %v241_v35  ;;  %4777 = vmatmul.mubr.msk.bf16.vlgmr.msra.gmra.mrb[0].mxu1 %vm6839_vm0, %v241_v35 }
 0x153   :  { %4768 = vmatprep.mubr.msk.bf16.mxu0 %vm6839_vm0, %v241_v35  ;;  %4780 = vmatprep.mubr.msk.bf16.mxu1 %vm6839_vm0, %v241_v35 }
 0x154   :  { %4785 = vmatpush3.bf16.msra.mxu0 %v5203_v18 }
 0x155   :  { %4786 = vmatprep.subr.bf16.mxu0 %v5204_v36 }
 0x158   :  { %4787 = vmatpush3.bf16.msra.mxu0 %v5204_v36 }
 0x159   :  { %4812 = vmatprep.subr.bf16.mxu0 %v5205_v37 }
 0x15a   :  { %4769 = vmatmul.mubr.msk.bf16.gmra.mrb[4].mxu0 %vm6839_vm0, %v241_v35  ;;  %4781 = vmatmul.mubr.msk.bf16.gmra.mrb[4].mxu1 %vm6839_vm0, %v241_v35 }
 0x15b   :  { %4788 = vmatprep.mubr.msk.bf16.mxu0 %vm6839_vm0, %v241_v35 }
 0x162   :  { %4789 = vmatmul.mubr.msk.bf16.vlgmr.msra.gmra.mrb[8].mxu0 %vm6839_vm0, %v241_v35 }
 0x163   :  { %4792 = vmatprep.mubr.msk.bf16.mxu0 %vm6839_vm0, %v241_v35  ;;  %4813 = vmatpush3.bf16.msra.mxu0 %v5205_v37  ;;  %v5774_v37 = vsel %vm148_vm7, 1.0, %v5475_v39 }
 0x164   :  { %4814 = vmatprep.subr.bf16.mxu0 %v5206_v38 }
 0x167   :  { %4815 = vmatpush3.bf16.msra.mxu0 %v5206_v38 }
 0x168   :  { %4824 = vmatprep.subr.bf16.mxu0 %v5475_v39 }
 0x16a   :  { %4793 = vmatmul.mubr.msk.bf16.gmra.mrb[12].mxu0 %vm6839_vm0, %v241_v35 }
 0x225   :  { %v4766_v55 = vpop.f32.mrb[0].mxu0  ;;  %v4778_v57 = vpop.f32.mrb[0].mxu1 }
 0x226   :  { %v395_v60 = vadd.f32 %v4778_v57, %v5692_v51  ;;  %v298_v61 = vpop.f32.mrb[1].mxu0  ;;  %v386_v63 = vpop.f32.mrb[1].mxu1  ;;  %v5734_v7 = vadd.f32 %v4766_v55, %v4233_v56 }
 0x227   :  { %v387_v1 = vadd.f32 %v5692_v51, %v386_v63  ;;  %v4767_v2 = vpop.f32.mrb[2].mxu0  ;;  %v4779_v3 = vpop.f32.mrb[2].mxu1  ;;  %v299_v13 = vadd.f32 %v4233_v56, %v298_v61  ;;  %v5786_v63 = vsel %vm5761_vm8, 1.0, %v5475_v39 }
 0x228   :  { %v5736_v8 = vadd.f32 %v4767_v2, %v4233_v56  ;;  %v398_v9 = vadd.f32 %v4779_v3, %v5692_v51  ;;  %v301_v10 = vpop.f32.mrb[3].mxu0  ;;  %v389_v11 = vpop.f32.mrb[3].mxu1  ;;  %v419_v17 = vmul.f32 %v5719_v59, %v395_v60 }
 0x229   :  { %v302_v14 = vadd.f32 %v4233_v56, %v301_v10  ;;  %v390_v15 = vadd.f32 %v5692_v51, %v389_v11  ;;  %v417_v20 = vmul.f32 %v5723_v62, %v387_v1 }
 0x22a   :  { %v522_v18 = vpack.c.bf16 %v5736_v8, %v5734_v7  ;;  %v420_v19 = vmul.f32 %v5726_v0, %v398_v9  ;;  %v5833_v8 = vand.u32 1, %v5681_v47 }
 0x22b   :  { %v521_v21 = vpack.c.bf16 %v302_v14, %v299_v13  ;;  %v418_v22 = vmul.f32 %v5730_v4, %v390_v15 }
 0x22c   :  { %v526_v23 = vpack.c.bf16 %v420_v19, %v419_v17 }
 0x22d   :  { %v525_v24 = vpack.c.bf16 %v418_v22, %v417_v20  ;;  %v4770_v25 = vpop.f32.mrb[4].mxu0  ;;  %v4782_v26 = vpop.f32.mrb[4].mxu1  ;;  %4804 = vmatprep.mubr.msk.bf16.mxu1 %vm6839_vm0, %v521_v21 }
 0x22e   :  { %v411_v29 = vadd.f32 %v4782_v26, %v5692_v51  ;;  %v314_v30 = vpop.f32.mrb[5].mxu0  ;;  %v402_v31 = vpop.f32.mrb[5].mxu1  ;;  %v5778_v55 = vadd.f32 %v4770_v25, %v4233_v56  ;;  %v545_v26 = vsel %vm6839_vm0, %v526_v23, 0 }
 0x22f   :  { %v403_v35 = vadd.f32 %v5692_v51, %v402_v31  ;;  %v4771_v36 = vpop.f32.mrb[6].mxu0  ;;  %v4783_v38 = vpop.f32.mrb[6].mxu1  ;;  %5176 = vmatprep.subr.msk.bf16.mxu1 %vm6839_vm0, %v525_v24  ;;  %v542_v40 = vsel %vm6839_vm0, %v525_v24, 0  ;;  %v315_v2 = vadd.f32 %v4233_v56, %v314_v30 }
 0x230   :  { %v5780_v57 = vadd.f32 %v4771_v36, %v4233_v56  ;;  %v414_v60 = vadd.f32 %v4783_v38, %v5692_v51  ;;  %v317_v61 = vpop.f32.mrb[7].mxu0  ;;  %v405_v1 = vpop.f32.mrb[7].mxu1  ;;  %4797 = vmatpush3.bf16.xpose.msra.mxu1 %v542_v40  ;;  %v423_v10 = vmul.f32 %v5766_v28, %v411_v29 }
 0x231   :  { %v318_v3 = vadd.f32 %v4233_v56, %v317_v61  ;;  %v406_v9 = vadd.f32 %v5692_v51, %v405_v1  ;;  %5177 = vmatprep.subr.msk.bf16.mxu1 %vm6839_vm0, %v526_v23  ;;  %v421_v14 = vmul.f32 %v5770_v32, %v403_v35  ;;  %v4247_v56 = vld [vmem:[%s6814_s9] ss:$0 sm:$0xff] }
 0x232   :  { %v524_v11 = vpack.c.bf16 %v5780_v57, %v5778_v55  ;;  %v424_v13 = vmul.f32 %v5774_v37, %v414_v60 }
 0x233   :  { %v523_v15 = vpack.c.bf16 %v318_v3, %v315_v2  ;;  %v422_v17 = vmul.f32 %v5786_v63, %v406_v9 }
 0x234   :  { %v528_v19 = vpack.c.bf16 %v424_v13, %v423_v10 }
 0x235   :  { %v527_v51 = vpack.c.bf16 %v422_v17, %v421_v14  ;;  %v4790_v20 = vpop.f32.mrb[8].mxu0 }
 0x236   :  { %v491_v21 = vadd.f32 %v4790_v20, %v4247_v56  ;;  %v482_v22 = vpop.f32.mrb[9].mxu0 }
 0x237   :  { %v483_v24 = vadd.f32 %v4247_v56, %v482_v22  ;;  %v4791_v25 = vpop.f32.mrb[10].mxu0  ;;  %v548_v2 = vsel %vm6839_vm0, %v527_v51, 0 }
 0x238   :  { %v494_v27 = vadd.f32 %v4791_v25, %v4247_v56  ;;  %v485_v29 = vpop.f32.mrb[11].mxu0  ;;  %4799 = vmatpush3.bf16.xpose.msra.mxu1 %v545_v26  ;;  %v515_v31 = vmul.f32 %v5719_v59, %v491_v21  ;;  %v107_v25 = vshra.s32 %v5666_v41, 3  ;;  %v5830_v26 = vshra.s32 %v5671_v43, 4 }
 0x239   :  { %v486_v30 = vadd.f32 %v4247_v56, %v485_v29  ;;  %5178 = vmatprep.subr.msk.bf16.mxu1 %vm6839_vm0, %v527_v51  ;;  %v513_v36 = vmul.f32 %v5723_v62, %v483_v24  ;;  %v551_v51 = vsel %vm6839_vm0, %v528_v19, 0  ;;  %v170_v24 = vsub.s32 0, %v5666_v41 }
 0x23a   :  { %v516_v35 = vmul.f32 %v5726_v0, %v494_v27  ;;  %v108_v27 = vshra.s32 %v5677_v45, 3  ;;  %vm101_vm10 = vcmp.eq.s32.totalorder %v92_v46, %v5830_v26  ;;  %v115_v43 = vand.u32 1, %v107_v25 }
 0x23b   :  { %v514_v38 = vmul.f32 %v5730_v4, %v486_v30  ;;  %vm99_vm14 = vcmp.eq.s32.totalorder %v90_v48, %v5830_v26  ;;  %vm102_vm1 = vcmp.eq.s32.totalorder %v93_v49, %v5830_v26  ;;  %vm100_vm4 = vcmp.eq.s32.totalorder %v91_v50, %v5830_v26 }
 0x23c   :  { %v712_v40 = vpack.c.bf16 %v516_v35, %v515_v31  ;;  %vm125_vm15 = vcmp.eq.s32.totalorder %v115_v43, %v5833_v8  ;;  %v112_v48 = vshra.s32 %v5716_v58, 3 }
 0x23d   :  { %v711_v55 = vpack.c.bf16 %v514_v38, %v513_v36  ;;  %v4794_v57 = vpop.f32.mrb[12].mxu0  ;;  %vm5875_vm6 = vmand %vm99_vm14, %vm125_vm15 }
 0x23e   :  { %v507_v60 = vadd.f32 %v4794_v57, %v4247_v56  ;;  %v498_v61 = vpop.f32.mrb[13].mxu0 }
 0x23f   :  { %v499_v23 = vadd.f32 %v4247_v56, %v498_v61  ;;  %v4795_v1 = vpop.f32.mrb[14].mxu0  ;;  %4816 = vmatprep.mubr.msk.bf16.mxu0 %vm6839_vm0, %v711_v55  ;;  %v113_v55 = vshra.s32 %v5701_v52, 3 }
 0x240   :  { %v510_v3 = vadd.f32 %v4795_v1, %v4247_v56  ;;  %v501_v9 = vpop.f32.mrb[15].mxu0  ;;  %4801 = vmatpush3.bf16.xpose.msra.mxu1 %v548_v2  ;;  %4817 = vmatmul.mubr.msk.bf16.vlgmr.msra.gmra.mrb[16].mxu0 %vm6839_vm0, %v712_v40  ;;  %v519_v13 = vmul.f32 %v5766_v28, %v507_v60  ;;  %v116_v40 = vand.u32 1, %v108_v27 }
 0x241   :  { %v502_v10 = vadd.f32 %v4247_v56, %v501_v9  ;;  %5179 = vmatprep.subr.msk.bf16.mxu1 %vm6839_vm0, %v528_v19  ;;  %v517_v17 = vmul.f32 %v5770_v32, %v499_v23  ;;  %v165_v56 = vld [vmem:[%s6866_s7] sm:$0x1]  ;;  %v109_v19 = vshra.s32 %v5669_v42, 3  ;;  %v111_v42 = vshra.s32 %v5704_v53, 3 }
 0x242   :  { %v520_v14 = vmul.f32 %v5774_v37, %v510_v3  ;;  %vm166_vm9 = vcmp.gt.f32.partialorder %v165_v56, 0.5  ;;  %vm126_vm5 = vcmp.eq.s32.totalorder %v116_v40, %v5833_v8  ;;  %v114_v3 = vshra.s32 %v5710_v54, 3 }
 0x243   :  { %v518_v20 = vmul.f32 %v5786_v63, %v502_v10  ;;  %v117_v7 = vand.u32 1, %v109_v19  ;;  %v119_v2 = vand.u32 1, %v111_v42  ;;  %vm5884_vm8 = vmand %vm100_vm4, %vm126_vm5  ;;  %vm6841_vm4 = vcmask 523264  }
 0x244   :  { %v714_v21 = vpack.c.bf16 %v520_v14, %v519_v13  ;;  %v120_v13 = vand.u32 1, %v112_v48  ;;  %vm5932_vm5 = vcmp.eq.s32.totalorder %v95_v16, %v5830_v26 }
 0x245   :  { %v713_v22 = vpack.c.bf16 %v518_v20, %v517_v17  ;;  %vm127_vm11 = vcmp.eq.s32.totalorder %v117_v7, %v5833_v8  ;;  %v5477_v17 = vmov -10000.0  }
 0x246   :  { %vm5847_vm12 = vmand %vm101_vm10, %vm127_vm11  ;;  %vm105_vm10 = vcmp.eq.s32.totalorder %v96_v5, %v5830_v26  ;;  %v122_v5 = vand.u32 1, %v114_v3 }
 0x247   :  { %4820 = vmatprep.mubr.msk.bf16.mxu0 %vm6839_vm0, %v713_v22 }
 0x248   :  { %4803 = vmatpush3.bf16.xpose.msra.mxu1 %v551_v51  ;;  %4821 = vmatmul.mubr.msk.bf16.gmra.mrb[20].mxu0 %vm6839_vm0, %v714_v21 }
 0x249   :  { %4836 = vmatprep.subr.bf16.mxu1 %v5475_v39 }
 0x24f   :  { %4805 = vmatmul.mubr.msk.bf16.vlgmr.msra.gmra.mrb[8].mxu1 %vm6839_vm0, %v522_v18  ;;  %v5476_v18 = vmov 0  }
 0x250   :  { %4808 = vmatprep.mubr.msk.bf16.mxu1 %vm6839_vm0, %v523_v15  ;;  %v110_v15 = vshra.s32 %v5674_v44, 3  ;;  %v121_v44 = vand.u32 1, %v113_v55 }
 0x252   :  { %v118_v35 = vand.u32 1, %v110_v15  ;;  %vm131_vm11 = vcmp.eq.s32.totalorder %v121_v44, %v5833_v8 }
 0x254   :  { %vm128_vm2 = vcmp.eq.s32.totalorder %v118_v35, %v5833_v8 }
 0x255   :  { %vm5879_vm7 = vmand %vm102_vm1, %vm128_vm2  ;;  %vm103_vm1 = vcmp.eq.s32.totalorder %v94_v6, %v5830_v26  ;;  %vm129_vm2 = vcmp.eq.s32.totalorder %v119_v2, %v5833_v8 }
 0x257   :  { %4809 = vmatmul.mubr.msk.bf16.gmra.mrb[12].mxu1 %vm6839_vm0, %v524_v11  ;;  %v167_v11 = vsel %vm166_vm9, 1, %v5476_v18 }
 0x258   :  { %v5840_v30 = vrot.slane %v167_v11, %v170_v24 }
 0x25a   :  { %vm172_vm13 = vcmp.eq.s32.totalorder %v5840_v30, 1 }
 0x25b   :  { %vm5866_vm3 = vmand %vm5847_vm12, %vm172_vm13 }
 0x25c   :  { %vm173_vm9 = vmand %vm5875_vm6, %vm172_vm13  ;;  %v5904_v20 = vsel %vm5866_vm3, 0.0, %v5477_v17 }
 0x25d   :  { %vm176_vm14 = vmand %vm5879_vm7, %vm172_vm13  ;;  %v5919_v21 = vsel %vm173_vm9, 0.0, %v5477_v17  ;;  %vm130_vm9 = vcmp.eq.s32.totalorder %v120_v13, %v5833_v8 }
 0x25e   :  { %vm5910_vm15 = vmand %vm5884_vm8, %vm172_vm13  ;;  %v5926_v56 = vsel %vm176_vm14, 0.0, %v5477_v17  ;;  %vm106_vm14 = vcmp.eq.s32.totalorder %v97_v12, %v5830_v26  ;;  %v6889_v26 = vmov 0 }
 0x25f   :  { %vm5921_vm3 = vmand %vm105_vm10, %vm131_vm11  ;;  %v5945_v11 = vsel %vm5910_vm15, 0.0, %v5477_v17 }
 0x260   :  { %vm5938_vm10 = vmand %vm103_vm1, %vm129_vm2  ;;  %vm132_vm1 = vcmp.eq.s32.totalorder %v122_v5, %v5833_v8 }
 0x261   :  { %vm5951_vm11 = vmand %vm5921_vm3, %vm172_vm13 }
 0x262   :  { %vm5964_vm15 = vmand %vm5932_vm5, %vm130_vm9  ;;  %v5994_v35 = vsel %vm5951_vm11, 0.0, %v5477_v17  ;;  %vm6891_vm11 = vcmask 261120  }
 0x263   :  { %vm177_vm2 = vmand %vm5938_vm10, %vm172_vm13 }
 0x264   :  { %vm5975_vm0 = vmand %vm106_vm14, %vm132_vm1  ;;  %v5985_v43 = vsel %vm177_vm2, 0.0, %v5477_v17 }
 0x265   :  { %v6890_v26 = vsel %vm5975_vm0, 4294967295, %v6889_v26  ;;  %vm178_vm5 = vmand %vm5964_vm15, %vm172_vm13 }
 0x266   :  { %vm180_vm9 = vmand %vm5975_vm0, %vm172_vm13  ;;  %v5998_v40 = vsel %vm178_vm5, 0.0, %v5477_v17  ;;  %vm6842_vm13 = vmmov 0  }
 0x267   :  { %v6002_v30 = vsel %vm180_vm9, 0.0, %v5477_v17  ;;  %4832 = vmatprep.mubr.msk.bf16.mxu0 %vm6842_vm13, %v5475_v39  ;;  %4840 = vmatprep.mubr.msk.bf16.mxu1 %vm6842_vm13, %v5475_v39  ;;  %vm6892_vm14 = vmmov %vm6891_vm11 }
 0x268   :  { %vm6893_vm1 = vmmov %vm6891_vm11 }
 0x269   :  { %vm6894_vm2 = vmmov %vm6893_vm1 }
 0x26a   :  { %vm6895_vm5 = vmmov %vm6893_vm1 }
 0x26b   :  { %vm6896_vm9 = vmmov %vm6893_vm1 }
 0x26c   :  { %vm6908_vm0 = vmmov %vm6893_vm1 }
 0x313   :  { %v4818_v29 = vpop.f32.mrb[16].mxu0 }
 0x314   :  { %v773_v31 = vpop.f32.mrb[17].mxu0 }
 0x315   :  { %v4819_v47 = vpop.f32.mrb[18].mxu0 }
 0x316   :  { %v812_v36 = vpack.c.bf16 %v4819_v47, %v4818_v29  ;;  %v776_v38 = vpop.f32.mrb[19].mxu0 }
 0x317   :  { %v811_v57 = vpack.c.bf16 %v776_v38, %v773_v31 }
 0x319   :  { %4825 = vmatpush3.bf16.msra.mxu0 %v811_v57 }
 0x31a   :  { %4826 = vmatprep.subr.bf16.mxu0 %v5475_v39 }
 0x31b   :  { %v4822_v49 = vpop.f32.mrb[20].mxu0 }
 0x31c   :  { %v789_v23 = vpop.f32.mrb[21].mxu0 }
 0x31d   :  { %v4823_v45 = vpop.f32.mrb[22].mxu0  ;;  %4827 = vmatpush3.bf16.msra.mxu0 %v812_v36 }
 0x31e   :  { %v814_v9 = vpack.c.bf16 %v4823_v45, %v4822_v49  ;;  %v792_v10 = vpop.f32.mrb[23].mxu0  ;;  %4828 = vmatprep.subr.bf16.mxu0 %v5475_v39 }
 0x31f   :  { %v813_v14 = vpack.c.bf16 %v792_v10, %v789_v23 }
 0x321   :  { %4829 = vmatpush3.bf16.msra.mxu0 %v813_v14 }
 0x322   :  { %v4806_v51 = vpop.f32.mrb[8].mxu1  ;;  %4830 = vmatprep.subr.bf16.mxu0 %v5475_v39 }
 0x323   :  { %v596_v6 = vadd.f32 %v4806_v51, %v5904_v20  ;;  %v587_v19 = vpop.f32.mrb[9].mxu1 }
 0x324   :  { %v4807_v7 = vpop.f32.mrb[10].mxu1  ;;  %v588_v16 = vadd.f32 %v587_v19, %v5919_v21 }
 0x325   :  { %v599_v15 = vadd.f32 %v4807_v7, %v5926_v56  ;;  %v590_v27 = vpop.f32.mrb[11].mxu1  ;;  %4831 = vmatpush3.bf16.msra.mxu0 %v814_v9  ;;  %v625_v29 = vsel %vm6841_vm4, %v596_v6, -inf }
 0x326   :  { %626 = vmax.xlane.f32.xlu0 %v625_v29  ;;  %4844 = vmatprep.subr.bf16.mxu0 %v5475_v39  ;;  %v591_v54 = vadd.f32 %v590_v27, %v5945_v11  ;;  %v619_v8 = vsel %vm6841_vm4, %v588_v16, -inf }
 0x327   :  { %v628_v12 = vsel %vm6841_vm4, %v599_v15, -inf }
 0x328   :  { %629 = vmax.xlane.f32.xlu1 %v628_v12  ;;  %v622_v38 = vsel %vm6841_vm4, %v591_v54, -inf }
 0x32a   :  { %v4810_v47 = vpop.f32.mrb[12].mxu1  ;;  %620 = vmax.xlane.f32.xlu0 %v619_v8 }
 0x32b   :  { %v603_v36 = vpop.f32.mrb[13].mxu1  ;;  %v612_v46 = vadd.f32 %v4810_v47, %v5994_v35 }
 0x32c   :  { %v604_v55 = vadd.f32 %v603_v36, %v5985_v43  ;;  %v4811_v57 = vpop.f32.mrb[14].mxu1  ;;  %623 = vmax.xlane.f32.xlu1 %v622_v38 }
 0x32d   :  { %v606_v42 = vpop.f32.mrb[15].mxu1  ;;  %v615_v49 = vadd.f32 %v4811_v57, %v6002_v30  ;;  %v637_v2 = vsel %vm6841_vm4, %v612_v46, -inf }
 0x32e   :  { %v607_v44 = vadd.f32 %v606_v42, %v5998_v40  ;;  %v631_v48 = vsel %vm6841_vm4, %v604_v55, -inf }
 0x32f   :  { %632 = vmax.xlane.f32.xlu0 %v631_v48  ;;  %v640_v3 = vsel %vm6841_vm4, %v615_v49, -inf }
 0x330   :  { %v634_v23 = vsel %vm6841_vm4, %v607_v44, -inf }
 0x331   :  { %635 = vmax.xlane.f32.xlu1 %v634_v23 }
 0x333   :  { %638 = vmax.xlane.f32.xlu0 %v637_v2 }
 0x335   :  { %641 = vmax.xlane.f32.xlu1 %v640_v3 }
 0x3b3   :  { %v627_v45 = vpop.xlane.xlu0 %626 }
 0x3b4   :  { %v645_v9 = vsub.f32 %v596_v6, %v627_v45 }
 0x3b5   :  { %v630_v10 = vpop.xlane.xlu1 %629 }
 0x3b6   :  { %v655_v13 = vmul.f32 1.442695, %v645_v9  ;;  %v646_v14 = vsub.f32 %v599_v15, %v630_v10 }
 0x3b7   :  { %v621_v52 = vpop.xlane.xlu0 %620 }
 0x3b8   :  { %5267 = vpow2.f32 %v655_v13  ;;  %v657_v5 = vmul.f32 1.442695, %v646_v14  ;;  %v643_v51 = vsub.f32 %v588_v16, %v621_v52 }
 0x3b9   :  { %v624_v53 = vpop.xlane.xlu1 %623 }
 0x3ba   :  { %5269 = vpow2.f32 %v657_v5  ;;  %v651_v19 = vmul.f32 1.442695, %v643_v51  ;;  %v644_v7 = vsub.f32 %v591_v54, %v624_v53 }
 0x3bc   :  { %5271 = vpow2.f32 %v651_v19  ;;  %v653_v58 = vmul.f32 1.442695, %v644_v7  ;;  %v633_v27 = vpop.xlane.xlu0 %632 }
 0x3bd   :  { %v647_v29 = vsub.f32 %v604_v55, %v633_v27 }
 0x3be   :  { %5273 = vpow2.f32 %v653_v58  ;;  %v636_v12 = vpop.xlane.xlu1 %635 }
 0x3bf   :  { %v659_v8 = vmul.f32 1.442695, %v647_v29  ;;  %v648_v47 = vsub.f32 %v607_v44, %v636_v12 }
 0x3c0   :  { %v639_v6 = vpop.xlane.xlu0 %638 }
 0x3c1   :  { %5275 = vpow2.f32 %v659_v8  ;;  %v661_v36 = vmul.f32 1.442695, %v648_v47  ;;  %v649_v15 = vsub.f32 %v612_v46, %v639_v6 }
 0x3c2   :  { %v5268_v38 = vpop.eup %5267  ;;  %v642_v57 = vpop.xlane.xlu1 %641 }
 0x3c3   :  { %5277 = vpow2.f32 %v661_v36  ;;  %v663_v16 = vmul.f32 1.442695, %v649_v15  ;;  %v650_v42 = vsub.f32 %v615_v49, %v642_v57  ;;  %v673_v48 = vsel %vm6841_vm4, %v5268_v38, 0.0 }
 0x3c4   :  { %v5270_v54 = vpop.eup %5269  ;;  %674 = vadd.xlane.f32.xlu0 %v673_v48 }
 0x3c5   :  { %5279 = vpow2.f32 %v663_v16  ;;  %v665_v23 = vmul.f32 1.442695, %v650_v42  ;;  %v676_v55 = vsel %vm6841_vm4, %v5270_v54, 0.0 }
 0x3c6   :  { %v5272_v2 = vpop.eup %5271  ;;  %677 = vadd.xlane.f32.xlu1 %v676_v55 }
 0x3c7   :  { %5281 = vpow2.f32 %v665_v23  ;;  %v667_v44 = vsel %vm6841_vm4, %v5272_v2, 0.0 }
 0x3c8   :  { %v5274_v3 = vpop.eup %5273  ;;  %668 = vadd.xlane.f32.xlu0 %v667_v44 }
 0x3c9   :  { %v670_v46 = vsel %vm6841_vm4, %v5274_v3, 0.0 }
 0x3ca   :  { %671 = vadd.xlane.f32.xlu1 %v670_v46 }
 0x3cb   :  { %v5276_v45 = vpop.eup %5275 }
 0x3cc   :  { %v679_v49 = vsel %vm6841_vm4, %v5276_v45, 0.0 }
 0x3cd   :  { %v5278_v9 = vpop.eup %5277  ;;  %680 = vadd.xlane.f32.xlu0 %v679_v49 }
 0x3ce   :  { %v682_v10 = vsel %vm6841_vm4, %v5278_v9, 0.0 }
 0x3cf   :  { %v5280_v13 = vpop.eup %5279  ;;  %683 = vadd.xlane.f32.xlu1 %v682_v10 }
 0x3d0   :  { %v685_v14 = vsel %vm6841_vm4, %v5280_v13, 0.0 }
 0x3d1   :  { %v5282_v52 = vpop.eup %5281  ;;  %686 = vadd.xlane.f32.xlu0 %v685_v14 }
 0x3d2   :  { %v688_v5 = vsel %vm6841_vm4, %v5282_v52, 0.0 }
 0x3d3   :  { %689 = vadd.xlane.f32.xlu1 %v688_v5 }
 0x451   :  { %v675_v51 = vpop.xlane.xlu0 %674 }
 0x452   :  { %5283 = vrcp.f32 %v675_v51 }
 0x453   :  { %v678_v53 = vpop.xlane.xlu1 %677 }
 0x455   :  { %v669_v19 = vpop.xlane.xlu0 %668 }
 0x456   :  { %5285 = vrcp.f32 %v669_v19 }
 0x457   :  { %v672_v7 = vpop.xlane.xlu1 %671 }
 0x458   :  { %5287 = vrcp.f32 %v672_v7 }
 0x459   :  { %5289 = vrcp.f32 %v678_v53 }
 0x45a   :  { %v681_v58 = vpop.xlane.xlu0 %680 }
 0x45b   :  { %5291 = vrcp.f32 %v681_v58 }
 0x45c   :  { %v684_v27 = vpop.xlane.xlu1 %683  ;;  %v5284_v8 = vpop.eup %5283 }
 0x45d   :  { %5293 = vrcp.f32 %v684_v27  ;;  %v701_v48 = vmul.f32 %v5284_v8, %v5268_v38  ;;  %v4264_v38 = vld [vmem:[%s6816_s11] ss:$0 sm:$0xff] }
 0x45e   :  { %v687_v29 = vpop.xlane.xlu0 %686 }
 0x45f   :  { %5295 = vrcp.f32 %v687_v29 }
 0x460   :  { %v690_v12 = vpop.xlane.xlu1 %689  ;;  %v5286_v47 = vpop.eup %5285 }
 0x461   :  { %5297 = vrcp.f32 %v690_v12  ;;  %v699_v57 = vmul.f32 %v5286_v47, %v5272_v2 }
 0x462   :  { %v5288_v6 = vpop.eup %5287 }
 0x463   :  { %v5290_v36 = vpop.eup %5289  ;;  %v700_v16 = vmul.f32 %v5288_v6, %v5274_v3  ;;  %v804_v49 = vadd.f32 %v701_v48, %v699_v57 }
 0x464   :  { %v702_v23 = vmul.f32 %v5290_v36, %v5270_v54 }
 0x465   :  { %v5292_v15 = vpop.eup %5291 }
 0x466   :  { %v703_v55 = vmul.f32 %v5292_v15, %v5276_v45  ;;  %v805_v10 = vadd.f32 %v702_v23, %v700_v16 }
 0x467   :  { %v5294_v42 = vpop.eup %5293 }
 0x468   :  { %v704_v44 = vmul.f32 %v5294_v42, %v5278_v9  ;;  %v806_v51 = vadd.f32 %v804_v49, %v703_v55  ;;  %v5208_v55 = vld [vmem:[%s6819_s14 + $0x8] sm:$0xff]  }
 0x469   :  { %v5296_v46 = vpop.eup %5295 }
 0x46a   :  { %v705_v14 = vmul.f32 %v5296_v46, %v5280_v13  ;;  %v807_v53 = vadd.f32 %v805_v10, %v704_v44 }
 0x46b   :  { %v5298_v5 = vpop.eup %5297 }
 0x46c   :  { %v706_v19 = vmul.f32 %v5298_v5, %v5282_v52  ;;  %v808_v7 = vadd.f32 %v806_v51, %v705_v14 }
 0x46e   :  { %v809_v58 = vadd.f32 %v807_v53, %v706_v19  ;;  %v4266_v53 = vld [vmem:[%s6817_s12] ss:$0 sm:$0xff] }
 0x470   :  { %v810_v27 = vpack.c.bf16 %v809_v58, %v808_v7 }
 0x472   :  { %4833 = vmatmul.mubr.msk.bf16.vlgmr.msra.gmra.mrb[24].mxu0 %vm6841_vm4, %v810_v27 }
 0x473   :  { %4852 = vmatprep.mubr.msk.bf16.mxu0 %vm6842_vm13, %v5475_v39  ;;  %vm6907_vm13 = vmmov %vm6893_vm1 }
 0x545   :  { %v859_v54 = vpop.f32.mrb[24].mxu0 }
 0x546   :  { %v860_v2 = vadd.f32 %v4264_v38, %v859_v54  ;;  %v4834_v3 = vpop.f32.mrb[25].mxu0 }
 0x547   :  { %v862_v45 = vpop.f32.mrb[26].mxu0 }
 0x548   :  { %v863_v9 = vadd.f32 %v4264_v38, %v862_v45  ;;  %v4835_v13 = vpop.f32.mrb[27].mxu0  ;;  %v866_v52 = vadd.f32 %v860_v2, %v5638_v33  ;;  %v4267_v38 = vld [vmem:[%s6818_s13] ss:$0 sm:$0xff] }
 0x549   :  { %v5210_v13 = vld [vmem:[%s6821_s16 + $0x8] sm:$0xff]  }
 0x54a   :  { %v870_v29 = vsel %vm6891_vm11, %v866_v52, 0.0  ;;  %v867_v12 = vadd.f32 %v863_v9, %v5640_v34  ;;  %v5207_v34 = vld [vmem:[%s6819_s14] sm:$0xff]   ;;  %vm6897_vm11 = vmmov %vm6893_vm1 }
 0x54b   :  { %871 = vadd.xlane.f32.xlu0 %v870_v29  ;;  %4837 = vmatpush3.bf16.msra.mxu1 %v5207_v34  ;;  %v5209_v9 = vld [vmem:[%s6821_s16] sm:$0xff]   ;;  %v5212_v29 = vld [vmem:[%s6821_s16 + $0x18] sm:$0xff]  }
 0x54c   :  { %v873_v8 = vsel %vm6892_vm14, %v867_v12, 0.0  ;;  %4838 = vmatprep.subr.bf16.mxu1 %v5475_v39  ;;  %4845 = vmatpush3.bf16.msra.mxu0 %v5209_v9  ;;  %vm6898_vm14 = vmmov %vm6893_vm1 }
 0x54d   :  { %874 = vadd.xlane.f32.xlu1 %v873_v8  ;;  %4846 = vmatprep.subr.bf16.mxu0 %v5475_v39 }
 0x54f   :  { %4839 = vmatpush3.bf16.msra.mxu1 %v5208_v55 }
 0x550   :  { %4847 = vmatpush3.bf16.msra.mxu0 %v5210_v13 }
 0x551   :  { %4848 = vmatprep.subr.bf16.mxu0 %v5475_v39 }
 0x5d8   :  { %v872_v47 = vpop.xlane.xlu0 %871 }
 0x5d9   :  { %v876_v6 = vmul.f32 0.03125, %v872_v47 }
 0x5da   :  { %v875_v36 = vpop.xlane.xlu1 %874 }
 0x5db   :  { %v878_v15 = vsub.f32 %v866_v52, %v876_v6  ;;  %v877_v57 = vmul.f32 0.03125, %v875_v36  ;;  %v5211_v52 = vld [vmem:[%s6821_s16 + $0x10] sm:$0xff]  }
 0x5dc   :  { %4849 = vmatpush3.bf16.msra.mxu0 %v5211_v52 }
 0x5dd   :  { %v879_v16 = vsub.f32 %v867_v12, %v877_v57  ;;  %v880_v42 = vmul.f32 %v878_v15, %v878_v15  ;;  %4850 = vmatprep.subr.bf16.mxu0 %v5475_v39  ;;  %v4268_v12 = vld [vmem:[%s6820_s15] ss:$0 sm:$0xff] }
 0x5df   :  { %v882_v48 = vsel %vm6893_vm1, %v880_v42, 0.0  ;;  %v881_v23 = vmul.f32 %v879_v16, %v879_v16 }
 0x5e0   :  { %883 = vadd.xlane.f32.xlu0 %v882_v48  ;;  %4851 = vmatpush3.bf16.msra.mxu0 %v5212_v29 }
 0x5e1   :  { %v885_v33 = vsel %vm6894_vm2, %v881_v23, 0.0  ;;  %vm6899_vm2 = vmmov %vm6893_vm1 }
 0x5e2   :  { %886 = vadd.xlane.f32.xlu1 %v885_v33 }
 0x66d   :  { %v884_v44 = vpop.xlane.xlu0 %883 }
 0x66e   :  { %v888_v46 = vmul.f32 0.03125, %v884_v44 }
 0x66f   :  { %v887_v49 = vpop.xlane.xlu1 %886 }
 0x670   :  { %v890_v10 = vadd.f32 1e-12, %v888_v46  ;;  %v889_v14 = vmul.f32 0.03125, %v887_v49 }
 0x672   :  { %5299 = vrsqrt.f32 %v890_v10  ;;  %v891_v5 = vadd.f32 1e-12, %v889_v14 }
 0x674   :  { %5301 = vrsqrt.f32 %v891_v5 }
 0x67c   :  { %v5300_v51 = vpop.eup %5299 }
 0x67d   :  { %v894_v19 = vmul.f32 %v5300_v51, %v878_v15 }
 0x67e   :  { %v5302_v7 = vpop.eup %5301 }
 0x67f   :  { %v902_v58 = vmul.f32 %v4266_v53, %v894_v19  ;;  %v895_v27 = vmul.f32 %v5302_v7, %v879_v16 }
 0x681   :  { %v903_v54 = vmul.f32 %v4266_v53, %v895_v27  ;;  %v910_v2 = vadd.f32 %v4267_v38, %v902_v58 }
 0x683   :  { %v911_v3 = vadd.f32 %v4267_v38, %v903_v54  ;;  %v4272_v38 = vld [vmem:[%s6822_s17] ss:$0 sm:$0xff] }
 0x685   :  { %v916_v45 = vpack.c.bf16 %v911_v3, %v910_v2 }
 0x687   :  { %4841 = vmatmul.mubr.msk.bf16.vlgmr.msra.gmra.mrb[16].mxu1 %vm6895_vm5, %v916_v45  ;;  %vm6900_vm5 = vmmov %vm6893_vm1 }
 0x75a   :  { %v973_v8 = vpop.f32.mrb[16].mxu1 }
 0x75b   :  { %v974_v47 = vadd.f32 %v4268_v12, %v973_v8  ;;  %v4842_v6 = vpop.f32.mrb[17].mxu1 }
 0x75c   :  { %v976_v36 = vpop.f32.mrb[18].mxu1 }
 0x75d   :  { %v982_v15 = vmul.f32 0.044715, %v974_v47  ;;  %v977_v57 = vadd.f32 %v4268_v12, %v976_v36  ;;  %v4843_v16 = vpop.f32.mrb[19].mxu1  ;;  %v980_v51 = vmul.f32 0.5, %v974_v47 }
 0x75f   :  { %v984_v42 = vmul.f32 %v982_v15, %v974_v47  ;;  %v983_v48 = vmul.f32 0.044715, %v977_v57  ;;  %v981_v53 = vmul.f32 0.5, %v977_v57 }
 0x761   :  { %v986_v23 = vmul.f32 %v984_v42, %v974_v47  ;;  %v985_v33 = vmul.f32 %v983_v48, %v977_v57 }
 0x763   :  { %v988_v34 = vadd.f32 %v986_v23, %v974_v47  ;;  %v987_v55 = vmul.f32 %v985_v33, %v977_v57 }
 0x765   :  { %v990_v44 = vmul.f32 0.7978846, %v988_v34  ;;  %v989_v46 = vadd.f32 %v987_v55, %v977_v57  ;;  %v5214_v55 = vld [vmem:[%s6857_s0 + $0x10] sm:$0xff]  }
 0x766   :  { %4856 = vmatprep.subr.bf16.mxu1 %v5214_v55 }
 0x767   :  { %5303 = vtanh.f32 %v990_v44  ;;  %v991_v49 = vmul.f32 0.7978846, %v989_v46  ;;  %4857 = vmatpush3.bf16.msra.mxu1 %v5214_v55  ;;  %v5215_v44 = vld [vmem:[%s6858_s3 + $0x18] sm:$0xff]  }
 0x768   :  { %v5216_v46 = vld [vmem:[%s6857_s0 + $0x18] sm:$0xff]  }
 0x769   :  { %5305 = vtanh.f32 %v991_v49  ;;  %4858 = vmatprep.subr.bf16.mxu1 %v5216_v46  ;;  %v5217_v49 = vld [vmem:[%s6859_s28 + $0x10] sm:$0xff]  }
 0x76b   :  { %4859 = vmatpush3.bf16.msra.mxu1 %v5216_v46 }
 0x76c   :  { %4880 = vmatprep.subr.bf16.mxu1 %v5217_v49 }
 0x771   :  { %v5304_v10 = vpop.eup %5303 }
 0x772   :  { %v994_v14 = vadd.f32 1.0, %v5304_v10 }
 0x773   :  { %v5306_v5 = vpop.eup %5305 }
 0x774   :  { %v995_v19 = vadd.f32 1.0, %v5306_v5  ;;  %v996_v7 = vmul.f32 %v994_v14, %v980_v51 }
 0x776   :  { %v997_v58 = vmul.f32 %v995_v19, %v981_v53 }
 0x778   :  { %v1006_v27 = vpack.c.bf16 %v997_v58, %v996_v7  ;;  %v4278_v58 = vld [vmem:[%s6823_s18] ss:$0 sm:$0xff] }
 0x77a   :  { %4853 = vmatmul.mubr.msk.bf16.vlgmr.msra.gmra.mrb[28].mxu0 %vm6841_vm4, %v1006_v27  ;;  %vm6904_vm4 = vmmov %vm6893_vm1 }
 0x84d   :  { %v1075_v54 = vpop.f32.mrb[28].mxu0 }
 0x84e   :  { %v1076_v45 = vadd.f32 %v4272_v38, %v1075_v54  ;;  %v4854_v9 = vpop.f32.mrb[29].mxu0 }
 0x84f   :  { %v1078_v13 = vpop.f32.mrb[30].mxu0  ;;  %v4279_v9 = vld [vmem:[%s6824_s19] ss:$0 sm:$0xff] }
 0x850   :  { %v1079_v52 = vadd.f32 %v4272_v38, %v1078_v13  ;;  %v4855_v29 = vpop.f32.mrb[31].mxu0  ;;  %v1082_v12 = vadd.f32 %v1076_v45, %v910_v2 }
 0x852   :  { %v1086_v8 = vsel %vm6896_vm9, %v1082_v12, 0.0  ;;  %v1083_v47 = vadd.f32 %v1079_v52, %v911_v3  ;;  %v5213_v3 = vld [vmem:[%s6858_s3 + $0x10] sm:$0xff]   ;;  %vm6901_vm9 = vmmov %vm6893_vm1 }
 0x853   :  { %1087 = vadd.xlane.f32.xlu0 %v1086_v8  ;;  %4868 = vmatprep.subr.bf16.mxu0 %v5213_v3  ;;  %v5218_v8 = vld [vmem:[%s6859_s28 + $0x18] sm:$0xff]  }
 0x854   :  { %v1089_v6 = vsel %vm6897_vm11, %v1083_v47, 0.0  ;;  %4869 = vmatpush3.bf16.msra.mxu0 %v5213_v3  ;;  %vm6902_vm11 = vmmov %vm6893_vm1 }
 0x855   :  { %1090 = vadd.xlane.f32.xlu1 %v1089_v6  ;;  %4870 = vmatprep.subr.bf16.mxu0 %v5215_v44  ;;  %v5220_v6 = vld [vmem:[%s6815_s10 + $0x18] sm:$0xff]  }
 0x858   :  { %4871 = vmatpush3.bf16.msra.mxu0 %v5215_v44 }
 0x8e0   :  { %v1088_v36 = vpop.xlane.xlu0 %1087 }
 0x8e1   :  { %v1092_v15 = vmul.f32 0.03125, %v1088_v36  ;;  %v4297_v36 = vld [vmem:[%s6862_s30 + $0x1] ss:$0 sm:$0xff] }
 0x8e2   :  { %v1091_v57 = vpop.xlane.xlu1 %1090 }
 0x8e3   :  { %v1094_v16 = vsub.f32 %v1082_v12, %v1092_v15  ;;  %v1093_v42 = vmul.f32 0.03125, %v1091_v57  ;;  %v4285_v57 = vld [vmem:[%s6863_s1 + $0x1] ss:$0 sm:$0xff] }
 0x8e5   :  { %v1095_v48 = vsub.f32 %v1083_v47, %v1093_v42  ;;  %v1096_v23 = vmul.f32 %v1094_v16, %v1094_v16  ;;  %v5219_v47 = vld [vmem:[%s6815_s10 + $0x10] sm:$0xff]  }
 0x8e7   :  { %v1098_v33 = vsel %vm6898_vm14, %v1096_v23, 0.0  ;;  %v1097_v34 = vmul.f32 %v1095_v48, %v1095_v48  ;;  %vm6903_vm14 = vmmov %vm6893_vm1 }
 0x8e8   :  { %1099 = vadd.xlane.f32.xlu0 %v1098_v33 }
 0x8e9   :  { %v1101_v2 = vsel %vm6893_vm1, %v1097_v34, 0.0 }
 0x8ea   :  { %1102 = vadd.xlane.f32.xlu1 %v1101_v2 }
 0x975   :  { %v1100_v10 = vpop.xlane.xlu0 %1099 }
 0x976   :  { %v1104_v14 = vmul.f32 0.03125, %v1100_v10 }
 0x977   :  { %v1103_v5 = vpop.xlane.xlu1 %1102 }
 0x978   :  { %v1106_v51 = vadd.f32 1e-12, %v1104_v14  ;;  %v1105_v53 = vmul.f32 0.03125, %v1103_v5 }
 0x97a   :  { %5307 = vrsqrt.f32 %v1106_v51  ;;  %v1107_v19 = vadd.f32 1e-12, %v1105_v53 }
 0x97c   :  { %5309 = vrsqrt.f32 %v1107_v19 }
 0x984   :  { %v5308_v7 = vpop.eup %5307 }
 0x985   :  { %v1110_v27 = vmul.f32 %v5308_v7, %v1094_v16 }
 0x986   :  { %v5310_v38 = vpop.eup %5309 }
 0x987   :  { %v1118_v54 = vmul.f32 %v4278_v58, %v1110_v27  ;;  %v1111_v45 = vmul.f32 %v5310_v38, %v1095_v48 }
 0x989   :  { %v1119_v13 = vmul.f32 %v4278_v58, %v1111_v45  ;;  %v6096_v52 = vadd.f32 %v4279_v9, %v1118_v54 }
 0x98b   :  { %v6098_v29 = vadd.f32 %v4279_v9, %v1119_v13 }
 0x98d   :  { %v1133_v12 = vpack.c.bf16 %v6098_v29, %v6096_v52 }
 0x98f   :  { %4860 = vmatprep.mubr.msk.bf16.mxu1 %vm6899_vm2, %v1133_v12  ;;  %4872 = vmatprep.mubr.msk.bf16.mxu0 %vm6900_vm5, %v1133_v12  ;;  %vm6905_vm2 = vmmov %vm6893_vm1 }
 0x990   :  { %4861 = vmatmul.mubr.msk.bf16.vlgmr.msra.gmra.mrb[20].mxu1 %vm6901_vm9, %v1133_v12  ;;  %4873 = vmatmul.mubr.msk.bf16.vlgmr.msra.gmra.mrb[32].mxu0 %vm6902_vm11, %v1133_v12  ;;  %vm6906_vm5 = vmmov %vm6893_vm1 }
 0x991   :  { %4864 = vmatprep.mubr.msk.bf16.mxu1 %vm6903_vm14, %v1133_v12  ;;  %4876 = vmatprep.mubr.msk.bf16.mxu0 %vm6893_vm1, %v1133_v12  ;;  %vm6909_vm9 = vmmov %vm6908_vm0 }
 0x992   :  { %4881 = vmatpush3.bf16.msra.mxu1 %v5217_v49  ;;  %vm6912_vm11 = vmmov %vm6908_vm0 }
 0x993   :  { %4882 = vmatprep.subr.bf16.mxu1 %v5218_v8  ;;  %vm6913_vm14 = vmmov %vm6908_vm0 }
 0x994   :  { %vm6914_vm1 = vmmov %vm6908_vm0 }
 0x996   :  { %4883 = vmatpush3.bf16.msra.mxu1 %v5218_v8 }
 0x997   :  { %4908 = vmatprep.subr.bf16.mxu1 %v5219_v47 }
 0x998   :  { %4865 = vmatmul.mubr.msk.bf16.gmra.mrb[24].mxu1 %vm6904_vm4, %v1133_v12  ;;  %4877 = vmatmul.mubr.msk.bf16.gmra.mrb[36].mxu0 %vm6905_vm2, %v1133_v12  ;;  %vm6910_vm4 = vmmov %vm6908_vm0 }
 0x999   :  { %4884 = vmatprep.mubr.msk.bf16.mxu1 %vm6906_vm5, %v1133_v12  ;;  %vm6915_vm2 = vmmov %vm6908_vm0 }
 0x99a   :  { %vm6916_vm5 = vmmov %vm6908_vm0 }
 0x9a0   :  { %4885 = vmatmul.mubr.msk.bf16.vlgmr.msra.gmra.mrb[28].mxu1 %vm6907_vm13, %v1133_v12  ;;  %vm6911_vm13 = vmmov %vm6908_vm0 }
 0x9a1   :  { %4888 = vmatprep.mubr.msk.bf16.mxu1 %vm6908_vm0, %v1133_v12  ;;  %4909 = vmatpush3.bf16.msra.mxu1 %v5219_v47 }
 0x9a2   :  { %4910 = vmatprep.subr.bf16.mxu1 %v5220_v6 }
 0x9a5   :  { %4911 = vmatpush3.bf16.msra.mxu1 %v5220_v6 }
 0x9a6   :  { %4920 = vmatprep.subr.bf16.mxu1 %v5475_v39 }
 0x9a8   :  { %4889 = vmatmul.mubr.msk.bf16.gmra.mrb[32].mxu1 %vm6909_vm9, %v1133_v12  ;;  %vm6917_vm9 = vmmov %vm6908_vm0 }
 0xa63   :  { %v4862_v15 = vpop.f32.mrb[20].mxu1  ;;  %v4874_v16 = vpop.f32.mrb[32].mxu0 }
 0xa64   :  { %v1290_v42 = vadd.f32 %v4874_v16, %v4297_v36  ;;  %v1191_v48 = vpop.f32.mrb[21].mxu1  ;;  %v1281_v23 = vpop.f32.mrb[33].mxu0  ;;  %v6130_v3 = vadd.f32 %v4862_v15, %v4285_v57 }
 0xa65   :  { %v1282_v33 = vadd.f32 %v4297_v36, %v1281_v23  ;;  %v4863_v34 = vpop.f32.mrb[22].mxu1  ;;  %v4875_v2 = vpop.f32.mrb[34].mxu0  ;;  %v1192_v10 = vadd.f32 %v4285_v57, %v1191_v48 }
 0xa66   :  { %v6132_v55 = vadd.f32 %v4863_v34, %v4285_v57  ;;  %v1293_v44 = vadd.f32 %v4875_v2, %v4297_v36  ;;  %v1194_v46 = vpop.f32.mrb[23].mxu1  ;;  %v1284_v49 = vpop.f32.mrb[35].mxu0  ;;  %v1314_v51 = vmul.f32 %v5719_v59, %v1290_v42 }
 0xa67   :  { %v1195_v14 = vadd.f32 %v4285_v57, %v1194_v46  ;;  %v1285_v5 = vadd.f32 %v4297_v36, %v1284_v49  ;;  %v1312_v7 = vmul.f32 %v5723_v62, %v1282_v33 }
 0xa68   :  { %v1419_v53 = vpack.c.bf16 %v6132_v55, %v6130_v3  ;;  %v1315_v19 = vmul.f32 %v5726_v0, %v1293_v44 }
 0xa69   :  { %v1418_v58 = vpack.c.bf16 %v1195_v14, %v1192_v10  ;;  %v1313_v27 = vmul.f32 %v5730_v4, %v1285_v5 }
 0xa6a   :  { %v1423_v38 = vpack.c.bf16 %v1315_v19, %v1314_v51 }
 0xa6b   :  { %v1422_v54 = vpack.c.bf16 %v1313_v27, %v1312_v7  ;;  %v4866_v45 = vpop.f32.mrb[24].mxu1  ;;  %v4878_v9 = vpop.f32.mrb[36].mxu0  ;;  %4900 = vmatprep.mubr.msk.bf16.mxu0 %vm6908_vm0, %v1418_v58  ;;  %v4309_v7 = vld [vmem:[%s6814_s9 + $0x1] ss:$0 sm:$0xff] }
 0xa6c   :  { %v1306_v13 = vadd.f32 %v4878_v9, %v4297_v36  ;;  %v1207_v12 = vpop.f32.mrb[25].mxu1  ;;  %v1297_v8 = vpop.f32.mrb[37].mxu0  ;;  %v6143_v42 = vadd.f32 %v4866_v45, %v4285_v57 }
 0xa6d   :  { %v1298_v47 = vadd.f32 %v4297_v36, %v1297_v8  ;;  %v4867_v6 = vpop.f32.mrb[26].mxu1  ;;  %v4879_v15 = vpop.f32.mrb[38].mxu0  ;;  %5180 = vmatprep.subr.msk.bf16.mxu0 %vm6910_vm4, %v1422_v54  ;;  %v1439_v16 = vsel %vm6911_vm13, %v1422_v54, 0  ;;  %v1208_v2 = vadd.f32 %v4285_v57, %v1207_v12  ;;  %vm6918_vm4 = vmmov %vm6908_vm0 }
 0xa6e   :  { %v6145_v48 = vadd.f32 %v4867_v6, %v4285_v57  ;;  %v1309_v23 = vadd.f32 %v4879_v15, %v4297_v36  ;;  %v1210_v33 = vpop.f32.mrb[27].mxu1  ;;  %v1300_v34 = vpop.f32.mrb[39].mxu0  ;;  %4893 = vmatpush3.bf16.xpose.msra.mxu0 %v1439_v16  ;;  %v1318_v49 = vmul.f32 %v5766_v28, %v1306_v13  ;;  %v1442_v13 = vsel %vm6913_vm14, %v1423_v38, 0  ;;  %vm6919_vm13 = vmmov %vm6908_vm0 }
 0xa6f   :  { %v1211_v44 = vadd.f32 %v4285_v57, %v1210_v33  ;;  %v1301_v46 = vadd.f32 %v4297_v36, %v1300_v34  ;;  %5181 = vmatprep.subr.msk.bf16.mxu0 %vm6912_vm11, %v1423_v38  ;;  %v1316_v5 = vmul.f32 %v5770_v32, %v1298_v47  ;;  %vm6920_vm11 = vmmov %vm6908_vm0  ;;  %vm6921_vm14 = vmmov 0  }
 0xa70   :  { %v1421_v10 = vpack.c.bf16 %v6145_v48, %v6143_v42  ;;  %v1319_v14 = vmul.f32 %v5774_v37, %v1309_v23 }
 0xa71   :  { %v1420_v51 = vpack.c.bf16 %v1211_v44, %v1208_v2  ;;  %v1317_v19 = vmul.f32 %v5786_v63, %v1301_v46 }
 0xa72   :  { %v1425_v57 = vpack.c.bf16 %v1319_v14, %v1318_v49 }
 0xa73   :  { %v1424_v36 = vpack.c.bf16 %v1317_v19, %v1316_v5  ;;  %v4886_v58 = vpop.f32.mrb[28].mxu1 }
 0xa74   :  { %v1388_v27 = vadd.f32 %v4886_v58, %v4309_v7  ;;  %v1379_v54 = vpop.f32.mrb[29].mxu1 }
 0xa75   :  { %v1380_v45 = vadd.f32 %v4309_v7, %v1379_v54  ;;  %v4887_v9 = vpop.f32.mrb[30].mxu1  ;;  %v1445_v46 = vsel %vm6916_vm5, %v1424_v36, 0  ;;  %vm6924_vm5 = vmmov %vm6908_vm0 }
 0xa76   :  { %v1391_v12 = vadd.f32 %v4887_v9, %v4309_v7  ;;  %v1382_v8 = vpop.f32.mrb[31].mxu1  ;;  %4895 = vmatpush3.bf16.xpose.msra.mxu0 %v1442_v13  ;;  %v1412_v6 = vmul.f32 %v5719_v59, %v1388_v27 }
 0xa77   :  { %v1383_v47 = vadd.f32 %v4309_v7, %v1382_v8  ;;  %5182 = vmatprep.subr.msk.bf16.mxu0 %vm6914_vm1, %v1424_v36  ;;  %v1410_v16 = vmul.f32 %v5723_v62, %v1380_v45  ;;  %v1448_v36 = vsel %vm6919_vm13, %v1425_v57, 0  ;;  %vm6922_vm1 = vmmov %vm6908_vm0 }
 0xa78   :  { %v1413_v15 = vmul.f32 %v5726_v0, %v1391_v12 }
 0xa79   :  { %v1411_v42 = vmul.f32 %v5730_v4, %v1383_v47 }
 0xa7a   :  { %v1609_v48 = vpack.c.bf16 %v1413_v15, %v1412_v6 }
 0xa7b   :  { %v1608_v23 = vpack.c.bf16 %v1411_v42, %v1410_v16  ;;  %v4890_v33 = vpop.f32.mrb[32].mxu1 }
 0xa7c   :  { %v1404_v34 = vadd.f32 %v4890_v33, %v4309_v7  ;;  %v1395_v2 = vpop.f32.mrb[33].mxu1 }
 0xa7d   :  { %v1396_v38 = vadd.f32 %v4309_v7, %v1395_v2  ;;  %v4891_v44 = vpop.f32.mrb[34].mxu1  ;;  %4912 = vmatprep.mubr.msk.bf16.mxu1 %vm6915_vm2, %v1608_v23  ;;  %vm6923_vm2 = vmmov %vm6908_vm0 }
 0xa7e   :  { %v1407_v49 = vadd.f32 %v4891_v44, %v4309_v7  ;;  %v1398_v14 = vpop.f32.mrb[35].mxu1  ;;  %4897 = vmatpush3.bf16.xpose.msra.mxu0 %v1445_v46  ;;  %4913 = vmatmul.mubr.msk.bf16.vlgmr.msra.gmra.mrb[36].mxu1 %vm6917_vm9, %v1609_v48  ;;  %v1416_v19 = vmul.f32 %v5766_v28, %v1404_v34  ;;  %vm6925_vm9 = vcmask 523264  }
 0xa7f   :  { %v1399_v5 = vadd.f32 %v4309_v7, %v1398_v14  ;;  %5183 = vmatprep.subr.msk.bf16.mxu0 %vm6908_vm0, %v1425_v57  ;;  %v1414_v27 = vmul.f32 %v5770_v32, %v1396_v38  ;;  %vm6926_vm0 = vmmov %vm6925_vm9 }
 0xa80   :  { %v1417_v58 = vmul.f32 %v5774_v37, %v1407_v49  ;;  %vm6928_vm13 = vmmov %vm6926_vm0 }
 0xa81   :  { %v1415_v54 = vmul.f32 %v5786_v63, %v1399_v5 }
 0xa82   :  { %v1611_v45 = vpack.c.bf16 %v1417_v58, %v1416_v19 }
 0xa83   :  { %v1610_v9 = vpack.c.bf16 %v1415_v54, %v1414_v27 }
 0xa85   :  { %4916 = vmatprep.mubr.msk.bf16.mxu1 %vm6918_vm4, %v1610_v9  ;;  %vm6927_vm4 = vmmov %vm6926_vm0 }
 0xa86   :  { %4899 = vmatpush3.bf16.xpose.msra.mxu0 %v1448_v36  ;;  %4917 = vmatmul.mubr.msk.bf16.gmra.mrb[40].mxu1 %vm6920_vm11, %v1611_v45  ;;  %vm6929_vm11 = vmmov %vm6926_vm0 }
 0xa87   :  { %4928 = vmatprep.mubr.msk.bf16.mxu1 %vm6921_vm14, %v5475_v39  ;;  %4940 = vmatprep.subr.bf16.mxu0 %v5475_v39 }
 0xa8d   :  { %4901 = vmatmul.mubr.msk.bf16.vlgmr.msra.gmra.mrb[40].mxu0 %vm6922_vm1, %v1419_v53  ;;  %vm6930_vm1 = vmmov %vm6926_vm0 }
 0xa8e   :  { %4904 = vmatprep.mubr.msk.bf16.mxu0 %vm6923_vm2, %v1420_v51  ;;  %vm6931_vm2 = vmmov %vm6926_vm0 }
 0xa95   :  { %4905 = vmatmul.mubr.msk.bf16.gmra.mrb[44].mxu0 %vm6924_vm5, %v1421_v10  ;;  %vm6932_vm5 = vmmov %vm6926_vm0 }
 0xa96   :  { %4948 = vmatprep.mubr.msk.bf16.mxu0 %vm6921_vm14, %v5475_v39 }
 0xb51   :  { %v4914_v7 = vpop.f32.mrb[36].mxu1 }
 0xb52   :  { %v1670_v57 = vpop.f32.mrb[37].mxu1 }
 0xb53   :  { %v4915_v13 = vpop.f32.mrb[38].mxu1 }
 0xb54   :  { %v1709_v12 = vpack.c.bf16 %v4915_v13, %v4914_v7  ;;  %v1673_v8 = vpop.f32.mrb[39].mxu1 }
 0xb55   :  { %v1708_v47 = vpack.c.bf16 %v1673_v8, %v1670_v57 }
 0xb57   :  { %4921 = vmatpush3.bf16.msra.mxu1 %v1708_v47 }
 0xb58   :  { %4922 = vmatprep.subr.bf16.mxu1 %v5475_v39 }
 0xb59   :  { %v4918_v6 = vpop.f32.mrb[40].mxu1 }
 0xb5a   :  { %v1686_v3 = vpop.f32.mrb[41].mxu1 }
 0xb5b   :  { %v4919_v55 = vpop.f32.mrb[42].mxu1  ;;  %4923 = vmatpush3.bf16.msra.mxu1 %v1709_v12 }
 0xb5c   :  { %v1711_v53 = vpack.c.bf16 %v4919_v55, %v4918_v6  ;;  %v1689_v51 = vpop.f32.mrb[43].mxu1  ;;  %4924 = vmatprep.subr.bf16.mxu1 %v5475_v39 }
 0xb5d   :  { %v1710_v10 = vpack.c.bf16 %v1689_v51, %v1686_v3 }
 0xb5f   :  { %4925 = vmatpush3.bf16.msra.mxu1 %v1710_v10 }
 0xb60   :  { %v4902_v15 = vpop.f32.mrb[40].mxu0  ;;  %4926 = vmatprep.subr.bf16.mxu1 %v5475_v39 }
 0xb61   :  { %v1493_v16 = vadd.f32 %v4902_v15, %v5904_v20  ;;  %v1484_v42 = vpop.f32.mrb[41].mxu0 }
 0xb62   :  { %v4903_v48 = vpop.f32.mrb[42].mxu0  ;;  %v1485_v23 = vadd.f32 %v1484_v42, %v5919_v21 }
 0xb63   :  { %v1496_v33 = vadd.f32 %v4903_v48, %v5926_v56  ;;  %v1487_v34 = vpop.f32.mrb[43].mxu0  ;;  %4927 = vmatpush3.bf16.msra.mxu1 %v1711_v53  ;;  %v1521_v2 = vsel %vm6925_vm9, %v1493_v16, -inf  ;;  %vm6933_vm9 = vmmov %vm6926_vm0 }
 0xb64   :  { %1522 = vmax.xlane.f32.xlu0 %v1521_v2  ;;  %4932 = vmatprep.subr.bf16.mxu1 %v5475_v39  ;;  %v1488_v38 = vadd.f32 %v1487_v34, %v5945_v11  ;;  %v1515_v20 = vsel %vm6927_vm4, %v1485_v23, -inf  ;;  %vm6934_vm4 = vmmov %vm6926_vm0 }
 0xb65   :  { %v1524_v44 = vsel %vm6926_vm0, %v1496_v33, -inf }
 0xb66   :  { %1525 = vmax.xlane.f32.xlu1 %v1524_v44  ;;  %v1518_v21 = vsel %vm6928_vm13, %v1488_v38, -inf  ;;  %vm6935_vm13 = vmmov %vm6926_vm0 }
 0xb68   :  { %v4906_v46 = vpop.f32.mrb[44].mxu0  ;;  %1516 = vmax.xlane.f32.xlu0 %v1515_v20 }
 0xb69   :  { %v1500_v49 = vpop.f32.mrb[45].mxu0  ;;  %v1509_v19 = vadd.f32 %v4906_v46, %v5994_v35 }
 0xb6a   :  { %v1501_v56 = vadd.f32 %v1500_v49, %v5985_v43  ;;  %v4907_v14 = vpop.f32.mrb[46].mxu0  ;;  %1519 = vmax.xlane.f32.xlu1 %v1518_v21 }
 0xb6b   :  { %v1503_v5 = vpop.f32.mrb[47].mxu0  ;;  %v1512_v27 = vadd.f32 %v4907_v14, %v6002_v30  ;;  %v1533_v45 = vsel %vm6931_vm2, %v1509_v19, -inf  ;;  %vm6938_vm2 = vmmov %vm6926_vm0 }
 0xb6c   :  { %v1504_v58 = vadd.f32 %v1503_v5, %v5998_v40  ;;  %v1527_v11 = vsel %vm6929_vm11, %v1501_v56, -inf  ;;  %vm6936_vm11 = vmmov %vm6926_vm0 }
 0xb6d   :  { %1528 = vmax.xlane.f32.xlu0 %v1527_v11  ;;  %v1536_v43 = vsel %vm6932_vm5, %v1512_v27, -inf  ;;  %vm6939_vm5 = vmmov %vm6926_vm0 }
 0xb6e   :  { %v1530_v54 = vsel %vm6930_vm1, %v1504_v58, -inf  ;;  %vm6937_vm1 = vmmov %vm6926_vm0 }
 0xb6f   :  { %1531 = vmax.xlane.f32.xlu1 %v1530_v54 }
 0xb71   :  { %1534 = vmax.xlane.f32.xlu0 %v1533_v45 }
 0xb73   :  { %1537 = vmax.xlane.f32.xlu1 %v1536_v43 }
 0xbf1   :  { %v1523_v9 = vpop.xlane.xlu0 %1522 }
 0xbf2   :  { %v1541_v36 = vsub.f32 %v1493_v16, %v1523_v9 }
 0xbf3   :  { %v1526_v7 = vpop.xlane.xlu1 %1525 }
 0xbf4   :  { %v1551_v35 = vmul.f32 1.442695, %v1541_v36  ;;  %v1542_v57 = vsub.f32 %v1496_v33, %v1526_v7 }
 0xbf5   :  { %v1517_v40 = vpop.xlane.xlu0 %1516 }
 0xbf6   :  { %5311 = vpow2.f32 %v1551_v35  ;;  %v1553_v13 = vmul.f32 1.442695, %v1542_v57  ;;  %v1539_v12 = vsub.f32 %v1485_v23, %v1517_v40 }
 0xbf7   :  { %v1520_v8 = vpop.xlane.xlu1 %1519 }
 0xbf8   :  { %5313 = vpow2.f32 %v1553_v13  ;;  %v1547_v30 = vmul.f32 1.442695, %v1539_v12  ;;  %v1540_v47 = vsub.f32 %v1488_v38, %v1520_v8 }
 0xbfa   :  { %5315 = vpow2.f32 %v1547_v30  ;;  %v1549_v6 = vmul.f32 1.442695, %v1540_v47  ;;  %v1529_v3 = vpop.xlane.xlu0 %1528 }
 0xbfb   :  { %v1543_v55 = vsub.f32 %v1501_v56, %v1529_v3 }
 0xbfc   :  { %5317 = vpow2.f32 %v1549_v6  ;;  %v1532_v53 = vpop.xlane.xlu1 %1531 }
 0xbfd   :  { %v1555_v51 = vmul.f32 1.442695, %v1543_v55  ;;  %v1544_v10 = vsub.f32 %v1504_v58, %v1532_v53 }
 0xbfe   :  { %v1535_v15 = vpop.xlane.xlu0 %1534 }
 0xbff   :  { %5319 = vpow2.f32 %v1555_v51  ;;  %v1557_v16 = vmul.f32 1.442695, %v1544_v10  ;;  %v1545_v42 = vsub.f32 %v1509_v19, %v1535_v15 }
 0xc00   :  { %v5312_v48 = vpop.eup %5311  ;;  %v1538_v33 = vpop.xlane.xlu1 %1537 }
 0xc01   :  { %5321 = vpow2.f32 %v1557_v16  ;;  %v1559_v23 = vmul.f32 1.442695, %v1545_v42  ;;  %v1546_v34 = vsub.f32 %v1512_v27, %v1538_v33  ;;  %v1569_v2 = vsel %vm6933_vm9, %v5312_v48, 0.0  ;;  %vm6940_vm9 = vmmov %vm6926_vm0 }
 0xc02   :  { %v5314_v38 = vpop.eup %5313  ;;  %1570 = vadd.xlane.f32.xlu0 %v1569_v2 }
 0xc03   :  { %5323 = vpow2.f32 %v1559_v23  ;;  %v1561_v44 = vmul.f32 1.442695, %v1546_v34  ;;  %v1572_v20 = vsel %vm6926_vm0, %v5314_v38, 0.0  ;;  %vm6941_vm0 = vcmask 261120  }
 0xc04   :  { %v5316_v46 = vpop.eup %5315  ;;  %1573 = vadd.xlane.f32.xlu1 %v1572_v20 }
 0xc05   :  { %5325 = vpow2.f32 %v1561_v44  ;;  %v1563_v49 = vsel %vm6934_vm4, %v5316_v46, 0.0  ;;  %vm6942_vm4 = vmmov %vm6941_vm0 }
 0xc06   :  { %v5318_v21 = vpop.eup %5317  ;;  %1564 = vadd.xlane.f32.xlu0 %v1563_v49 }
 0xc07   :  { %v1566_v56 = vsel %vm6935_vm13, %v5318_v21, 0.0  ;;  %vm6943_vm13 = vmmov %vm6941_vm0 }
 0xc08   :  { %1567 = vadd.xlane.f32.xlu1 %v1566_v56 }
 0xc09   :  { %v5320_v14 = vpop.eup %5319 }
 0xc0a   :  { %v1575_v5 = vsel %vm6936_vm11, %v5320_v14, 0.0  ;;  %vm6944_vm11 = vmmov %vm6941_vm0 }
 0xc0b   :  { %v5322_v19 = vpop.eup %5321  ;;  %1576 = vadd.xlane.f32.xlu0 %v1575_v5 }
 0xc0c   :  { %v1578_v58 = vsel %vm6937_vm1, %v5322_v19, 0.0  ;;  %vm6945_vm1 = vmmov %vm6941_vm0 }
 0xc0d   :  { %v5324_v11 = vpop.eup %5323  ;;  %1579 = vadd.xlane.f32.xlu1 %v1578_v58 }
 0xc0e   :  { %v1581_v27 = vsel %vm6938_vm2, %v5324_v11, 0.0 }
 0xc0f   :  { %v5326_v54 = vpop.eup %5325  ;;  %1582 = vadd.xlane.f32.xlu0 %v1581_v27 }
 0xc10   :  { %v1584_v45 = vsel %vm6939_vm5, %v5326_v54, 0.0  ;;  %vm6946_vm5 = vmmov %vm6941_vm0 }
 0xc11   :  { %1585 = vadd.xlane.f32.xlu1 %v1584_v45 }
 0xc8f   :  { %v1571_v43 = vpop.xlane.xlu0 %1570 }
 0xc90   :  { %5327 = vrcp.f32 %v1571_v43 }
 0xc91   :  { %v1574_v9 = vpop.xlane.xlu1 %1573 }
 0xc93   :  { %v1565_v36 = vpop.xlane.xlu0 %1564 }
 0xc94   :  { %5329 = vrcp.f32 %v1565_v36 }
 0xc95   :  { %v1568_v7 = vpop.xlane.xlu1 %1567 }
 0xc96   :  { %5331 = vrcp.f32 %v1568_v7 }
 0xc97   :  { %5333 = vrcp.f32 %v1574_v9 }
 0xc98   :  { %v1577_v35 = vpop.xlane.xlu0 %1576 }
 0xc99   :  { %5335 = vrcp.f32 %v1577_v35 }
 0xc9a   :  { %v1580_v57 = vpop.xlane.xlu1 %1579  ;;  %v5328_v12 = vpop.eup %5327 }
 0xc9b   :  { %5337 = vrcp.f32 %v1580_v57  ;;  %v1597_v51 = vmul.f32 %v5328_v12, %v5312_v48  ;;  %v4331_v48 = vld [vmem:[%s6816_s11 + $0x1] ss:$0 sm:$0xff] }
 0xc9c   :  { %v1583_v40 = vpop.xlane.xlu0 %1582 }
 0xc9d   :  { %5339 = vrcp.f32 %v1583_v40 }
 0xc9e   :  { %v1586_v13 = vpop.xlane.xlu1 %1585  ;;  %v5330_v8 = vpop.eup %5329 }
 0xc9f   :  { %5341 = vrcp.f32 %v1586_v13  ;;  %v1595_v3 = vmul.f32 %v5330_v8, %v5316_v46 }
 0xca0   :  { %v5332_v30 = vpop.eup %5331 }
 0xca1   :  { %v5334_v47 = vpop.eup %5333  ;;  %v1596_v55 = vmul.f32 %v5332_v30, %v5318_v21  ;;  %v1701_v33 = vadd.f32 %v1597_v51, %v1595_v3  ;;  %v5222_v30 = vld [vmem:[%s6819_s14 + $0x18] sm:$0xff]  }
 0xca2   :  { %v1598_v10 = vmul.f32 %v5334_v47, %v5314_v38 }
 0xca3   :  { %v5336_v6 = vpop.eup %5335 }
 0xca4   :  { %v1599_v15 = vmul.f32 %v5336_v6, %v5320_v14  ;;  %v1702_v23 = vadd.f32 %v1598_v10, %v1596_v55 }
 0xca5   :  { %v5338_v53 = vpop.eup %5337 }
 0xca6   :  { %v1600_v16 = vmul.f32 %v5338_v53, %v5322_v19  ;;  %v1703_v44 = vadd.f32 %v1701_v33, %v1599_v15  ;;  %v4335_v15 = vld [vmem:[%s6817_s12 + $0x1] ss:$0 sm:$0xff] }
 0xca7   :  { %v5340_v42 = vpop.eup %5339 }
 0xca8   :  { %v1601_v34 = vmul.f32 %v5340_v42, %v5324_v11  ;;  %v1704_v20 = vadd.f32 %v1702_v23, %v1600_v16 }
 0xca9   :  { %v5342_v2 = vpop.eup %5341 }
 0xcaa   :  { %v1602_v49 = vmul.f32 %v5342_v2, %v5326_v54  ;;  %v1705_v56 = vadd.f32 %v1703_v44, %v1601_v34  ;;  %v4336_v34 = vld [vmem:[%s6818_s13 + $0x1] ss:$0 sm:$0xff] }
 0xcac   :  { %v1706_v5 = vadd.f32 %v1704_v20, %v1602_v49 }
 0xcae   :  { %v1707_v58 = vpack.c.bf16 %v1706_v5, %v1705_v56  ;;  %v5223_v56 = vld [vmem:[%s6821_s16 + $0x20] sm:$0xff]   ;;  %v5224_v5 = vld [vmem:[%s6821_s16 + $0x28] sm:$0xff]  }
 0xcaf   :  { %4941 = vmatpush3.bf16.msra.mxu0 %v5223_v56 }
 0xcb0   :  { %4929 = vmatmul.mubr.msk.bf16.vlgmr.msra.gmra.mrb[44].mxu1 %vm6940_vm9, %v1707_v58  ;;  %4942 = vmatprep.subr.bf16.mxu0 %v5475_v39  ;;  %v5225_v58 = vld [vmem:[%s6821_s16 + $0x30] sm:$0xff]   ;;  %vm6947_vm9 = vmmov %vm6941_vm0 }
 0xcb1   :  { %4936 = vmatprep.mubr.msk.bf16.mxu1 %vm6921_vm14, %v5475_v39 }
 0xcb3   :  { %4943 = vmatpush3.bf16.msra.mxu0 %v5224_v5 }
 0xcb4   :  { %4944 = vmatprep.subr.bf16.mxu0 %v5475_v39 }
 0xcb7   :  { %4945 = vmatpush3.bf16.msra.mxu0 %v5225_v58 }
 0xcb8   :  { %4946 = vmatprep.subr.bf16.mxu0 %v5475_v39 }
 0xd83   :  { %v1757_v38 = vpop.f32.mrb[44].mxu1 }
 0xd84   :  { %v1758_v46 = vadd.f32 %v4331_v48, %v1757_v38  ;;  %v4930_v21 = vpop.f32.mrb[45].mxu1  ;;  %v4342_v38 = vld [vmem:[%s6820_s15 + $0x1] ss:$0 sm:$0xff] }
 0xd85   :  { %v1760_v14 = vpop.f32.mrb[46].mxu1 }
 0xd86   :  { %v1761_v19 = vadd.f32 %v4331_v48, %v1760_v14  ;;  %v4931_v11 = vpop.f32.mrb[47].mxu1  ;;  %v1764_v27 = vadd.f32 %v1758_v46, %v6096_v52  ;;  %v5226_v48 = vld [vmem:[%s6821_s16 + $0x38] sm:$0xff]  }
 0xd87   :  { %4947 = vmatpush3.bf16.msra.mxu0 %v5226_v48 }
 0xd88   :  { %v1770_v54 = vsel %vm6941_vm0, %v1764_v27, 0.0  ;;  %v1765_v45 = vadd.f32 %v1761_v19, %v6098_v29  ;;  %v5221_v29 = vld [vmem:[%s6819_s14 + $0x10] sm:$0xff]   ;;  %4960 = vmatprep.subr.bf16.mxu0 %v5475_v39 }
 0xd89   :  { %1771 = vadd.xlane.f32.xlu0 %v1770_v54  ;;  %4933 = vmatpush3.bf16.msra.mxu1 %v5221_v29 }
 0xd8a   :  { %v1773_v43 = vsel %vm6942_vm4, %v1765_v45, 0.0  ;;  %4934 = vmatprep.subr.bf16.mxu1 %v5475_v39  ;;  %vm6948_vm4 = vmmov %vm6941_vm0 }
 0xd8b   :  { %1774 = vadd.xlane.f32.xlu1 %v1773_v43 }
 0xd8d   :  { %4935 = vmatpush3.bf16.msra.mxu1 %v5222_v30 }
 0xd8e   :  { %4952 = vmatprep.subr.bf16.mxu1 %v5475_v39 }
 0xe16   :  { %v1772_v9 = vpop.xlane.xlu0 %1771 }
 0xe17   :  { %v1776_v36 = vmul.f32 0.03125, %v1772_v9 }
 0xe18   :  { %v1775_v7 = vpop.xlane.xlu1 %1774 }
 0xe19   :  { %v1778_v35 = vsub.f32 %v1764_v27, %v1776_v36  ;;  %v1777_v57 = vmul.f32 0.03125, %v1775_v7 }
 0xe1b   :  { %v1779_v40 = vsub.f32 %v1765_v45, %v1777_v57  ;;  %v1780_v13 = vmul.f32 %v1778_v35, %v1778_v35 }
 0xe1d   :  { %v1782_v12 = vsel %vm6943_vm13, %v1780_v13, 0.0  ;;  %v1781_v8 = vmul.f32 %v1779_v40, %v1779_v40  ;;  %vm6949_vm13 = vmmov %vm6941_vm0 }
 0xe1e   :  { %1783 = vadd.xlane.f32.xlu0 %v1782_v12 }
 0xe1f   :  { %v1785_v52 = vsel %vm6944_vm11, %v1781_v8, 0.0  ;;  %vm6950_vm11 = vmmov %vm6941_vm0 }
 0xe20   :  { %1786 = vadd.xlane.f32.xlu1 %v1785_v52 }
 0xeab   :  { %v1784_v47 = vpop.xlane.xlu0 %1783 }
 0xeac   :  { %v1788_v6 = vmul.f32 0.03125, %v1784_v47 }
 0xead   :  { %v1787_v3 = vpop.xlane.xlu1 %1786 }
 0xeae   :  { %v1790_v55 = vadd.f32 1e-12, %v1788_v6  ;;  %v1789_v53 = vmul.f32 0.03125, %v1787_v3 }
 0xeb0   :  { %5343 = vrsqrt.f32 %v1790_v55  ;;  %v1791_v51 = vadd.f32 1e-12, %v1789_v53  ;;  %v4355_v53 = vld [vmem:[%s6822_s17 + $0x1] ss:$0 sm:$0xff] }
 0xeb2   :  { %5345 = vrsqrt.f32 %v1791_v51 }
 0xeba   :  { %v5344_v10 = vpop.eup %5343 }
 0xebb   :  { %v1794_v16 = vmul.f32 %v5344_v10, %v1778_v35 }
 0xebc   :  { %v5346_v42 = vpop.eup %5345 }
 0xebd   :  { %v1802_v33 = vmul.f32 %v4335_v15, %v1794_v16  ;;  %v1795_v23 = vmul.f32 %v5346_v42, %v1779_v40 }
 0xebf   :  { %v1803_v2 = vmul.f32 %v4335_v15, %v1795_v23  ;;  %v1810_v44 = vadd.f32 %v4336_v34, %v1802_v33 }
 0xec1   :  { %v1811_v20 = vadd.f32 %v4336_v34, %v1803_v2 }
 0xec3   :  { %v1817_v49 = vpack.c.bf16 %v1811_v20, %v1810_v44 }
 0xec5   :  { %4937 = vmatmul.mubr.msk.bf16.vlgmr.msra.gmra.mrb[48].mxu1 %vm6945_vm1, %v1817_v49  ;;  %vm6951_vm1 = vmmov %vm6941_vm0 }
 0xec6   :  { %4956 = vmatprep.mubr.msk.bf16.mxu1 %vm6921_vm14, %v5475_v39 }
 0xf98   :  { %v1875_v46 = vpop.f32.mrb[48].mxu1 }
 0xf99   :  { %v1876_v21 = vadd.f32 %v4342_v38, %v1875_v46  ;;  %v4938_v14 = vpop.f32.mrb[49].mxu1 }
 0xf9a   :  { %v1878_v19 = vpop.f32.mrb[50].mxu1  ;;  %v4375_v14 = vld [vmem:[%s6856_s27 + $0x18] sm:$0xff] }
 0xf9b   :  { %v1884_v11 = vmul.f32 0.044715, %v1876_v21  ;;  %v1879_v27 = vadd.f32 %v4342_v38, %v1878_v19  ;;  %v4939_v54 = vpop.f32.mrb[51].mxu1  ;;  %v1882_v29 = vmul.f32 0.5, %v1876_v21 }
 0xf9d   :  { %v1886_v45 = vmul.f32 %v1884_v11, %v1876_v21  ;;  %v1885_v43 = vmul.f32 0.044715, %v1879_v27  ;;  %v1883_v30 = vmul.f32 0.5, %v1879_v27 }
 0xf9f   :  { %v1888_v9 = vmul.f32 %v1886_v45, %v1876_v21  ;;  %v1887_v36 = vmul.f32 %v1885_v43, %v1879_v27  ;;  %v5227_v45 = vld [vmem:[%s6825_s20] sm:$0xff]   ;;  %v5228_v43 = vld [vmem:[%s6825_s20 + $0x8] sm:$0xff]  }
 0xfa0   :  { %4953 = vmatpush3.bf16.msra.mxu1 %v5227_v45 }
 0xfa1   :  { %v1890_v7 = vadd.f32 %v1888_v9, %v1876_v21  ;;  %v1889_v35 = vmul.f32 %v1887_v36, %v1879_v27  ;;  %4954 = vmatprep.subr.bf16.mxu1 %v5475_v39 }
 0xfa3   :  { %v1892_v57 = vmul.f32 0.7978846, %v1890_v7  ;;  %v1891_v40 = vadd.f32 %v1889_v35, %v1879_v27  ;;  %v2211_v27 = vsel %vm6949_vm13, %v4375_v14, 0.0  ;;  %vm6955_vm13 = vmmov %vm6941_vm0 }
 0xfa4   :  { %4955 = vmatpush3.bf16.msra.mxu1 %v5228_v43  ;;  %v4378_v43 = vld [vmem:[%s6860_s29 + $0x1] ss:$0 sm:$0xff] }
 0xfa5   :  { %5347 = vtanh.f32 %v1892_v57  ;;  %v1893_v13 = vmul.f32 0.7978846, %v1891_v40 }
 0xfa7   :  { %5349 = vtanh.f32 %v1893_v13 }
 0xfaf   :  { %v5348_v12 = vpop.eup %5347 }
 0xfb0   :  { %v1896_v8 = vadd.f32 1.0, %v5348_v12 }
 0xfb1   :  { %v5350_v52 = vpop.eup %5349 }
 0xfb2   :  { %v1897_v47 = vadd.f32 1.0, %v5350_v52  ;;  %v1898_v6 = vmul.f32 %v1896_v8, %v1882_v29 }
 0xfb4   :  { %v1899_v3 = vmul.f32 %v1897_v47, %v1883_v30 }
 0xfb6   :  { %v1909_v55 = vpack.c.bf16 %v1899_v3, %v1898_v6 }
 0xfb8   :  { %4949 = vmatmul.mubr.msk.bf16.vlgmr.msra.gmra.mrb[48].mxu0 %vm6938_vm2, %v1909_v55  ;;  %vm6952_vm2 = vmmov %vm6941_vm0 }
 0xfb9   :  { %4964 = vmatprep.mubr.msk.bf16.mxu0 %vm6921_vm14, %v5475_v39 }
0x108b   :  { %v1979_v51 = vpop.f32.mrb[48].mxu0 }
0x108c   :  { %v1980_v10 = vadd.f32 %v4355_v53, %v1979_v51  ;;  %v4950_v15 = vpop.f32.mrb[49].mxu0 }
0x108d   :  { %v1982_v16 = vpop.f32.mrb[50].mxu0  ;;  %v4363_v15 = vld [vmem:[%s6823_s18 + $0x1] ss:$0 sm:$0xff] }
0x108e   :  { %v1983_v42 = vadd.f32 %v4355_v53, %v1982_v16  ;;  %v4951_v33 = vpop.f32.mrb[51].mxu0  ;;  %v1986_v23 = vadd.f32 %v1980_v10, %v1810_v44 }
0x1090   :  { %v1992_v34 = vsel %vm6946_vm5, %v1986_v23, 0.0  ;;  %v1987_v2 = vadd.f32 %v1983_v42, %v1811_v20  ;;  %v4374_v20 = vld [vmem:[%s6856_s27 + $0x10] sm:$0xff]  ;;  %vm6845_vm5 = vcmask 1040384   ;;  %s6979_s27 = sld [smem:[#allocation6_spill]] }
0x1091   :  { %1993 = vadd.xlane.f32.xlu1 %v1992_v34  ;;  %v2208_v54 = vsel %vm6950_vm11, %v4374_v20, 0.0  ;;  %vm6956_vm11 = vmmov %vm6941_vm0 }
0x1092   :  { %v1995_v49 = vsel %vm6947_vm9, %v1987_v2, 0.0  ;;  %vm6953_vm9 = vmmov %vm6941_vm0 }
0x1093   :  { %1996 = vadd.xlane.f32.xlu0 %v1995_v49 }
0x111e   :  { %v1994_v56 = vpop.xlane.xlu1 %1993 }
0x111f   :  { %v1998_v5 = vmul.f32 0.03125, %v1994_v56 }
0x1120   :  { %v1997_v58 = vpop.xlane.xlu0 %1996 }
0x1121   :  { %v2000_v48 = vsub.f32 %v1986_v23, %v1998_v5  ;;  %v1999_v38 = vmul.f32 0.03125, %v1997_v58  ;;  %v4364_v23 = vld [vmem:[%s6824_s19 + $0x1] ss:$0 sm:$0xff] }
0x1122   :  { %v5229_v58 = vld [vmem:[%s6857_s0 + $0x20] sm:$0xff]  }
0x1123   :  { %v2001_v46 = vsub.f32 %v1987_v2, %v1999_v38  ;;  %v2002_v21 = vmul.f32 %v2000_v48, %v2000_v48  ;;  %4968 = vmatprep.subr.bf16.mxu1 %v5229_v58  ;;  %v5231_v38 = vld [vmem:[%s6859_s28 + $0x20] sm:$0xff]  }
0x1125   :  { %v2004_v44 = vsel %vm6941_vm0, %v2002_v21, 0.0  ;;  %v2003_v19 = vmul.f32 %v2001_v46, %v2001_v46  ;;  %v5234_v21 = vld [vmem:[%s6827_s22 + $0x8] sm:$0xff]  }
0x1126   :  { %2005 = vadd.xlane.f32.xlu1 %v2004_v44 }
0x1127   :  { %v2007_v11 = vsel %vm6948_vm4, %v2003_v19, 0.0  ;;  %vm6954_vm4 = vmmov %vm6941_vm0 }
0x1128   :  { %2008 = vadd.xlane.f32.xlu0 %v2007_v11 }
0x112a   :  { %2212 = vadd.xlane.f32.xlu1 %v2211_v27 }
0x112c   :  { %2209 = vadd.xlane.f32.xlu0 %v2208_v54 }
0x11b3   :  { %v2006_v9 = vpop.xlane.xlu1 %2005 }
0x11b4   :  { %v2010_v36 = vmul.f32 0.03125, %v2006_v9 }
0x11b5   :  { %v2009_v7 = vpop.xlane.xlu0 %2008 }
0x11b6   :  { %v2012_v35 = vadd.f32 1e-12, %v2010_v36  ;;  %v2011_v57 = vmul.f32 0.03125, %v2009_v7 }
0x11b7   :  { %v2213_v40 = vpop.xlane.xlu1 %2212 }
0x11b8   :  { %5351 = vrsqrt.f32 %v2012_v35  ;;  %v2013_v13 = vadd.f32 1e-12, %v2011_v57  ;;  %v2215_v12 = vmul.f32 0.03125, %v2213_v40  ;;  %v4379_v57 = vld [vmem:[%s6861_s25 + $0x1] ss:$0 sm:$0xff] }
0x11b9   :  { %v2210_v8 = vpop.xlane.xlu0 %2209 }
0x11ba   :  { %5353 = vrsqrt.f32 %v2013_v13  ;;  %v2217_v52 = vsub.f32 %v4375_v14, %v2215_v12  ;;  %v2214_v29 = vmul.f32 0.03125, %v2210_v8  ;;  %v5235_v14 = vld [vmem:[%s6858_s3 + $0x20] sm:$0xff]  }
0x11bc   :  { %v2216_v30 = vsub.f32 %v4374_v20, %v2214_v29  ;;  %v2219_v47 = vmul.f32 %v2217_v52, %v2217_v52  ;;  %v5232_v29 = vld [vmem:[%s6859_s28 + $0x28] sm:$0xff]  }
0x11be   :  { %v2223_v6 = vsel %vm6951_vm1, %v2219_v47, 0.0  ;;  %v2218_v3 = vmul.f32 %v2216_v30, %v2216_v30  ;;  %vm6957_vm1 = vmmov %vm6941_vm0 }
0x11bf   :  { %2224 = vadd.xlane.f32.xlu1 %v2223_v6 }
0x11c0   :  { %v2220_v55 = vsel %vm6952_vm2, %v2218_v3, 0.0  ;;  %vm6958_vm2 = vmmov %vm6941_vm0 }
0x11c1   :  { %2221 = vadd.xlane.f32.xlu0 %v2220_v55 }
0x11c2   :  { %v5352_v53 = vpop.eup %5351 }
0x11c3   :  { %v2016_v51 = vmul.f32 %v5352_v53, %v2000_v48  ;;  %v5230_v48 = vld [vmem:[%s6857_s0 + $0x28] sm:$0xff]  }
0x11c4   :  { %v5354_v10 = vpop.eup %5353 }
0x11c5   :  { %v2017_v16 = vmul.f32 %v5354_v10, %v2001_v46  ;;  %v2024_v42 = vmul.f32 %v4363_v15, %v2016_v51  ;;  %v5233_v46 = vld [vmem:[%s6827_s22] sm:$0xff]   ;;  %v5236_v10 = vld [vmem:[%s6858_s3 + $0x28] sm:$0xff]  }
0x11c6   :  { %4961 = vmatpush3.bf16.msra.mxu0 %v5233_v46 }
0x11c7   :  { %v2025_v33 = vmul.f32 %v4363_v15, %v2017_v16  ;;  %v2032_v2 = vadd.f32 %v4364_v23, %v2024_v42  ;;  %4962 = vmatprep.subr.bf16.mxu0 %v5475_v39  ;;  %v5237_v15 = vld [vmem:[%s6815_s10 + $0x20] sm:$0xff]   ;;  %v5238_v16 = vld [vmem:[%s6815_s10 + $0x28] sm:$0xff]  }
0x11c8   :  { %v4385_v42 = vld [vmem:[%s6863_s1 + $0x2] ss:$0 sm:$0xff] }
0x11c9   :  { %v2033_v34 = vadd.f32 %v4364_v23, %v2025_v33 }
0x11ca   :  { %4963 = vmatpush3.bf16.msra.mxu0 %v5234_v21 }
0x11cb   :  { %v2035_v49 = vrot.slane %v2033_v34, 7  ;;  %4980 = vmatprep.subr.bf16.mxu0 %v5235_v14 }
0x11cd   :  { %v2038_v56 = vsel %vm6845_vm5, %v2032_v2, %v2035_v49  ;;  %vm6960_vm5 = vmmov %vm6941_vm0 }
0x11ce   :  { %v2043_v5 = vpack.c.bf16 %v2038_v56, %v2038_v56 }
0x11d0   :  { %4957 = vmatmul.mubr.msk.bf16.vlgmr.msra.gmra.mrb[52].mxu1 %vm6953_vm9, %v2043_v5  ;;  %vm6959_vm9 = vmmov %vm6941_vm0 }
0x11d1   :  { %4969 = vmatpush3.bf16.msra.mxu1 %v5229_v58 }
0x11d2   :  { %4970 = vmatprep.subr.bf16.mxu1 %v5230_v48 }
0x11d5   :  { %4971 = vmatpush3.bf16.msra.mxu1 %v5230_v48 }
0x11d6   :  { %4992 = vmatprep.subr.bf16.mxu1 %v5231_v38 }
0x124c   :  { %v2225_v44 = vpop.xlane.xlu1 %2224 }
0x124d   :  { %v2227_v19 = vmul.f32 0.03125, %v2225_v44 }
0x124e   :  { %v2222_v20 = vpop.xlane.xlu0 %2221 }
0x124f   :  { %v2229_v11 = vadd.f32 1e-12, %v2227_v19  ;;  %v2226_v27 = vmul.f32 0.03125, %v2222_v20 }
0x1251   :  { %5355 = vrsqrt.f32 %v2229_v11  ;;  %v2228_v54 = vadd.f32 1e-12, %v2226_v27 }
0x1253   :  { %5357 = vrsqrt.f32 %v2228_v54 }
0x125b   :  { %v5356_v45 = vpop.eup %5355 }
0x125c   :  { %v2233_v9 = vmul.f32 %v5356_v45, %v2217_v52  ;;  %v4365_v52 = vld [vmem:[%s6826_s21] ss:$0 sm:$0xff] }
0x125d   :  { %v5358_v36 = vpop.eup %5357 }
0x125e   :  { %v2241_v7 = vmul.f32 %v4378_v43, %v2233_v9  ;;  %v2232_v35 = vmul.f32 %v5358_v36, %v2216_v30 }
0x1260   :  { %v2240_v40 = vmul.f32 %v4378_v43, %v2232_v35  ;;  %v6321_v13 = vadd.f32 %v4379_v57, %v2241_v7  ;;  %v4409_v43 = vld [vmem:[%s6814_s9 + $0x2] ss:$0 sm:$0xff] }
0x1262   :  { %v6323_v12 = vadd.f32 %v4379_v57, %v2240_v40 }
0x1264   :  { %v2255_v8 = vpack.c.bf16 %v6321_v13, %v6323_v12 }
0x1266   :  { %4972 = vmatprep.mubr.msk.bf16.mxu1 %vm6941_vm0, %v2255_v8 }
0x1267   :  { %4973 = vmatmul.mubr.msk.bf16.vlgmr.msra.gmra.mrb[56].mxu1 %vm6954_vm4, %v2255_v8  ;;  %vm6962_vm4 = vmmov %vm6941_vm0 }
0x1268   :  { %4976 = vmatprep.mubr.msk.bf16.mxu1 %vm6955_vm13, %v2255_v8  ;;  %4993 = vmatpush3.bf16.msra.mxu1 %v5231_v38  ;;  %vm6963_vm13 = vmmov %vm6941_vm0 }
0x1269   :  { %4994 = vmatprep.subr.bf16.mxu1 %v5232_v29 }
0x126c   :  { %4995 = vmatpush3.bf16.msra.mxu1 %v5232_v29 }
0x126d   :  { %5020 = vmatprep.subr.bf16.mxu1 %v5237_v15 }
0x126f   :  { %4977 = vmatmul.mubr.msk.bf16.gmra.mrb[60].mxu1 %vm6956_vm11, %v2255_v8  ;;  %vm6964_vm11 = vmmov %vm6941_vm0 }
0x1270   :  { %4996 = vmatprep.mubr.msk.bf16.mxu1 %vm6957_vm1, %v2255_v8  ;;  %vm6965_vm1 = vmmov %vm6941_vm0 }
0x1277   :  { %4997 = vmatmul.mubr.msk.bf16.vlgmr.msra.gmra.mrb[64].mxu1 %vm6958_vm2, %v2255_v8  ;;  %vm6966_vm2 = vmmov %vm6941_vm0 }
0x1278   :  { %5000 = vmatprep.mubr.msk.bf16.mxu1 %vm6959_vm9, %v2255_v8  ;;  %5021 = vmatpush3.bf16.msra.mxu1 %v5237_v15  ;;  %vm6967_vm9 = vmmov %vm6941_vm0 }
0x1279   :  { %5022 = vmatprep.subr.bf16.mxu1 %v5238_v16 }
0x127c   :  { %5023 = vmatpush3.bf16.msra.mxu1 %v5238_v16 }
0x127d   :  { %5032 = vmatprep.subr.bf16.mxu1 %v5475_v39 }
0x127f   :  { %5001 = vmatmul.mubr.msk.bf16.gmra.mrb[68].mxu1 %vm6960_vm5, %v2255_v8  ;;  %vm6961_vm5 = vmmov %vm6941_vm0 }
0x12a3   :  { %v2100_v30 = vpop.f32.mrb[52].mxu1 }
0x12a4   :  { %v2101_v47 = vadd.f32 %v4365_v52, %v2100_v30  ;;  %v4958_v6 = vpop.f32.mrb[53].mxu1 }
0x12a5   :  { %v2103_v3 = vpop.f32.mrb[54].mxu1 }
0x12a6   :  { %5359 = vtanh.f32 %v2101_v47  ;;  %v4959_v55 = vpop.f32.mrb[55].mxu1 }
0x12b0   :  { %v5360_v53 = vpop.eup %5359 }
0x12b1   :  { %v2111_v51 = vpack.c.bf16 %v5360_v53, %v5360_v53 }
0x12b3   :  { %4965 = vmatmul.mubr.msk.bf16.vlgmr.msra.gmra.mrb[52].mxu0 %vm6941_vm0, %v2111_v51 }
0x12b4   :  { %4981 = vmatpush3.bf16.msra.mxu0 %v5235_v14  ;;  %4984 = vmatprep.mubr.msk.bf16.mxu0 %vm6961_vm5, %v2255_v8  ;;  %vm6968_vm5 = vmmov %vm6941_vm0 }
0x12b5   :  { %4982 = vmatprep.subr.bf16.mxu0 %v5236_v10 }
0x12b8   :  { %4983 = vmatpush3.bf16.msra.mxu0 %v5236_v10 }
0x12bb   :  { %4985 = vmatmul.mubr.msk.bf16.vlgmr.msra.gmra.mrb[56].mxu0 %vm6962_vm4, %v2255_v8  ;;  %vm2174_vm4 = vcmask 123904  }
0x12bc   :  { %4988 = vmatprep.mubr.msk.bf16.mxu0 %vm6963_vm13, %v2255_v8  ;;  %vm6969_vm13 = vmmov %vm6941_vm0 }
0x12c3   :  { %4989 = vmatmul.mubr.msk.bf16.gmra.mrb[60].mxu0 %vm6964_vm11, %v2255_v8  ;;  %vm6970_vm11 = vmmov %vm6941_vm0 }
0x133a   :  { %v4974_v33 = vpop.f32.mrb[56].mxu1 }
0x133b   :  { %v6359_v23 = vadd.f32 %v4974_v33, %v4385_v42  ;;  %v2313_v34 = vpop.f32.mrb[57].mxu1 }
0x133c   :  { %v4975_v2 = vpop.f32.mrb[58].mxu1  ;;  %v2314_v5 = vadd.f32 %v4385_v42, %v2313_v34 }
0x133d   :  { %v6361_v49 = vadd.f32 %v4975_v2, %v4385_v42  ;;  %v2316_v56 = vpop.f32.mrb[59].mxu1 }
0x133e   :  { %v2317_v58 = vadd.f32 %v4385_v42, %v2316_v56 }
0x133f   :  { %v2541_v48 = vpack.c.bf16 %v6361_v49, %v6359_v23 }
0x1340   :  { %v2540_v38 = vpack.c.bf16 %v2317_v58, %v2314_v5 }
0x1342   :  { %v4978_v46 = vpop.f32.mrb[60].mxu1  ;;  %5012 = vmatprep.mubr.msk.bf16.mxu0 %vm6965_vm1, %v2540_v38  ;;  %vm6971_vm1 = vmmov %vm6941_vm0 }
0x1343   :  { %v6366_v21 = vadd.f32 %v4978_v46, %v4385_v42  ;;  %v2329_v14 = vpop.f32.mrb[61].mxu1 }
0x1344   :  { %v6368_v44 = vadd.f32 %v4385_v42, %v2329_v14  ;;  %v4979_v19 = vpop.f32.mrb[62].mxu1  ;;  %v4369_v14 = vld [vmem:[%s6828_s23] ss:$0 sm:$0xff] }
0x1345   :  { %v6370_v20 = vadd.f32 %v4979_v19, %v4385_v42  ;;  %v2332_v11 = vpop.f32.mrb[63].mxu1 }
0x1346   :  { %v6372_v27 = vadd.f32 %v4385_v42, %v2332_v11 }
0x1347   :  { %v2543_v54 = vpack.c.bf16 %v6370_v20, %v6366_v21 }
0x1348   :  { %v2542_v45 = vpack.c.bf16 %v6372_v27, %v6368_v44 }
0x134a   :  { %v4998_v9 = vpop.f32.mrb[64].mxu1 }
0x134b   :  { %v2510_v36 = vadd.f32 %v4998_v9, %v4409_v43  ;;  %v2501_v7 = vpop.f32.mrb[65].mxu1 }
0x134c   :  { %v2502_v35 = vadd.f32 %v4409_v43, %v2501_v7  ;;  %v4999_v57 = vpop.f32.mrb[66].mxu1  ;;  %v4397_v7 = vld [vmem:[%s6862_s30 + $0x2] ss:$0 sm:$0xff] }
0x134d   :  { %v2513_v40 = vadd.f32 %v4999_v57, %v4409_v43  ;;  %v2504_v8 = vpop.f32.mrb[67].mxu1  ;;  %v2534_v52 = vmul.f32 %v5719_v59, %v2510_v36 }
0x134e   :  { %v2505_v29 = vadd.f32 %v4409_v43, %v2504_v8  ;;  %v2532_v47 = vmul.f32 %v5723_v62, %v2502_v35 }
0x134f   :  { %v2535_v30 = vmul.f32 %v5726_v0, %v2513_v40 }
0x1350   :  { %v2533_v6 = vmul.f32 %v5730_v4, %v2505_v29 }
0x1351   :  { %v2731_v3 = vpack.c.bf16 %v2535_v30, %v2534_v52 }
0x1352   :  { %v2730_v55 = vpack.c.bf16 %v2533_v6, %v2532_v47  ;;  %v5002_v53 = vpop.f32.mrb[68].mxu1 }
0x1353   :  { %v2526_v51 = vadd.f32 %v5002_v53, %v4409_v43  ;;  %v2517_v10 = vpop.f32.mrb[69].mxu1 }
0x1354   :  { %v2518_v15 = vadd.f32 %v4409_v43, %v2517_v10  ;;  %v5003_v16 = vpop.f32.mrb[70].mxu1  ;;  %5024 = vmatprep.mubr.msk.bf16.mxu1 %vm6966_vm2, %v2730_v55  ;;  %vm6972_vm2 = vmmov %vm6941_vm0 }
0x1355   :  { %v2529_v42 = vadd.f32 %v5003_v16, %v4409_v43  ;;  %v2520_v33 = vpop.f32.mrb[71].mxu1  ;;  %5025 = vmatmul.mubr.msk.bf16.vlgmr.msra.gmra.mrb[72].mxu1 %vm6967_vm9, %v2731_v3  ;;  %v2538_v2 = vmul.f32 %v5766_v28, %v2526_v51  ;;  %vm6973_vm9 = vmmov %vm6941_vm0 }
0x1356   :  { %v2521_v34 = vadd.f32 %v4409_v43, %v2520_v33  ;;  %v2536_v5 = vmul.f32 %v5770_v32, %v2518_v15 }
0x1357   :  { %v2539_v56 = vmul.f32 %v5774_v37, %v2529_v42 }
0x1358   :  { %v2537_v58 = vmul.f32 %v5786_v63, %v2521_v34 }
0x1359   :  { %v2733_v38 = vpack.c.bf16 %v2539_v56, %v2538_v2 }
0x135a   :  { %v2732_v46 = vpack.c.bf16 %v2537_v58, %v2536_v5 }
0x135c   :  { %5028 = vmatprep.mubr.msk.bf16.mxu1 %vm6941_vm0, %v2732_v46 }
0x135d   :  { %5029 = vmatmul.mubr.msk.bf16.gmra.mrb[76].mxu1 %vm6968_vm5, %v2733_v38  ;;  %vm6974_vm5 = vmmov %vm6941_vm0 }
0x135e   :  { %5040 = vmatprep.mubr.msk.bf16.mxu1 %vm6921_vm14, %v5475_v39 }
0x1386   :  { %v2168_v19 = vpop.f32.mrb[52].mxu0 }
0x1387   :  { %v2169_v11 = vadd.f32 %v4369_v14, %v2168_v19  ;;  %v4966_v43 = vpop.f32.mrb[53].mxu0 }
0x1388   :  { %v2171_v9 = vpop.f32.mrb[54].mxu0 }
0x1389   :  { %2175 = vst.msk [vmem:[#allocation2] sm:$0x3] %vm2174_vm4, %v2169_v11  ;;  %v4967_v36 = vpop.f32.mrb[55].mxu0 }
0x138e   :  { %v4986_v35 = vpop.f32.mrb[56].mxu0 }
0x138f   :  { %v2412_v57 = vadd.f32 %v4986_v35, %v4397_v7  ;;  %v2403_v40 = vpop.f32.mrb[57].mxu0 }
0x1390   :  { %v2404_v8 = vadd.f32 %v4397_v7, %v2403_v40  ;;  %v4987_v29 = vpop.f32.mrb[58].mxu0 }
0x1391   :  { %v2415_v52 = vadd.f32 %v4987_v29, %v4397_v7  ;;  %v2406_v30 = vpop.f32.mrb[59].mxu0  ;;  %v2436_v6 = vmul.f32 %v5719_v59, %v2412_v57 }
0x1392   :  { %v2407_v47 = vadd.f32 %v4397_v7, %v2406_v30  ;;  %v2434_v55 = vmul.f32 %v5723_v62, %v2404_v8 }
0x1393   :  { %v2437_v3 = vmul.f32 %v5726_v0, %v2415_v52 }
0x1394   :  { %v2435_v53 = vmul.f32 %v5730_v4, %v2407_v47 }
0x1395   :  { %v2545_v51 = vpack.c.bf16 %v2437_v3, %v2436_v6 }
0x1396   :  { %v2544_v10 = vpack.c.bf16 %v2435_v53, %v2434_v55  ;;  %v4990_v15 = vpop.f32.mrb[60].mxu0 }
0x1397   :  { %v2428_v16 = vadd.f32 %v4990_v15, %v4397_v7  ;;  %v2419_v42 = vpop.f32.mrb[61].mxu0  ;;  %v2564_v9 = vsel %vm6972_vm2, %v2545_v51, 0  ;;  %vm6978_vm2 = vmmov %vm6941_vm0 }
0x1398   :  { %v2420_v33 = vadd.f32 %v4397_v7, %v2419_v42  ;;  %v4991_v34 = vpop.f32.mrb[62].mxu0  ;;  %5184 = vmatprep.subr.msk.bf16.mxu0 %vm6969_vm13, %v2544_v10  ;;  %v2561_v2 = vsel %vm6970_vm11, %v2544_v10, 0  ;;  %vm6975_vm13 = vmmov %vm6941_vm0 }
0x1399   :  { %v2431_v56 = vadd.f32 %v4991_v34, %v4397_v7  ;;  %v2422_v5 = vpop.f32.mrb[63].mxu0  ;;  %5005 = vmatpush3.bf16.xpose.msra.mxu0 %v2561_v2  ;;  %v2440_v38 = vmul.f32 %v5766_v28, %v2428_v16  ;;  %vm6976_vm11 = vmmov %vm6941_vm0 }
0x139a   :  { %v2423_v58 = vadd.f32 %v4397_v7, %v2422_v5  ;;  %5185 = vmatprep.subr.msk.bf16.mxu0 %vm6971_vm1, %v2545_v51  ;;  %v2438_v14 = vmul.f32 %v5770_v32, %v2420_v33  ;;  %vm6977_vm1 = vmmov %vm6941_vm0 }
0x139b   :  { %v2441_v46 = vmul.f32 %v5774_v37, %v2431_v56 }
0x139c   :  { %v2439_v19 = vmul.f32 %v5786_v63, %v2423_v58 }
0x139d   :  { %v2547_v11 = vpack.c.bf16 %v2441_v46, %v2440_v38 }
0x139e   :  { %v2546_v43 = vpack.c.bf16 %v2439_v19, %v2438_v14 }
0x139f   :  { %v2570_v7 = vsel %vm6975_vm13, %v2547_v11, 0 }
0x13a0   :  { %v2567_v36 = vsel %vm6941_vm0, %v2546_v43, 0 }
0x13a1   :  { %5007 = vmatpush3.bf16.xpose.msra.mxu0 %v2564_v9 }
0x13a2   :  { %5186 = vmatprep.subr.msk.bf16.mxu0 %vm6973_vm9, %v2546_v43 }
0x13a9   :  { %5009 = vmatpush3.bf16.xpose.msra.mxu0 %v2567_v36 }
0x13aa   :  { %5187 = vmatprep.subr.msk.bf16.mxu0 %vm6974_vm5, %v2547_v11 }
0x13b1   :  { %5011 = vmatpush3.bf16.xpose.msra.mxu0 %v2570_v7 }
0x13b2   :  { %5044 = vmatprep.subr.bf16.mxu0 %v5475_v39 }
0x13b8   :  { %5013 = vmatmul.mubr.msk.bf16.vlgmr.msra.gmra.mrb[64].mxu0 %vm6976_vm11, %v2541_v48 }
0x13b9   :  { %5016 = vmatprep.mubr.msk.bf16.mxu0 %vm6977_vm1, %v2542_v45 }
0x13c0   :  { %5017 = vmatmul.mubr.msk.bf16.gmra.mrb[68].mxu0 %vm6978_vm2, %v2543_v54  ;;  %v4373_v54 = vld [vmem:[%s6979_s27 + $0x1] sm:$0x1] }
0x13c1   :  { %5048 = vmatprep.mubr.msk.bf16.mxu0 %vm6921_vm14, %v5475_v39  ;;  %vm2178_vm9 = vcmp.gt.f32.partialorder %v4373_v54, 0.5 }
0x13c2   :  { %v2179_v29 = vsel %vm2178_vm9, 1, %v5476_v18 }
0x13c3   :  { %v2183_v52 = vrot.slane %v2179_v29, %v170_v24 }
0x13c5   :  { %vm2184_vm0 = vcmp.eq.s32.totalorder %v2183_v52, 1 }
0x13c6   :  { %vm2187_vm5 = vmand %vm5847_vm12, %vm2184_vm0  ;;  %vm6980_vm12 = vcmask 523264  }
0x13c7   :  { %vm2185_vm13 = vmand %vm5875_vm6, %vm2184_vm0  ;;  %v6453_v30 = vsel %vm2187_vm5, 0.0, %v5477_v17 }
0x13c8   :  { %vm2188_vm11 = vmand %vm5879_vm7, %vm2184_vm0  ;;  %v6459_v24 = vsel %vm2185_vm13, 0.0, %v5477_v17 }
0x13c9   :  { %vm2186_vm1 = vmand %vm5884_vm8, %vm2184_vm0  ;;  %v6462_v18 = vsel %vm2188_vm11, 0.0, %v5477_v17 }
0x13ca   :  { %v6466_v1 = vsel %vm2186_vm1, 0.0, %v5477_v17  ;;  %vm2189_vm6 = vmand %vm5938_vm10, %vm2184_vm0  ;;  %vm6983_vm10 = vnez %v6890_v26 }
0x13cb   :  { %vm6981_vm7 = vmmov %vm6980_vm12  ;;  %v6484_v15 = vsel %vm2189_vm6, 0.0, %v5477_v17 }
0x13cc   :  { %vm2191_vm8 = vmand %vm5921_vm3, %vm2184_vm0 }
0x13cd   :  { %vm2190_vm2 = vmand %vm5964_vm15, %vm2184_vm0  ;;  %v6490_v16 = vsel %vm2191_vm8, 0.0, %v5477_v17 }
0x13ce   :  { %vm6982_vm9 = vmmov %vm6981_vm7  ;;  %v6494_v31 = vsel %vm2190_vm2, 0.0, %v5477_v17 }
0x13cf   :  { %vm2192_vm5 = vmand %vm6983_vm10, %vm2184_vm0 }
0x13d0   :  { %vm6984_vm3 = vmmov %vm6981_vm7  ;;  %v6498_v2 = vsel %vm2192_vm5, 0.0, %v5477_v17 }
0x13d1   :  { %vm6985_vm15 = vmmov %vm6984_vm3 }
0x13d2   :  { %vm6986_vm0 = vmmov %vm6984_vm3 }
0x13d3   :  { %vm6987_vm13 = vmmov %vm6986_vm0 }
0x13d4   :  { %vm6988_vm11 = vmmov %vm6986_vm0 }
0x13d5   :  { %vm6989_vm1 = vmmov %vm6986_vm0 }
0x13d6   :  { %vm6991_vm6 = vmmov %vm6986_vm0 }
0x13d7   :  { %vm6993_vm8 = vmmov %vm6986_vm0 }
0x13d8   :  { %vm6994_vm2 = vmmov %vm6986_vm0 }
0x13d9   :  { %vm6996_vm10 = vmmov %vm6986_vm0 }
0x13da   :  { %vm6997_vm5 = vmmov %vm6986_vm0 }
0x1428   :  { %v5026_v35 = vpop.f32.mrb[72].mxu1 }
0x1429   :  { %v2792_v57 = vpop.f32.mrb[73].mxu1 }
0x142a   :  { %v5027_v40 = vpop.f32.mrb[74].mxu1 }
0x142b   :  { %v2831_v8 = vpack.c.bf16 %v5027_v40, %v5026_v35  ;;  %v2795_v23 = vpop.f32.mrb[75].mxu1 }
0x142c   :  { %v2830_v49 = vpack.c.bf16 %v2795_v23, %v2792_v57 }
0x142e   :  { %5033 = vmatpush3.bf16.msra.mxu1 %v2830_v49 }
0x142f   :  { %5034 = vmatprep.subr.bf16.mxu1 %v5475_v39 }
0x1430   :  { %v5030_v48 = vpop.f32.mrb[76].mxu1 }
0x1431   :  { %v2808_v44 = vpop.f32.mrb[77].mxu1 }
0x1432   :  { %v5031_v27 = vpop.f32.mrb[78].mxu1  ;;  %5035 = vmatpush3.bf16.msra.mxu1 %v2831_v8 }
0x1433   :  { %v2833_v45 = vpack.c.bf16 %v5031_v27, %v5030_v48  ;;  %v2811_v21 = vpop.f32.mrb[79].mxu1  ;;  %5036 = vmatprep.subr.bf16.mxu1 %v5475_v39 }
0x1434   :  { %v2832_v20 = vpack.c.bf16 %v2811_v21, %v2808_v44 }
0x1436   :  { %5037 = vmatpush3.bf16.msra.mxu1 %v2832_v20 }
0x1437   :  { %5038 = vmatprep.subr.bf16.mxu1 %v5475_v39 }
0x143a   :  { %5039 = vmatpush3.bf16.msra.mxu1 %v2833_v45 }
0x143b   :  { %5052 = vmatprep.subr.bf16.mxu1 %v5475_v39 }
0x148b   :  { %v5014_v41 = vpop.f32.mrb[64].mxu0 }
0x148c   :  { %v2615_v60 = vadd.f32 %v5014_v41, %v6453_v30  ;;  %v2606_v61 = vpop.f32.mrb[65].mxu0 }
0x148d   :  { %v5015_v47 = vpop.f32.mrb[66].mxu0  ;;  %v2607_v6 = vadd.f32 %v2606_v61, %v6459_v24 }
0x148e   :  { %v2618_v3 = vadd.f32 %v5015_v47, %v6462_v18  ;;  %v2609_v50 = vpop.f32.mrb[67].mxu0  ;;  %v2643_v55 = vsel %vm6980_vm12, %v2615_v60, -inf  ;;  %vm6990_vm12 = vmmov %vm6986_vm0 }
0x148f   :  { %2644 = vmax.xlane.f32.xlu0 %v2643_v55  ;;  %v2610_v53 = vadd.f32 %v2609_v50, %v6466_v1  ;;  %v2637_v10 = vsel %vm6982_vm9, %v2607_v6, -inf  ;;  %vm6995_vm9 = vmmov %vm6986_vm0 }
0x1490   :  { %v2646_v51 = vsel %vm6981_vm7, %v2618_v3, -inf  ;;  %vm6992_vm7 = vmmov %vm6986_vm0 }
0x1491   :  { %2647 = vmax.xlane.f32.xlu1 %v2646_v51  ;;  %v2640_v42 = vsel %vm6984_vm3, %v2610_v53, -inf  ;;  %vm6998_vm3 = vcmask 261120  }
0x1493   :  { %v5018_v25 = vpop.f32.mrb[68].mxu0  ;;  %2638 = vmax.xlane.f32.xlu0 %v2637_v10 }
0x1494   :  { %v2622_v22 = vpop.f32.mrb[69].mxu0  ;;  %v2631_v26 = vadd.f32 %v5018_v25, %v6490_v16 }
0x1495   :  { %v2623_v33 = vadd.f32 %v2622_v22, %v6484_v15  ;;  %v5019_v34 = vpop.f32.mrb[70].mxu0  ;;  %2641 = vmax.xlane.f32.xlu1 %v2640_v42 }
0x1496   :  { %v2625_v56 = vpop.f32.mrb[71].mxu0  ;;  %v2634_v38 = vadd.f32 %v5019_v34, %v6498_v2  ;;  %v2655_v14 = vsel %vm6987_vm13, %v2631_v26, -inf }
0x1497   :  { %v2626_v5 = vadd.f32 %v2625_v56, %v6494_v31  ;;  %v2649_v58 = vsel %vm6985_vm15, %v2623_v33, -inf  ;;  %vm6999_vm15 = vmmov %vm6998_vm3 }
0x1498   :  { %2650 = vmax.xlane.f32.xlu0 %v2649_v58  ;;  %v2658_v19 = vsel %vm6988_vm11, %v2634_v38, -inf }
0x1499   :  { %v2652_v46 = vsel %vm6986_vm0, %v2626_v5, -inf  ;;  %vm7000_vm0 = vmmov %vm6998_vm3 }
0x149a   :  { %2653 = vmax.xlane.f32.xlu1 %v2652_v46  ;;  %vm7001_vm13 = vmmov %vm7000_vm0 }
0x149b   :  { %vm7002_vm11 = vmmov %vm7000_vm0 }
0x149c   :  { %2656 = vmax.xlane.f32.xlu0 %v2655_v14 }
0x149e   :  { %2659 = vmax.xlane.f32.xlu1 %v2658_v19 }
0x151c   :  { %v2645_v17 = vpop.xlane.xlu0 %2644 }
0x151d   :  { %v2663_v11 = vsub.f32 %v2615_v60, %v2645_v17 }
0x151e   :  { %v2648_v43 = vpop.xlane.xlu1 %2647 }
0x151f   :  { %v2673_v9 = vmul.f32 1.442695, %v2663_v11  ;;  %v2664_v36 = vsub.f32 %v2618_v3, %v2648_v43 }
0x1520   :  { %v2639_v7 = vpop.xlane.xlu0 %2638 }
0x1521   :  { %5361 = vpow2.f32 %v2673_v9  ;;  %v2675_v35 = vmul.f32 1.442695, %v2664_v36  ;;  %v2661_v57 = vsub.f32 %v2607_v6, %v2639_v7 }
0x1522   :  { %v2642_v40 = vpop.xlane.xlu1 %2641 }
0x1523   :  { %5363 = vpow2.f32 %v2675_v35  ;;  %v2669_v8 = vmul.f32 1.442695, %v2661_v57  ;;  %v2662_v23 = vsub.f32 %v2610_v53, %v2642_v40 }
0x1525   :  { %5365 = vpow2.f32 %v2669_v8  ;;  %v2671_v49 = vmul.f32 1.442695, %v2662_v23  ;;  %v2651_v48 = vpop.xlane.xlu0 %2650 }
0x1526   :  { %v2665_v44 = vsub.f32 %v2623_v33, %v2651_v48 }
0x1527   :  { %5367 = vpow2.f32 %v2671_v49  ;;  %v2654_v27 = vpop.xlane.xlu1 %2653 }
0x1528   :  { %v2677_v45 = vmul.f32 1.442695, %v2665_v44  ;;  %v2666_v21 = vsub.f32 %v2626_v5, %v2654_v27 }
0x1529   :  { %v2657_v20 = vpop.xlane.xlu0 %2656 }
0x152a   :  { %5369 = vpow2.f32 %v2677_v45  ;;  %v2679_v54 = vmul.f32 1.442695, %v2666_v21  ;;  %v2667_v29 = vsub.f32 %v2631_v26, %v2657_v20 }
0x152b   :  { %v5362_v52 = vpop.eup %5361  ;;  %v2660_v41 = vpop.xlane.xlu1 %2659 }
0x152c   :  { %5371 = vpow2.f32 %v2679_v54  ;;  %v2681_v60 = vmul.f32 1.442695, %v2667_v29  ;;  %v2668_v61 = vsub.f32 %v2634_v38, %v2660_v41  ;;  %v2691_v47 = vsel %vm6989_vm1, %v5362_v52, 0.0 }
0x152d   :  { %v5364_v6 = vpop.eup %5363  ;;  %2692 = vadd.xlane.f32.xlu0 %v2691_v47 }
0x152e   :  { %5373 = vpow2.f32 %v2681_v60  ;;  %v2683_v3 = vmul.f32 1.442695, %v2668_v61  ;;  %v2694_v50 = vsel %vm6990_vm12, %v5364_v6, 0.0  ;;  %vm7003_vm12 = vmmov %vm7000_vm0 }
0x152f   :  { %v5366_v55 = vpop.eup %5365  ;;  %2695 = vadd.xlane.f32.xlu1 %v2694_v50 }
0x1530   :  { %5375 = vpow2.f32 %v2683_v3  ;;  %v2685_v53 = vsel %vm6991_vm6, %v5366_v55, 0.0  ;;  %vm7004_vm6 = vmmov %vm7000_vm0 }
0x1531   :  { %v5368_v51 = vpop.eup %5367  ;;  %2686 = vadd.xlane.f32.xlu0 %v2685_v53 }
0x1532   :  { %v2688_v10 = vsel %vm6992_vm7, %v5368_v51, 0.0  ;;  %vm7005_vm7 = vmmov %vm7000_vm0 }
0x1533   :  { %2689 = vadd.xlane.f32.xlu1 %v2688_v10 }
0x1534   :  { %v5370_v25 = vpop.eup %5369 }
0x1535   :  { %v2697_v22 = vsel %vm6993_vm8, %v5370_v25, 0.0  ;;  %vm7006_vm8 = vmmov %vm7000_vm0 }
0x1536   :  { %v5372_v42 = vpop.eup %5371  ;;  %2698 = vadd.xlane.f32.xlu0 %v2697_v22 }
0x1537   :  { %v2700_v33 = vsel %vm6994_vm2, %v5372_v42, 0.0  ;;  %vm7007_vm2 = vmmov %vm7000_vm0 }
0x1538   :  { %v5374_v34 = vpop.eup %5373  ;;  %2701 = vadd.xlane.f32.xlu1 %v2700_v33 }
0x1539   :  { %v2703_v56 = vsel %vm6995_vm9, %v5374_v34, 0.0  ;;  %vm7008_vm9 = vmmov %vm7000_vm0 }
0x153a   :  { %v5376_v26 = vpop.eup %5375  ;;  %2704 = vadd.xlane.f32.xlu0 %v2703_v56 }
0x153b   :  { %v2706_v5 = vsel %vm6996_vm10, %v5376_v26, 0.0  ;;  %vm7009_vm10 = vmmov %vm7000_vm0 }
0x153c   :  { %2707 = vadd.xlane.f32.xlu1 %v2706_v5 }
0x15ba   :  { %v2693_v58 = vpop.xlane.xlu0 %2692 }
0x15bb   :  { %5377 = vrcp.f32 %v2693_v58 }
0x15bc   :  { %v2696_v38 = vpop.xlane.xlu1 %2695 }
0x15be   :  { %v2687_v46 = vpop.xlane.xlu0 %2686 }
0x15bf   :  { %5379 = vrcp.f32 %v2687_v46 }
0x15c0   :  { %v2690_v14 = vpop.xlane.xlu1 %2689 }
0x15c1   :  { %5381 = vrcp.f32 %v2690_v14 }
0x15c2   :  { %5383 = vrcp.f32 %v2696_v38 }
0x15c3   :  { %v2699_v19 = vpop.xlane.xlu0 %2698 }
0x15c4   :  { %5385 = vrcp.f32 %v2699_v19 }
0x15c5   :  { %v2702_v17 = vpop.xlane.xlu1 %2701  ;;  %v5378_v9 = vpop.eup %5377 }
0x15c6   :  { %5387 = vrcp.f32 %v2702_v17  ;;  %v2719_v49 = vmul.f32 %v5378_v9, %v5362_v52  ;;  %v4431_v52 = vld [vmem:[%s6816_s11 + $0x2] ss:$0 sm:$0xff] }
0x15c7   :  { %v2705_v11 = vpop.xlane.xlu0 %2704 }
0x15c8   :  { %5389 = vrcp.f32 %v2705_v11  ;;  %v5240_v11 = vld [vmem:[%s6819_s14 + $0x28] sm:$0xff]  }
0x15c9   :  { %v2708_v43 = vpop.xlane.xlu1 %2707  ;;  %v5380_v36 = vpop.eup %5379 }
0x15ca   :  { %5391 = vrcp.f32 %v2708_v43  ;;  %v2717_v40 = vmul.f32 %v5380_v36, %v5366_v55 }
0x15cb   :  { %v5382_v7 = vpop.eup %5381 }
0x15cc   :  { %v5384_v35 = vpop.eup %5383  ;;  %v2718_v8 = vmul.f32 %v5382_v7, %v5368_v51  ;;  %v2823_v21 = vadd.f32 %v2719_v49, %v2717_v40 }
0x15cd   :  { %v2720_v48 = vmul.f32 %v5384_v35, %v5364_v6 }
0x15ce   :  { %v5386_v57 = vpop.eup %5385 }
0x15cf   :  { %v2721_v44 = vmul.f32 %v5386_v57, %v5370_v25  ;;  %v2824_v20 = vadd.f32 %v2720_v48, %v2718_v8  ;;  %v4435_v8 = vld [vmem:[%s6817_s12 + $0x2] ss:$0 sm:$0xff] }
0x15d0   :  { %v5388_v23 = vpop.eup %5387 }
0x15d1   :  { %v2722_v27 = vmul.f32 %v5388_v23, %v5372_v42  ;;  %v2825_v41 = vadd.f32 %v2823_v21, %v2721_v44 }
0x15d2   :  { %v5390_v45 = vpop.eup %5389 }
0x15d3   :  { %v2723_v54 = vmul.f32 %v5390_v45, %v5374_v34  ;;  %v2826_v60 = vadd.f32 %v2824_v20, %v2722_v27  ;;  %v4436_v27 = vld [vmem:[%s6818_s13 + $0x2] ss:$0 sm:$0xff] }
0x15d4   :  { %v5392_v29 = vpop.eup %5391 }
0x15d5   :  { %v2724_v61 = vmul.f32 %v5392_v29, %v5376_v26  ;;  %v2827_v47 = vadd.f32 %v2825_v41, %v2723_v54  ;;  %v5241_v29 = vld [vmem:[%s6821_s16 + $0x40] sm:$0xff]   ;;  %v5242_v41 = vld [vmem:[%s6821_s16 + $0x48] sm:$0xff]  }
0x15d7   :  { %v2828_v3 = vadd.f32 %v2826_v60, %v2724_v61  ;;  %v5243_v60 = vld [vmem:[%s6821_s16 + $0x50] sm:$0xff]   ;;  %v5244_v61 = vld [vmem:[%s6821_s16 + $0x58] sm:$0xff]  }
0x15d9   :  { %v2829_v50 = vpack.c.bf16 %v2828_v3, %v2827_v47  ;;  %v4442_v47 = vld [vmem:[%s6820_s15 + $0x2] ss:$0 sm:$0xff] }
0x15db   :  { %5041 = vmatmul.mubr.msk.bf16.vlgmr.msra.gmra.mrb[80].mxu1 %vm6997_vm5, %v2829_v50  ;;  %vm7010_vm5 = vmmov %vm7000_vm0 }
0x15dc   :  { %5060 = vmatprep.mubr.msk.bf16.mxu1 %vm6921_vm14, %v5475_v39  ;;  %5053 = vmatpush3.bf16.msra.mxu1 %v5241_v29 }
0x15dd   :  { %5054 = vmatprep.subr.bf16.mxu1 %v5475_v39 }
0x15e0   :  { %5055 = vmatpush3.bf16.msra.mxu1 %v5242_v41 }
0x15e1   :  { %5056 = vmatprep.subr.bf16.mxu1 %v5475_v39 }
0x15e4   :  { %5057 = vmatpush3.bf16.msra.mxu1 %v5243_v60 }
0x15e5   :  { %5058 = vmatprep.subr.bf16.mxu1 %v5475_v39 }
0x15e8   :  { %5059 = vmatpush3.bf16.msra.mxu1 %v5244_v61 }
0x16ae   :  { %v2879_v6 = vpop.f32.mrb[80].mxu1 }
0x16af   :  { %v2880_v55 = vadd.f32 %v4431_v52, %v2879_v6  ;;  %v5042_v53 = vpop.f32.mrb[81].mxu1 }
0x16b0   :  { %v2882_v51 = vpop.f32.mrb[82].mxu1 }
0x16b1   :  { %v2883_v10 = vadd.f32 %v4431_v52, %v2882_v51  ;;  %v5043_v25 = vpop.f32.mrb[83].mxu1  ;;  %v2886_v22 = vadd.f32 %v2880_v55, %v6323_v12 }
0x16b3   :  { %v2892_v42 = vsel %vm6998_vm3, %v2886_v22, 0.0  ;;  %v2887_v33 = vadd.f32 %v2883_v10, %v6321_v13  ;;  %v5239_v13 = vld [vmem:[%s6819_s14 + $0x20] sm:$0xff]   ;;  %vm7011_vm3 = vmmov %vm7000_vm0 }
0x16b4   :  { %2893 = vadd.xlane.f32.xlu0 %v2892_v42  ;;  %5045 = vmatpush3.bf16.msra.mxu0 %v5239_v13 }
0x16b5   :  { %v2895_v34 = vsel %vm6999_vm15, %v2887_v33, 0.0  ;;  %5046 = vmatprep.subr.bf16.mxu0 %v5475_v39  ;;  %vm7012_vm15 = vmmov %vm7000_vm0 }
0x16b6   :  { %2896 = vadd.xlane.f32.xlu1 %v2895_v34 }
0x16b8   :  { %5047 = vmatpush3.bf16.msra.mxu0 %v5240_v11 }
0x1741   :  { %v2894_v56 = vpop.xlane.xlu0 %2893 }
0x1742   :  { %v2898_v26 = vmul.f32 0.03125, %v2894_v56 }
0x1743   :  { %v2897_v5 = vpop.xlane.xlu1 %2896 }
0x1744   :  { %v2900_v58 = vsub.f32 %v2886_v22, %v2898_v26  ;;  %v2899_v38 = vmul.f32 0.03125, %v2897_v5 }
0x1746   :  { %v2901_v46 = vsub.f32 %v2887_v33, %v2899_v38  ;;  %v2902_v14 = vmul.f32 %v2900_v58, %v2900_v58 }
0x1748   :  { %v2904_v19 = vsel %vm7000_vm0, %v2902_v14, 0.0  ;;  %v2903_v17 = vmul.f32 %v2901_v46, %v2901_v46 }
0x1749   :  { %2905 = vadd.xlane.f32.xlu0 %v2904_v19 }
0x174a   :  { %v2907_v12 = vsel %vm7001_vm13, %v2903_v17, 0.0  ;;  %vm7013_vm13 = vmmov %vm7000_vm0 }
0x174b   :  { %2908 = vadd.xlane.f32.xlu1 %v2907_v12 }
0x17d6   :  { %v2906_v43 = vpop.xlane.xlu0 %2905 }
0x17d7   :  { %v2910_v9 = vmul.f32 0.03125, %v2906_v43  ;;  %v4455_v43 = vld [vmem:[%s6822_s17 + $0x2] ss:$0 sm:$0xff] }
0x17d8   :  { %v2909_v36 = vpop.xlane.xlu1 %2908 }
0x17d9   :  { %v2912_v7 = vadd.f32 1e-12, %v2910_v9  ;;  %v2911_v35 = vmul.f32 0.03125, %v2909_v36 }
0x17db   :  { %5393 = vrsqrt.f32 %v2912_v7  ;;  %v2913_v57 = vadd.f32 1e-12, %v2911_v35 }
0x17dd   :  { %5395 = vrsqrt.f32 %v2913_v57 }
0x17e5   :  { %v5394_v40 = vpop.eup %5393 }
0x17e6   :  { %v2916_v23 = vmul.f32 %v5394_v40, %v2900_v58 }
0x17e7   :  { %v5396_v49 = vpop.eup %5395 }
0x17e8   :  { %v2924_v48 = vmul.f32 %v4435_v8, %v2916_v23  ;;  %v2917_v44 = vmul.f32 %v5396_v49, %v2901_v46 }
0x17ea   :  { %v2925_v45 = vmul.f32 %v4435_v8, %v2917_v44  ;;  %v2932_v21 = vadd.f32 %v4436_v27, %v2924_v48 }
0x17ec   :  { %v2933_v20 = vadd.f32 %v4436_v27, %v2925_v45 }
0x17ee   :  { %v2939_v54 = vpack.c.bf16 %v2933_v20, %v2932_v21 }
0x17f0   :  { %5049 = vmatmul.mubr.msk.bf16.vlgmr.msra.gmra.mrb[72].mxu0 %vm7002_vm11, %v2939_v54  ;;  %vm7014_vm11 = vmmov %vm7000_vm0 }
0x18c3   :  { %v2997_v3 = vpop.f32.mrb[72].mxu0 }
0x18c4   :  { %v2998_v50 = vadd.f32 %v4442_v47, %v2997_v3  ;;  %v5050_v52 = vpop.f32.mrb[73].mxu0  ;;  %v5246_v3 = vld [vmem:[%s6857_s0 + $0x30] sm:$0xff]  }
0x18c5   :  { %v3000_v6 = vpop.f32.mrb[74].mxu0  ;;  %5064 = vmatprep.subr.bf16.mxu0 %v5246_v3  ;;  %v5248_v52 = vld [vmem:[%s6857_s0 + $0x38] sm:$0xff]  }
0x18c6   :  { %v3006_v55 = vmul.f32 0.044715, %v2998_v50  ;;  %v3001_v53 = vadd.f32 %v4442_v47, %v3000_v6  ;;  %v5051_v51 = vpop.f32.mrb[75].mxu0  ;;  %v3004_v14 = vmul.f32 0.5, %v2998_v50  ;;  %5065 = vmatpush3.bf16.msra.mxu0 %v5246_v3  ;;  %v5249_v6 = vld [vmem:[%s6859_s28 + $0x30] sm:$0xff]  }
0x18c7   :  { %5066 = vmatprep.subr.bf16.mxu0 %v5248_v52 }
0x18c8   :  { %v3008_v10 = vmul.f32 %v3006_v55, %v2998_v50  ;;  %v3007_v25 = vmul.f32 0.044715, %v3001_v53  ;;  %v3005_v19 = vmul.f32 0.5, %v3001_v53 }
0x18ca   :  { %v3010_v22 = vmul.f32 %v3008_v10, %v2998_v50  ;;  %v3009_v42 = vmul.f32 %v3007_v25, %v3001_v53  ;;  %5067 = vmatpush3.bf16.msra.mxu0 %v5248_v52 }
0x18cb   :  { %5088 = vmatprep.subr.bf16.mxu0 %v5249_v6 }
0x18cc   :  { %v3012_v33 = vadd.f32 %v3010_v22, %v2998_v50  ;;  %v3011_v34 = vmul.f32 %v3009_v42, %v3001_v53  ;;  %v5247_v50 = vld [vmem:[%s6858_s3 + $0x38] sm:$0xff]  }
0x18ce   :  { %v3014_v56 = vmul.f32 0.7978846, %v3012_v33  ;;  %v3013_v26 = vadd.f32 %v3011_v34, %v3001_v53  ;;  %v4463_v33 = vld [vmem:[%s6823_s18 + $0x2] ss:$0 sm:$0xff] }
0x18d0   :  { %5397 = vtanh.f32 %v3014_v56  ;;  %v3015_v5 = vmul.f32 0.7978846, %v3013_v26 }
0x18d2   :  { %5399 = vtanh.f32 %v3015_v5 }
0x18da   :  { %v5398_v58 = vpop.eup %5397 }
0x18db   :  { %v3018_v38 = vadd.f32 1.0, %v5398_v58  ;;  %v4464_v58 = vld [vmem:[%s6824_s19 + $0x2] ss:$0 sm:$0xff] }
0x18dc   :  { %v5400_v46 = vpop.eup %5399 }
0x18dd   :  { %v3019_v17 = vadd.f32 1.0, %v5400_v46  ;;  %v3020_v12 = vmul.f32 %v3018_v38, %v3004_v14 }
0x18df   :  { %v3021_v13 = vmul.f32 %v3019_v17, %v3005_v19  ;;  %v5250_v17 = vld [vmem:[%s6859_s28 + $0x38] sm:$0xff]  }
0x18e1   :  { %v3031_v11 = vpack.c.bf16 %v3021_v13, %v3020_v12  ;;  %v5251_v12 = vld [vmem:[%s6815_s10 + $0x30] sm:$0xff]   ;;  %v5252_v13 = vld [vmem:[%s6815_s10 + $0x38] sm:$0xff]  }
0x18e3   :  { %5061 = vmatmul.mubr.msk.bf16.vlgmr.msra.gmra.mrb[84].mxu1 %vm6989_vm1, %v3031_v11  ;;  %vm7015_vm1 = vmmov %vm7000_vm0  ;;  %v4482_v11 = vld [vmem:[%s6862_s30 + $0x3] ss:$0 sm:$0xff] }
0x19b6   :  { %v3101_v9 = vpop.f32.mrb[84].mxu1 }
0x19b7   :  { %v3102_v36 = vadd.f32 %v4455_v43, %v3101_v9  ;;  %v5062_v7 = vpop.f32.mrb[85].mxu1  ;;  %v4470_v9 = vld [vmem:[%s6863_s1 + $0x3] ss:$0 sm:$0xff] }
0x19b8   :  { %v3104_v35 = vpop.f32.mrb[86].mxu1 }
0x19b9   :  { %v3105_v57 = vadd.f32 %v4455_v43, %v3104_v35  ;;  %v5063_v40 = vpop.f32.mrb[87].mxu1  ;;  %v3108_v8 = vadd.f32 %v3102_v36, %v2932_v21 }
0x19bb   :  { %v3114_v23 = vsel %vm7003_vm12, %v3108_v8, 0.0  ;;  %v3109_v49 = vadd.f32 %v3105_v57, %v2933_v20  ;;  %v5245_v20 = vld [vmem:[%s6858_s3 + $0x30] sm:$0xff]   ;;  %vm7016_vm12 = vmmov %vm7000_vm0 }
0x19bc   :  { %3115 = vadd.xlane.f32.xlu0 %v3114_v23  ;;  %5076 = vmatprep.subr.bf16.mxu1 %v5245_v20 }
0x19bd   :  { %v3117_v48 = vsel %vm7004_vm6, %v3109_v49, 0.0  ;;  %5077 = vmatpush3.bf16.msra.mxu1 %v5245_v20  ;;  %vm7017_vm6 = vmmov %vm7000_vm0 }
0x19be   :  { %3118 = vadd.xlane.f32.xlu1 %v3117_v48  ;;  %5078 = vmatprep.subr.bf16.mxu1 %v5247_v50 }
0x19c1   :  { %5079 = vmatpush3.bf16.msra.mxu1 %v5247_v50 }
0x1a49   :  { %v3116_v44 = vpop.xlane.xlu0 %3115 }
0x1a4a   :  { %v3120_v27 = vmul.f32 0.03125, %v3116_v44 }
0x1a4b   :  { %v3119_v45 = vpop.xlane.xlu1 %3118 }
0x1a4c   :  { %v3122_v54 = vsub.f32 %v3108_v8, %v3120_v27  ;;  %v3121_v29 = vmul.f32 0.03125, %v3119_v45 }
0x1a4e   :  { %v3123_v41 = vsub.f32 %v3109_v49, %v3121_v29  ;;  %v3124_v60 = vmul.f32 %v3122_v54, %v3122_v54 }
0x1a50   :  { %v3126_v61 = vsel %vm7005_vm7, %v3124_v60, 0.0  ;;  %v3125_v47 = vmul.f32 %v3123_v41, %v3123_v41  ;;  %vm7018_vm7 = vmmov %vm7000_vm0 }
0x1a51   :  { %3127 = vadd.xlane.f32.xlu0 %v3126_v61 }
0x1a52   :  { %v3129_v21 = vsel %vm7006_vm8, %v3125_v47, 0.0  ;;  %vm7019_vm8 = vmmov %vm7000_vm0 }
0x1a53   :  { %3130 = vadd.xlane.f32.xlu1 %v3129_v21 }
0x1ade   :  { %v3128_v55 = vpop.xlane.xlu0 %3127 }
0x1adf   :  { %v3132_v53 = vmul.f32 0.03125, %v3128_v55 }
0x1ae0   :  { %v3131_v51 = vpop.xlane.xlu1 %3130 }
0x1ae1   :  { %v3134_v10 = vadd.f32 1e-12, %v3132_v53  ;;  %v3133_v25 = vmul.f32 0.03125, %v3131_v51 }
0x1ae3   :  { %5401 = vrsqrt.f32 %v3134_v10  ;;  %v3135_v22 = vadd.f32 1e-12, %v3133_v25 }
0x1ae5   :  { %5403 = vrsqrt.f32 %v3135_v22 }
0x1aed   :  { %v5402_v42 = vpop.eup %5401 }
0x1aee   :  { %v3138_v34 = vmul.f32 %v5402_v42, %v3122_v54 }
0x1aef   :  { %v5404_v56 = vpop.eup %5403 }
0x1af0   :  { %v3146_v26 = vmul.f32 %v4463_v33, %v3138_v34  ;;  %v3139_v5 = vmul.f32 %v5404_v56, %v3123_v41 }
0x1af2   :  { %v3147_v38 = vmul.f32 %v4463_v33, %v3139_v5  ;;  %v6588_v46 = vadd.f32 %v4464_v58, %v3146_v26 }
0x1af4   :  { %v6590_v14 = vadd.f32 %v4464_v58, %v3147_v38 }
0x1af6   :  { %v3161_v19 = vpack.c.bf16 %v6590_v14, %v6588_v46 }
0x1af8   :  { %5068 = vmatprep.mubr.msk.bf16.mxu0 %vm7007_vm2, %v3161_v19  ;;  %5080 = vmatprep.mubr.msk.bf16.mxu1 %vm7008_vm9, %v3161_v19  ;;  %vm7020_vm2 = vmmov %vm7000_vm0 }
0x1af9   :  { %5069 = vmatmul.mubr.msk.bf16.vlgmr.msra.gmra.mrb[76].mxu0 %vm7009_vm10, %v3161_v19  ;;  %5081 = vmatmul.mubr.msk.bf16.vlgmr.msra.gmra.mrb[88].mxu1 %vm7010_vm5, %v3161_v19  ;;  %vm7021_vm9 = vmmov %vm7000_vm0 }
0x1afa   :  { %5072 = vmatprep.mubr.msk.bf16.mxu0 %vm7011_vm3, %v3161_v19  ;;  %5084 = vmatprep.mubr.msk.bf16.mxu1 %vm7012_vm15, %v3161_v19  ;;  %vm7022_vm10 = vmmov %vm7000_vm0 }
0x1afb   :  { %5089 = vmatpush3.bf16.msra.mxu0 %v5249_v6  ;;  %vm7023_vm5 = vmmov %vm7000_vm0 }
0x1afc   :  { %5090 = vmatprep.subr.bf16.mxu0 %v5250_v17  ;;  %vm7024_vm3 = vmmov %vm7000_vm0 }
0x1afd   :  { %vm7025_vm15 = vmmov %vm7000_vm0 }
0x1aff   :  { %5091 = vmatpush3.bf16.msra.mxu0 %v5250_v17 }
0x1b00   :  { %5116 = vmatprep.subr.bf16.mxu0 %v5251_v12 }
0x1b01   :  { %5073 = vmatmul.mubr.msk.bf16.gmra.mrb[80].mxu0 %vm7000_vm0, %v3161_v19  ;;  %5085 = vmatmul.mubr.msk.bf16.gmra.mrb[92].mxu1 %vm7013_vm13, %v3161_v19  ;;  %vm7026_vm13 = vmmov %vm7000_vm0 }
0x1b02   :  { %5092 = vmatprep.mubr.msk.bf16.mxu0 %vm7014_vm11, %v3161_v19  ;;  %vm7027_vm11 = vmmov %vm7000_vm0 }
0x1b09   :  { %5093 = vmatmul.mubr.msk.bf16.vlgmr.msra.gmra.mrb[84].mxu0 %vm7015_vm1, %v3161_v19  ;;  %vm7028_vm1 = vmmov %vm7000_vm0 }
0x1b0a   :  { %5096 = vmatprep.mubr.msk.bf16.mxu0 %vm7016_vm12, %v3161_v19  ;;  %5117 = vmatpush3.bf16.msra.mxu0 %v5251_v12  ;;  %vm7029_vm12 = vmmov %vm7000_vm0 }
0x1b0b   :  { %5118 = vmatprep.subr.bf16.mxu0 %v5252_v13 }
0x1b0e   :  { %5119 = vmatpush3.bf16.msra.mxu0 %v5252_v13 }
0x1b0f   :  { %5128 = vmatprep.subr.bf16.mxu0 %v5475_v39 }
0x1b11   :  { %5097 = vmatmul.mubr.msk.bf16.gmra.mrb[88].mxu0 %vm7017_vm6, %v3161_v19  ;;  %vm7030_vm6 = vmmov %vm7000_vm0 }
0x1bcc   :  { %v5070_v43 = vpop.f32.mrb[76].mxu0  ;;  %v5082_v36 = vpop.f32.mrb[88].mxu1 }
0x1bcd   :  { %v3318_v7 = vadd.f32 %v5082_v36, %v4482_v11  ;;  %v3219_v35 = vpop.f32.mrb[77].mxu0  ;;  %v3309_v57 = vpop.f32.mrb[89].mxu1  ;;  %v6622_v49 = vadd.f32 %v5070_v43, %v4470_v9 }
0x1bce   :  { %v3310_v40 = vadd.f32 %v4482_v11, %v3309_v57  ;;  %v5071_v8 = vpop.f32.mrb[78].mxu0  ;;  %v5083_v23 = vpop.f32.mrb[90].mxu1  ;;  %v3220_v54 = vadd.f32 %v4470_v9, %v3219_v35  ;;  %v4494_v57 = vld [vmem:[%s6814_s9 + $0x3] ss:$0 sm:$0xff] }
0x1bcf   :  { %v6624_v48 = vadd.f32 %v5071_v8, %v4470_v9  ;;  %v3321_v44 = vadd.f32 %v5083_v23, %v4482_v11  ;;  %v3222_v27 = vpop.f32.mrb[79].mxu0  ;;  %v3312_v45 = vpop.f32.mrb[91].mxu1  ;;  %v3342_v60 = vmul.f32 %v5719_v59, %v3318_v7 }
0x1bd0   :  { %v3223_v29 = vadd.f32 %v4470_v9, %v3222_v27  ;;  %v3313_v41 = vadd.f32 %v4482_v11, %v3312_v45  ;;  %v3340_v21 = vmul.f32 %v5723_v62, %v3310_v40 }
0x1bd1   :  { %v3447_v61 = vpack.c.bf16 %v6624_v48, %v6622_v49  ;;  %v3343_v47 = vmul.f32 %v5726_v0, %v3321_v44 }
0x1bd2   :  { %v3446_v20 = vpack.c.bf16 %v3223_v29, %v3220_v54  ;;  %v3341_v3 = vmul.f32 %v5730_v4, %v3313_v41 }
0x1bd3   :  { %v3451_v50 = vpack.c.bf16 %v3343_v47, %v3342_v60 }
0x1bd4   :  { %v3450_v52 = vpack.c.bf16 %v3341_v3, %v3340_v21  ;;  %v5074_v6 = vpop.f32.mrb[80].mxu0  ;;  %v5086_v55 = vpop.f32.mrb[92].mxu1  ;;  %5108 = vmatprep.mubr.msk.bf16.mxu1 %vm7018_vm7, %v3446_v20  ;;  %vm7031_vm7 = vmmov %vm7000_vm0 }
0x1bd5   :  { %v3334_v53 = vadd.f32 %v5086_v55, %v4482_v11  ;;  %v3235_v51 = vpop.f32.mrb[81].mxu0  ;;  %v3325_v10 = vpop.f32.mrb[93].mxu1  ;;  %v6635_v34 = vadd.f32 %v5074_v6, %v4470_v9  ;;  %v3470_v45 = vsel %vm7022_vm10, %v3451_v50, 0 }
0x1bd6   :  { %v3326_v25 = vadd.f32 %v4482_v11, %v3325_v10  ;;  %v5075_v22 = vpop.f32.mrb[82].mxu0  ;;  %v5087_v42 = vpop.f32.mrb[94].mxu1  ;;  %5188 = vmatprep.subr.msk.bf16.mxu1 %vm7019_vm8, %v3450_v52  ;;  %v3467_v33 = vsel %vm7020_vm2, %v3450_v52, 0  ;;  %v3236_v38 = vadd.f32 %v4470_v9, %v3235_v51  ;;  %vm7032_vm8 = vmmov %vm7000_vm0  ;;  %vm7033_vm2 = vcmask 523264  }
0x1bd7   :  { %v6637_v56 = vadd.f32 %v5075_v22, %v4470_v9  ;;  %v3337_v26 = vadd.f32 %v5087_v42, %v4482_v11  ;;  %v3238_v5 = vpop.f32.mrb[83].mxu0  ;;  %v3328_v58 = vpop.f32.mrb[95].mxu1  ;;  %5101 = vmatpush3.bf16.xpose.msra.mxu1 %v3467_v33  ;;  %v3346_v12 = vmul.f32 %v5766_v28, %v3334_v53  ;;  %vm7035_vm10 = vmmov %vm7033_vm2 }
0x1bd8   :  { %v3239_v19 = vadd.f32 %v4470_v9, %v3238_v5  ;;  %v3329_v17 = vadd.f32 %v4482_v11, %v3328_v58  ;;  %5189 = vmatprep.subr.msk.bf16.mxu1 %vm7021_vm9, %v3451_v50  ;;  %v3344_v36 = vmul.f32 %v5770_v32, %v3326_v25  ;;  %vm7034_vm9 = vmmov %vm7033_vm2 }
0x1bd9   :  { %v3449_v13 = vpack.c.bf16 %v6637_v56, %v6635_v34  ;;  %v3347_v43 = vmul.f32 %v5774_v37, %v3337_v26 }
0x1bda   :  { %v3448_v7 = vpack.c.bf16 %v3239_v19, %v3236_v38  ;;  %v3345_v35 = vmul.f32 %v5786_v63, %v3329_v17 }
0x1bdb   :  { %v3453_v9 = vpack.c.bf16 %v3347_v43, %v3346_v12 }
0x1bdc   :  { %v3452_v11 = vpack.c.bf16 %v3345_v35, %v3344_v36  ;;  %v5094_v40 = vpop.f32.mrb[84].mxu0 }
0x1bdd   :  { %v3416_v8 = vadd.f32 %v5094_v40, %v4494_v57  ;;  %v3407_v23 = vpop.f32.mrb[85].mxu0  ;;  %v3476_v56 = vsel %vm7028_vm1, %v3453_v9, 0 }
0x1bde   :  { %v3408_v44 = vadd.f32 %v4494_v57, %v3407_v23  ;;  %v5095_v27 = vpop.f32.mrb[86].mxu0  ;;  %v3473_v10 = vsel %vm7025_vm15, %v3452_v11, 0  ;;  %vm7038_vm15 = vmmov %vm7033_vm2 }
0x1bdf   :  { %v3419_v54 = vadd.f32 %v5095_v27, %v4494_v57  ;;  %v3410_v29 = vpop.f32.mrb[87].mxu0  ;;  %5103 = vmatpush3.bf16.xpose.msra.mxu1 %v3470_v45  ;;  %v3440_v60 = vmul.f32 %v5719_v59, %v3416_v8 }
0x1be0   :  { %v3411_v41 = vadd.f32 %v4494_v57, %v3410_v29  ;;  %5190 = vmatprep.subr.msk.bf16.mxu1 %vm7023_vm5, %v3452_v11  ;;  %v3438_v21 = vmul.f32 %v5723_v62, %v3408_v44  ;;  %vm7036_vm5 = vmmov %vm7033_vm2 }
0x1be1   :  { %v3441_v47 = vmul.f32 %v5726_v0, %v3419_v54 }
0x1be2   :  { %v3439_v20 = vmul.f32 %v5730_v4, %v3411_v41 }
0x1be3   :  { %v3637_v3 = vpack.c.bf16 %v3441_v47, %v3440_v60 }
0x1be4   :  { %v3636_v52 = vpack.c.bf16 %v3439_v20, %v3438_v21  ;;  %v5098_v6 = vpop.f32.mrb[88].mxu0 }
0x1be5   :  { %v3432_v55 = vadd.f32 %v5098_v6, %v4494_v57  ;;  %v3423_v53 = vpop.f32.mrb[89].mxu0 }
0x1be6   :  { %v3424_v50 = vadd.f32 %v4494_v57, %v3423_v53  ;;  %v5099_v51 = vpop.f32.mrb[90].mxu0  ;;  %5120 = vmatprep.mubr.msk.bf16.mxu0 %vm7024_vm3, %v3636_v52  ;;  %vm7037_vm3 = vmmov %vm7033_vm2 }
0x1be7   :  { %v3435_v25 = vadd.f32 %v5099_v51, %v4494_v57  ;;  %v3426_v22 = vpop.f32.mrb[91].mxu0  ;;  %5105 = vmatpush3.bf16.xpose.msra.mxu1 %v3473_v10  ;;  %5121 = vmatmul.mubr.msk.bf16.vlgmr.msra.gmra.mrb[92].mxu0 %vm7000_vm0, %v3637_v3  ;;  %v3444_v62 = vmul.f32 %v5766_v28, %v3432_v55  ;;  %vm7039_vm0 = vmmov %vm7033_vm2 }
0x1be8   :  { %v3427_v59 = vadd.f32 %v4494_v57, %v3426_v22  ;;  %5191 = vmatprep.subr.msk.bf16.mxu1 %vm7026_vm13, %v3453_v9  ;;  %v3442_v4 = vmul.f32 %v5770_v32, %v3424_v50  ;;  %vm7040_vm13 = vmmov %vm7039_vm0 }
0x1be9   :  { %v3445_v0 = vmul.f32 %v5774_v37, %v3435_v25  ;;  %vm7042_vm1 = vmmov %vm7039_vm0 }
0x1bea   :  { %v3443_v42 = vmul.f32 %v5786_v63, %v3427_v59 }
0x1beb   :  { %v3639_v33 = vpack.c.bf16 %v3445_v0, %v3444_v62 }
0x1bec   :  { %v3638_v34 = vpack.c.bf16 %v3443_v42, %v3442_v4 }
0x1bee   :  { %5124 = vmatprep.mubr.msk.bf16.mxu0 %vm7027_vm11, %v3638_v34  ;;  %vm7041_vm11 = vmmov %vm7039_vm0 }
0x1bef   :  { %5107 = vmatpush3.bf16.xpose.msra.mxu1 %v3476_v56  ;;  %5125 = vmatmul.mubr.msk.bf16.gmra.mrb[96].mxu0 %vm7029_vm12, %v3639_v33  ;;  %vm7043_vm12 = vmmov %vm7039_vm0 }
0x1bf0   :  { %5136 = vmatprep.mubr.msk.bf16.mxu0 %vm6921_vm14, %v5475_v39  ;;  %5148 = vmatprep.subr.bf16.mxu1 %v5475_v39 }
0x1bf6   :  { %5109 = vmatmul.mubr.msk.bf16.vlgmr.msra.gmra.mrb[96].mxu1 %vm7030_vm6, %v3447_v61  ;;  %vm7044_vm6 = vmmov %vm7039_vm0 }
0x1bf7   :  { %5112 = vmatprep.mubr.msk.bf16.mxu1 %vm7031_vm7, %v3448_v7  ;;  %vm7045_vm7 = vmmov %vm7039_vm0 }
0x1bfe   :  { %5113 = vmatmul.mubr.msk.bf16.gmra.mrb[100].mxu1 %vm7032_vm8, %v3449_v13  ;;  %vm7046_vm8 = vmmov %vm7039_vm0 }
0x1bff   :  { %5156 = vmatprep.mubr.msk.bf16.mxu1 %vm6921_vm14, %v5475_v39 }
0x1cba   :  { %v5122_v28 = vpop.f32.mrb[92].mxu0 }
0x1cbb   :  { %v3698_v32 = vpop.f32.mrb[93].mxu0 }
0x1cbc   :  { %v5123_v37 = vpop.f32.mrb[94].mxu0 }
0x1cbd   :  { %v3737_v63 = vpack.c.bf16 %v5123_v37, %v5122_v28  ;;  %v3701_v26 = vpop.f32.mrb[95].mxu0 }
0x1cbe   :  { %v3736_v5 = vpack.c.bf16 %v3701_v26, %v3698_v32 }
0x1cc0   :  { %5129 = vmatpush3.bf16.msra.mxu0 %v3736_v5 }
0x1cc1   :  { %5130 = vmatprep.subr.bf16.mxu0 %v5475_v39 }
0x1cc2   :  { %v5126_v58 = vpop.f32.mrb[96].mxu0 }
0x1cc3   :  { %v3714_v49 = vpop.f32.mrb[97].mxu0 }
0x1cc4   :  { %v5127_v48 = vpop.f32.mrb[98].mxu0  ;;  %5131 = vmatpush3.bf16.msra.mxu0 %v3737_v63 }
0x1cc5   :  { %v3739_v61 = vpack.c.bf16 %v5127_v48, %v5126_v58  ;;  %v3717_v38 = vpop.f32.mrb[99].mxu0  ;;  %5132 = vmatprep.subr.bf16.mxu0 %v5475_v39 }
0x1cc6   :  { %v3738_v19 = vpack.c.bf16 %v3717_v38, %v3714_v49 }
0x1cc8   :  { %5133 = vmatpush3.bf16.msra.mxu0 %v3738_v19 }
0x1cc9   :  { %v5110_v17 = vpop.f32.mrb[96].mxu1  ;;  %5134 = vmatprep.subr.bf16.mxu0 %v5475_v39 }
0x1cca   :  { %v3521_v12 = vadd.f32 %v5110_v17, %v6453_v30  ;;  %v3512_v13 = vpop.f32.mrb[97].mxu1 }
0x1ccb   :  { %v5111_v43 = vpop.f32.mrb[98].mxu1  ;;  %v3513_v36 = vadd.f32 %v3512_v13, %v6459_v24 }
0x1ccc   :  { %v3524_v7 = vadd.f32 %v5111_v43, %v6462_v18  ;;  %v3515_v35 = vpop.f32.mrb[99].mxu1  ;;  %5135 = vmatpush3.bf16.msra.mxu0 %v3739_v61  ;;  %v3549_v57 = vsel %vm7033_vm2, %v3521_v12, -inf  ;;  %vm7047_vm2 = vmmov %vm7039_vm0 }
0x1ccd   :  { %3550 = vmax.xlane.f32.xlu0 %v3549_v57  ;;  %5140 = vmatprep.subr.bf16.mxu0 %v5475_v39  ;;  %v3516_v9 = vadd.f32 %v3515_v35, %v6466_v1  ;;  %v3543_v30 = vsel %vm7035_vm10, %v3513_v36, -inf  ;;  %vm7049_vm10 = vmmov %vm7039_vm0 }
0x1cce   :  { %v3552_v11 = vsel %vm7034_vm9, %v3524_v7, -inf  ;;  %vm7048_vm9 = vmmov %vm7039_vm0 }
0x1ccf   :  { %3553 = vmax.xlane.f32.xlu1 %v3552_v11  ;;  %v3546_v24 = vsel %vm7036_vm5, %v3516_v9, -inf  ;;  %vm7050_vm5 = vcmask 261120  }
0x1cd1   :  { %v5114_v40 = vpop.f32.mrb[100].mxu1  ;;  %3544 = vmax.xlane.f32.xlu0 %v3543_v30 }
0x1cd2   :  { %v3528_v8 = vpop.f32.mrb[101].mxu1  ;;  %v3537_v27 = vadd.f32 %v5114_v40, %v6490_v16 }
0x1cd3   :  { %v3529_v18 = vadd.f32 %v3528_v8, %v6484_v15  ;;  %v5115_v23 = vpop.f32.mrb[102].mxu1  ;;  %3547 = vmax.xlane.f32.xlu1 %v3546_v24 }
0x1cd4   :  { %v3531_v44 = vpop.f32.mrb[103].mxu1  ;;  %v3540_v54 = vadd.f32 %v5115_v23, %v6498_v2  ;;  %v3561_v41 = vsel %vm7039_vm0, %v3537_v27, -inf }
0x1cd5   :  { %v3532_v45 = vadd.f32 %v3531_v44, %v6494_v31  ;;  %v3555_v1 = vsel %vm7037_vm3, %v3529_v18, -inf  ;;  %vm7051_vm3 = vmmov %vm7050_vm5 }
0x1cd6   :  { %3556 = vmax.xlane.f32.xlu0 %v3555_v1  ;;  %v3564_v15 = vsel %vm7040_vm13, %v3540_v54, -inf  ;;  %vm7053_vm0 = vmmov %vm7051_vm3 }
0x1cd7   :  { %v3558_v29 = vsel %vm7038_vm15, %v3532_v45, -inf  ;;  %vm7052_vm15 = vmmov %vm7051_vm3 }
0x1cd8   :  { %3559 = vmax.xlane.f32.xlu1 %v3558_v29  ;;  %vm7054_vm13 = vmmov %vm7053_vm0 }
0x1cda   :  { %3562 = vmax.xlane.f32.xlu0 %v3561_v41 }
0x1cdc   :  { %3565 = vmax.xlane.f32.xlu1 %v3564_v15 }
0x1d5a   :  { %v3551_v60 = vpop.xlane.xlu0 %3550 }
0x1d5b   :  { %v3569_v47 = vsub.f32 %v3521_v12, %v3551_v60 }
0x1d5c   :  { %v3554_v21 = vpop.xlane.xlu1 %3553 }
0x1d5d   :  { %v3579_v16 = vmul.f32 1.442695, %v3569_v47  ;;  %v3570_v20 = vsub.f32 %v3524_v7, %v3554_v21 }
0x1d5e   :  { %v3545_v31 = vpop.xlane.xlu0 %3544 }
0x1d5f   :  { %5405 = vpow2.f32 %v3579_v16  ;;  %v3581_v3 = vmul.f32 1.442695, %v3570_v20  ;;  %v3567_v52 = vsub.f32 %v3513_v36, %v3545_v31 }
0x1d60   :  { %v3548_v6 = vpop.xlane.xlu1 %3547 }
0x1d61   :  { %5407 = vpow2.f32 %v3581_v3  ;;  %v3575_v2 = vmul.f32 1.442695, %v3567_v52  ;;  %v3568_v55 = vsub.f32 %v3516_v9, %v3548_v6 }
0x1d63   :  { %5409 = vpow2.f32 %v3575_v2  ;;  %v3577_v53 = vmul.f32 1.442695, %v3568_v55  ;;  %v3557_v50 = vpop.xlane.xlu0 %3556  ;;  %v4516_v55 = vld [vmem:[%s6816_s11 + $0x3] ss:$0 sm:$0xff] }
0x1d64   :  { %v3571_v51 = vsub.f32 %v3529_v18, %v3557_v50 }
0x1d65   :  { %5411 = vpow2.f32 %v3577_v53  ;;  %v3560_v10 = vpop.xlane.xlu1 %3559 }
0x1d66   :  { %v3583_v25 = vmul.f32 1.442695, %v3571_v51  ;;  %v3572_v22 = vsub.f32 %v3532_v45, %v3560_v10 }
0x1d67   :  { %v3563_v59 = vpop.xlane.xlu0 %3562 }
0x1d68   :  { %5413 = vpow2.f32 %v3583_v25  ;;  %v3585_v62 = vmul.f32 1.442695, %v3572_v22  ;;  %v3573_v0 = vsub.f32 %v3537_v27, %v3563_v59 }
0x1d69   :  { %v5406_v4 = vpop.eup %5405  ;;  %v3566_v42 = vpop.xlane.xlu1 %3565 }
0x1d6a   :  { %5415 = vpow2.f32 %v3585_v62  ;;  %v3587_v33 = vmul.f32 1.442695, %v3573_v0  ;;  %v3574_v34 = vsub.f32 %v3540_v54, %v3566_v42  ;;  %v3597_v56 = vsel %vm7041_vm11, %v5406_v4, 0.0  ;;  %vm7055_vm11 = vmmov %vm7042_vm1 }
0x1d6b   :  { %v5408_v28 = vpop.eup %5407  ;;  %3598 = vadd.xlane.f32.xlu0 %v3597_v56 }
0x1d6c   :  { %5417 = vpow2.f32 %v3587_v33  ;;  %v3589_v32 = vmul.f32 1.442695, %v3574_v34  ;;  %v3600_v37 = vsel %vm7042_vm1, %v5408_v28, 0.0  ;;  %vm7056_vm1 = vmmov %vm7053_vm0 }
0x1d6d   :  { %v5410_v63 = vpop.eup %5409  ;;  %3601 = vadd.xlane.f32.xlu1 %v3600_v37 }
0x1d6e   :  { %5419 = vpow2.f32 %v3589_v32  ;;  %v3591_v26 = vsel %vm7043_vm12, %v5410_v63, 0.0  ;;  %vm7057_vm12 = vmmov %vm7053_vm0 }
0x1d6f   :  { %v5412_v5 = vpop.eup %5411  ;;  %3592 = vadd.xlane.f32.xlu0 %v3591_v26 }
0x1d70   :  { %v3594_v58 = vsel %vm7044_vm6, %v5412_v5, 0.0  ;;  %vm7059_vm6 = vmmov %vm7053_vm0 }
0x1d71   :  { %3595 = vadd.xlane.f32.xlu1 %v3594_v58 }
0x1d72   :  { %v5414_v49 = vpop.eup %5413 }
0x1d73   :  { %v3603_v48 = vsel %vm7045_vm7, %v5414_v49, 0.0  ;;  %vm7060_vm7 = vcmask 1040384  }
0x1d74   :  { %v5416_v61 = vpop.eup %5415  ;;  %3604 = vadd.xlane.f32.xlu0 %v3603_v48 }
0x1d75   :  { %v3606_v38 = vsel %vm7046_vm8, %v5416_v61, 0.0  ;;  %vm7061_vm8 = vmmov %vm7053_vm0 }
0x1d76   :  { %v5418_v19 = vpop.eup %5417  ;;  %3607 = vadd.xlane.f32.xlu1 %v3606_v38 }
0x1d77   :  { %v3609_v17 = vsel %vm7047_vm2, %v5418_v19, 0.0  ;;  %vm7062_vm2 = vmmov %vm7053_vm0 }
0x1d78   :  { %v5420_v12 = vpop.eup %5419  ;;  %3610 = vadd.xlane.f32.xlu0 %v3609_v17 }
0x1d79   :  { %v3612_v13 = vsel %vm7048_vm9, %v5420_v12, 0.0 }
0x1d7a   :  { %3613 = vadd.xlane.f32.xlu1 %v3612_v13 }
0x1df8   :  { %v3599_v43 = vpop.xlane.xlu0 %3598 }
0x1df9   :  { %5421 = vrcp.f32 %v3599_v43 }
0x1dfa   :  { %v3602_v36 = vpop.xlane.xlu1 %3601 }
0x1dfc   :  { %v3593_v7 = vpop.xlane.xlu0 %3592 }
0x1dfd   :  { %5423 = vrcp.f32 %v3593_v7 }
0x1dfe   :  { %v3596_v35 = vpop.xlane.xlu1 %3595 }
0x1dff   :  { %5425 = vrcp.f32 %v3596_v35  ;;  %v4521_v35 = vld [vmem:[%s6818_s13 + $0x3] ss:$0 sm:$0xff] }
0x1e00   :  { %5427 = vrcp.f32 %v3602_v36 }
0x1e01   :  { %v3605_v57 = vpop.xlane.xlu0 %3604 }
0x1e02   :  { %5429 = vrcp.f32 %v3605_v57 }
0x1e03   :  { %v3608_v9 = vpop.xlane.xlu1 %3607  ;;  %v5422_v40 = vpop.eup %5421 }
0x1e04   :  { %5431 = vrcp.f32 %v3608_v9  ;;  %v3625_v1 = vmul.f32 %v5422_v40, %v5406_v4  ;;  %v5255_v40 = vld [vmem:[%s6821_s16 + $0x60] sm:$0xff]  }
0x1e05   :  { %v3611_v11 = vpop.xlane.xlu0 %3610  ;;  %5149 = vmatpush3.bf16.msra.mxu1 %v5255_v40 }
0x1e06   :  { %5433 = vrcp.f32 %v3611_v11  ;;  %5150 = vmatprep.subr.bf16.mxu1 %v5475_v39 }
0x1e07   :  { %v3614_v30 = vpop.xlane.xlu1 %3613  ;;  %v5424_v8 = vpop.eup %5423 }
0x1e08   :  { %5435 = vrcp.f32 %v3614_v30  ;;  %v3623_v44 = vmul.f32 %v5424_v8, %v5410_v63  ;;  %v5256_v8 = vld [vmem:[%s6821_s16 + $0x68] sm:$0xff]  }
0x1e09   :  { %v5426_v24 = vpop.eup %5425  ;;  %5151 = vmatpush3.bf16.msra.mxu1 %v5256_v8 }
0x1e0a   :  { %v5428_v18 = vpop.eup %5427  ;;  %v3624_v27 = vmul.f32 %v5426_v24, %v5412_v5  ;;  %v3729_v60 = vadd.f32 %v3625_v1, %v3623_v44  ;;  %v5254_v5 = vld [vmem:[%s6819_s14 + $0x38] sm:$0xff]   ;;  %5152 = vmatprep.subr.bf16.mxu1 %v5475_v39  ;;  %v5257_v24 = vld [vmem:[%s6821_s16 + $0x70] sm:$0xff]  }
0x1e0b   :  { %v3626_v54 = vmul.f32 %v5428_v18, %v5408_v28  ;;  %v5258_v18 = vld [vmem:[%s6821_s16 + $0x78] sm:$0xff]  }
0x1e0c   :  { %v5430_v23 = vpop.eup %5429 }
0x1e0d   :  { %v3627_v29 = vmul.f32 %v5430_v23, %v5414_v49  ;;  %v3730_v47 = vadd.f32 %v3626_v54, %v3624_v27  ;;  %5153 = vmatpush3.bf16.msra.mxu1 %v5257_v24  ;;  %v4527_v23 = vld [vmem:[%s6820_s15 + $0x3] ss:$0 sm:$0xff] }
0x1e0e   :  { %v5432_v45 = vpop.eup %5431  ;;  %5154 = vmatprep.subr.bf16.mxu1 %v5475_v39 }
0x1e0f   :  { %v3628_v41 = vmul.f32 %v5432_v45, %v5416_v61  ;;  %v3731_v20 = vadd.f32 %v3729_v60, %v3627_v29 }
0x1e10   :  { %v5434_v15 = vpop.eup %5433 }
0x1e11   :  { %v3629_v21 = vmul.f32 %v5434_v15, %v5418_v19  ;;  %v3732_v31 = vadd.f32 %v3730_v47, %v3628_v41  ;;  %5155 = vmatpush3.bf16.msra.mxu1 %v5258_v18  ;;  %v4549_v18 = vld [vmem:[%s6824_s19 + $0x3] ss:$0 sm:$0xff] }
0x1e12   :  { %v5436_v16 = vpop.eup %5435  ;;  %5168 = vmatprep.subr.bf16.mxu1 %v5475_v39 }
0x1e13   :  { %v3630_v3 = vmul.f32 %v5436_v16, %v5420_v12  ;;  %v3733_v52 = vadd.f32 %v3731_v20, %v3629_v21  ;;  %v4520_v12 = vld [vmem:[%s6817_s12 + $0x3] ss:$0 sm:$0xff] }
0x1e15   :  { %v3734_v6 = vadd.f32 %v3732_v31, %v3630_v3 }
0x1e17   :  { %v3735_v2 = vpack.c.bf16 %v3734_v6, %v3733_v52 }
0x1e19   :  { %5137 = vmatmul.mubr.msk.bf16.vlgmr.msra.gmra.mrb[100].mxu0 %vm7049_vm10, %v3735_v2 }
0x1e1a   :  { %5144 = vmatprep.mubr.msk.bf16.mxu0 %vm6921_vm14, %v5475_v39 }
0x1eec   :  { %v3785_v53 = vpop.f32.mrb[100].mxu0 }
0x1eed   :  { %v3786_v50 = vadd.f32 %v4516_v55, %v3785_v53  ;;  %v5138_v51 = vpop.f32.mrb[101].mxu0 }
0x1eee   :  { %v3788_v10 = vpop.f32.mrb[102].mxu0 }
0x1eef   :  { %v3789_v25 = vadd.f32 %v4516_v55, %v3788_v10  ;;  %v5139_v22 = vpop.f32.mrb[103].mxu0  ;;  %v3792_v59 = vadd.f32 %v3786_v50, %v6588_v46 }
0x1ef1   :  { %v3798_v62 = vsel %vm7050_vm5, %v3792_v59, 0.0  ;;  %v3793_v0 = vadd.f32 %v3789_v25, %v6590_v14  ;;  %v5253_v14 = vld [vmem:[%s6819_s14 + $0x30] sm:$0xff]   ;;  %s5479_s14 = smov [#allocation2]  }
0x1ef2   :  { %3799 = vadd.xlane.f32.xlu0 %v3798_v62  ;;  %5141 = vmatpush3.bf16.msra.mxu0 %v5253_v14  ;;  %s4212_s5 = sshll.u32 %s5479_s14, 4  ;;  %s4213_s5 = int_to_ptr.vmem [resolvable:$true] %s4212_s5 }
0x1ef3   :  { %v3801_v4 = vsel %vm7051_vm3, %v3793_v0, 0.0  ;;  %5142 = vmatprep.subr.bf16.mxu0 %v5475_v39  ;;  %p5456_p1 = scmp.lt.s32.totalorder %s4213_s5, %s4213_s5 }
0x1ef4   :  { %3802 = vadd.xlane.f32.xlu1 %v3801_v4 }
0x1ef6   :  { %5143 = vmatpush3.bf16.msra.mxu0 %v5254_v5 }
0x1ef7   :  { %5160 = vmatprep.subr.bf16.mxu0 %v5475_v39 }
0x1f7f   :  { %v3800_v42 = vpop.xlane.xlu0 %3799 }
0x1f80   :  { %v3804_v33 = vmul.f32 0.03125, %v3800_v42 }
0x1f81   :  { %v3803_v34 = vpop.xlane.xlu1 %3802 }
0x1f82   :  { %v3806_v56 = vsub.f32 %v3792_v59, %v3804_v33  ;;  %v3805_v28 = vmul.f32 0.03125, %v3803_v34  ;;  %v4540_v59 = vld [vmem:[%s6822_s17 + $0x3] ss:$0 sm:$0xff] }
0x1f84   :  { %v3807_v32 = vsub.f32 %v3793_v0, %v3805_v28  ;;  %v3808_v37 = vmul.f32 %v3806_v56, %v3806_v56 }
0x1f86   :  { %v3810_v63 = vsel %vm7052_vm15, %v3808_v37, 0.0  ;;  %v3809_v26 = vmul.f32 %v3807_v32, %v3807_v32 }
0x1f87   :  { %3811 = vadd.xlane.f32.xlu0 %v3810_v63 }
0x1f88   :  { %v3813_v46 = vsel %vm7053_vm0, %v3809_v26, 0.0 }
0x1f89   :  { %3814 = vadd.xlane.f32.xlu1 %v3813_v46 }
0x2014   :  { %v3812_v58 = vpop.xlane.xlu0 %3811 }
0x2015   :  { %v3816_v49 = vmul.f32 0.03125, %v3812_v58 }
0x2016   :  { %v3815_v48 = vpop.xlane.xlu1 %3814 }
0x2017   :  { %v3818_v61 = vadd.f32 1e-12, %v3816_v49  ;;  %v3817_v38 = vmul.f32 0.03125, %v3815_v48 }
0x2019   :  { %5437 = vrsqrt.f32 %v3818_v61  ;;  %v3819_v19 = vadd.f32 1e-12, %v3817_v38 }
0x201b   :  { %5439 = vrsqrt.f32 %v3819_v19  ;;  %v5259_v19 = vld [vmem:[%s6825_s20 + $0x10] sm:$0xff]  }
0x2023   :  { %v5438_v17 = vpop.eup %5437 }
0x2024   :  { %v3822_v13 = vmul.f32 %v5438_v17, %v3806_v56  ;;  %v5260_v17 = vld [vmem:[%s6825_s20 + $0x18] sm:$0xff]  }
0x2025   :  { %v5440_v43 = vpop.eup %5439 }
0x2026   :  { %v3830_v36 = vmul.f32 %v4520_v12, %v3822_v13  ;;  %v3823_v7 = vmul.f32 %v5440_v43, %v3807_v32 }
0x2028   :  { %v3831_v57 = vmul.f32 %v4520_v12, %v3823_v7  ;;  %v3838_v9 = vadd.f32 %v4521_v35, %v3830_v36 }
0x202a   :  { %v3839_v11 = vadd.f32 %v4521_v35, %v3831_v57 }
0x202c   :  { %v3845_v30 = vpack.c.bf16 %v3839_v11, %v3838_v9 }
0x202e   :  { %5145 = vmatmul.mubr.msk.bf16.vlgmr.msra.gmra.mrb[104].mxu0 %vm7054_vm13, %v3845_v30  ;;  %v4548_v30 = vld [vmem:[%s6823_s18 + $0x3] ss:$0 sm:$0xff] }
0x202f   :  { %5164 = vmatprep.mubr.msk.bf16.mxu0 %vm6921_vm14, %v5475_v39  ;;  %5161 = vmatpush3.bf16.msra.mxu0 %v5259_v19 }
0x2030   :  { %5162 = vmatprep.subr.bf16.mxu0 %v5475_v39 }
0x2033   :  { %5163 = vmatpush3.bf16.msra.mxu0 %v5260_v17 }
0x2101   :  { %v3903_v44 = vpop.f32.mrb[104].mxu0 }
0x2102   :  { %v3904_v27 = vadd.f32 %v4527_v23, %v3903_v44  ;;  %v5146_v45 = vpop.f32.mrb[105].mxu0 }
0x2103   :  { %v3906_v1 = vpop.f32.mrb[106].mxu0 }
0x2104   :  { %v3912_v54 = vmul.f32 0.044715, %v3904_v27  ;;  %v3907_v29 = vadd.f32 %v4527_v23, %v3906_v1  ;;  %v5147_v41 = vpop.f32.mrb[107].mxu0  ;;  %v3910_v53 = vmul.f32 0.5, %v3904_v27 }
0x2105   :  { %v4555_v41 = vld [vmem:[%s6826_s21 + $0x1] ss:$0 sm:$0xff]  ;;  %s5451_s21 = scalar_lea.vmem %s4213_s5, 64 }
0x2106   :  { %v3914_v15 = vmul.f32 %v3912_v54, %v3904_v27  ;;  %v3913_v60 = vmul.f32 0.044715, %v3907_v29  ;;  %v3911_v50 = vmul.f32 0.5, %v3907_v29  ;;  %v5261_v54 = vld [vmem:[%s6827_s22 + $0x10] sm:$0xff]   ;;  %p5452_p0 = scmp.ne.s32.totalorder %s4213_s5, %s5451_s21  ;;  %p5457_p2 = scmp.lt.s32.totalorder %s5451_s21, %s5451_s21 }
0x2108   :  { %v3916_v47 = vmul.f32 %v3914_v15, %v3904_v27  ;;  %v3915_v21 = vmul.f32 %v3913_v60, %v3907_v29  ;;  %p5458_p3 = por %p5457_p2, %p5456_p1 }
0x210a   :  { %v3918_v16 = vadd.f32 %v3916_v47, %v3904_v27  ;;  %v3917_v20 = vmul.f32 %v3915_v21, %v3907_v29  ;;  %p5459_p4 = pnand %p5458_p3, %p5452_p0 }
0x210c   :  { %v3920_v31 = vmul.f32 0.7978846, %v3918_v16  ;;  %v3919_v3 = vadd.f32 %v3917_v20, %v3907_v29  ;;  %v5262_v29 = vld [vmem:[%s6827_s22 + $0x18] sm:$0xff]  }
0x210e   :  { %5441 = vtanh.f32 %v3920_v31  ;;  %v3921_v52 = vmul.f32 0.7978846, %v3919_v3 }
0x2110   :  { %5443 = vtanh.f32 %v3921_v52 }
0x2118   :  { %v5442_v6 = vpop.eup %5441 }
0x2119   :  { %v3924_v2 = vadd.f32 1.0, %v5442_v6 }
0x211a   :  { %v5444_v55 = vpop.eup %5443 }
0x211b   :  { %v3925_v51 = vadd.f32 1.0, %v5444_v55  ;;  %v3926_v10 = vmul.f32 %v3924_v2, %v3910_v53 }
0x211d   :  { %v3927_v25 = vmul.f32 %v3925_v51, %v3911_v50 }
0x211f   :  { %v3937_v22 = vpack.c.bf16 %v3927_v25, %v3926_v10 }
0x2121   :  { %5157 = vmatmul.mubr.msk.bf16.vlgmr.msra.gmra.mrb[104].mxu1 %vm7055_vm11, %v3937_v22 }
0x2122   :  { %5172 = vmatprep.mubr.msk.bf16.mxu1 %vm6921_vm14, %v5475_v39  ;;  %vm7058_vm14 = vmmov %vm7053_vm0  ;;  %5169 = vmatpush3.bf16.msra.mxu1 %v5261_v54 }
0x2123   :  { %5170 = vmatprep.subr.bf16.mxu1 %v5475_v39  ;;  %v4564_v39 = vld [vmem:[%s6828_s23 + $0x1] ss:$0 sm:$0xff] }
0x2126   :  { %5171 = vmatpush3.bf16.msra.mxu1 %v5262_v29 }
0x21f4   :  { %v4007_v62 = vpop.f32.mrb[104].mxu1 }
0x21f5   :  { %v4008_v0 = vadd.f32 %v4540_v59, %v4007_v62  ;;  %v5158_v4 = vpop.f32.mrb[105].mxu1 }
0x21f6   :  { %v4010_v42 = vpop.f32.mrb[106].mxu1 }
0x21f7   :  { %v4014_v33 = vadd.f32 %v4008_v0, %v3838_v9  ;;  %v4011_v34 = vadd.f32 %v4540_v59, %v4010_v42  ;;  %v5159_v56 = vpop.f32.mrb[107].mxu1 }
0x21f9   :  { %v4015_v28 = vadd.f32 %v4011_v34, %v3839_v11  ;;  %v4020_v32 = vsel %vm7056_vm1, %v4014_v33, 0.0 }
0x21fa   :  { %4021 = vadd.xlane.f32.xlu1 %v4020_v32 }
0x21fb   :  { %v4023_v37 = vsel %vm7057_vm12, %v4015_v28, 0.0 }
0x21fc   :  { %4024 = vadd.xlane.f32.xlu0 %v4023_v37 }
0x2287   :  { %v4022_v63 = vpop.xlane.xlu1 %4021 }
0x2288   :  { %v4026_v26 = vmul.f32 0.03125, %v4022_v63 }
0x2289   :  { %v4025_v46 = vpop.xlane.xlu0 %4024 }
0x228a   :  { %v4028_v14 = vsub.f32 %v4014_v33, %v4026_v26  ;;  %v4027_v5 = vmul.f32 0.03125, %v4025_v46 }
0x228c   :  { %v4029_v58 = vsub.f32 %v4015_v28, %v4027_v5  ;;  %v4030_v49 = vmul.f32 %v4028_v14, %v4028_v14 }
0x228e   :  { %v4032_v48 = vsel %vm7058_vm14, %v4030_v49, 0.0  ;;  %v4031_v61 = vmul.f32 %v4029_v58, %v4029_v58 }
0x228f   :  { %4033 = vadd.xlane.f32.xlu1 %v4032_v48 }
0x2290   :  { %v4035_v38 = vsel %vm7059_vm6, %v4031_v61, 0.0 }
0x2291   :  { %4036 = vadd.xlane.f32.xlu0 %v4035_v38 }
0x231c   :  { %v4034_v12 = vpop.xlane.xlu1 %4033 }
0x231d   :  { %v4038_v13 = vmul.f32 0.03125, %v4034_v12 }
0x231e   :  { %v4037_v43 = vpop.xlane.xlu0 %4036 }
0x231f   :  { %v4040_v36 = vadd.f32 1e-12, %v4038_v13  ;;  %v4039_v7 = vmul.f32 0.03125, %v4037_v43 }
0x2321   :  { %5445 = vrsqrt.f32 %v4040_v36  ;;  %v4041_v35 = vadd.f32 1e-12, %v4039_v7 }
0x2323   :  { %5447 = vrsqrt.f32 %v4041_v35 }
0x232b   :  { %v5446_v57 = vpop.eup %5445 }
0x232c   :  { %v4044_v9 = vmul.f32 %v5446_v57, %v4028_v14 }
0x232d   :  { %v5448_v11 = vpop.eup %5447 }
0x232e   :  { %v4045_v40 = vmul.f32 %v5448_v11, %v4029_v58  ;;  %v4052_v8 = vmul.f32 %v4548_v30, %v4044_v9 }
0x2330   :  { %v4053_v24 = vmul.f32 %v4548_v30, %v4045_v40  ;;  %v4060_v44 = vadd.f32 %v4549_v18, %v4052_v8 }
0x2332   :  { %v4061_v23 = vadd.f32 %v4549_v18, %v4053_v24 }
0x2334   :  { %v4063_v27 = vrot.slane %v4061_v23, 7 }
0x2336   :  { %v4065_v45 = vsel %vm7060_vm7, %v4060_v44, %v4063_v27 }
0x2337   :  { %v4071_v1 = vpack.c.bf16 %v4065_v45, %v4065_v45 }
0x2339   :  { %5165 = vmatmul.mubr.msk.bf16.vlgmr.msra.gmra.mrb[108].mxu0 %vm7061_vm8, %v4071_v1 }
0x240c   :  { %v4129_v15 = vpop.f32.mrb[108].mxu0 }
0x240d   :  { %v4130_v60 = vadd.f32 %v4555_v41, %v4129_v15  ;;  %v5166_v47 = vpop.f32.mrb[109].mxu0 }
0x240e   :  { %v4132_v21 = vpop.f32.mrb[110].mxu0 }
0x240f   :  { %5449 = vtanh.f32 %v4130_v60  ;;  %v5167_v16 = vpop.f32.mrb[111].mxu0 }
0x2419   :  { %v5450_v20 = vpop.eup %5449 }
0x241a   :  { %v4141_v31 = vpack.c.bf16 %v5450_v20, %v5450_v20 }
0x241c   :  { %5173 = vmatmul.mubr.msk.bf16.vlgmr.msra.gmra.mrb[108].mxu1 %vm7062_vm2, %v4141_v31 }
0x24ef   :  { %v4199_v3 = vpop.f32.mrb[108].mxu1 }
0x24f0   :  { %v4200_v52 = vadd.f32 %v4564_v39, %v4199_v3  ;;  %v5174_v6 = vpop.f32.mrb[109].mxu1 }
0x24f1   :  { %v4202_v2 = vpop.f32.mrb[110].mxu1 }
0x24f2   :  { %4206 = vst.msk [vmem:[#allocation2 + $0x2] sm:$0x3] %vm2174_vm4, %v4200_v52  ;;  %v5175_v55 = vpop.f32.mrb[111].mxu1 }
0x24f3   :  { %5462 = shalt.err (!%p5459_p4)
}
0x24f4   :  { %s7063_s25 = sld [smem:[#allocation14_spill]] }
0x24fa   :  { %s5463_s13 = scalar_lea.hbm %s7063_s25, 64 }
0x24fb   :  { %p5464_p5 = scmp.ne.s32.totalorder %s7063_s25, %s5463_s13  ;;  %p5467_p6 = scmp.lt.u32.totalorder %s5463_s13, %s7063_s25 }
0x24fd   :  { %p5469_p7 = pnand %p5467_p6, %p5464_p5 }
0x24ff   :  { %5472 = shalt.err (!%p5469_p7)
}
0x2500   :  { %s5480_s24 = smov 32   ;;  %s5481_s7 = smov 2  }
0x2501   :  { %4218 = dma.vmem_to_hbm [thread:$0]  %s4213_s5, 64, %s7063_s25, [#allocation3], %s5480_s24, %s5480_s24, %s5481_s7  }
0x2502   :  { %5473 = dma.done.wait [#allocation3], 64  }
0x2503   :  { %5474 = vsyncadd [#allocation3], 4294967232 }
0x2504   :  { %4222 = vsyncpa [#allocation3], 1 }

</bundles_post_ra>
